<compile_context>
chip_gen: v7x
topology: tpu7x:2x2x1
jax: 0.10.0
libtpu: 0.0.40
codegen_flags: <defaults>
</compile_context>

<pallas_src>
import functools

import jax
import jax.numpy as jnp
from jax.experimental import pallas as pl
from jax.experimental.pallas import tpu as pltpu

LANE = 128


def _round_up(x, m):
    return (x + m - 1) // m * m


def _pad2(x, rows, cols, dtype):
    x = x.astype(dtype)
    if x.shape == (rows, cols):
        return x
    return jnp.zeros((rows, cols), dtype).at[: x.shape[0], : x.shape[1]].set(x)


# ------------------------- tiled matmul + fused epilogue -------------------------

def _mm_kernel(a_ref, b_ref, bias_ref, *rest, relu, res_mode):
    """acc = A @ B; epilogue: +bias, optional residual (direct add or a second
    small matmul for the fused 1x1-downsample), optional relu."""
    if res_mode == "add":
        res_ref, o_ref, acc_ref = rest
    elif res_mode == "mm":
        ra_ref, rb_ref, rbias_ref, o_ref, acc_ref = rest
    else:
        o_ref, acc_ref = rest
    k = pl.program_id(2)

    @pl.when(k == 0)
    def _():
        acc_ref[...] = jnp.zeros_like(acc_ref)

    acc_ref[...] += jnp.dot(a_ref[...], b_ref[...],
                            preferred_element_type=jnp.float32)

    @pl.when(k == pl.num_programs(2) - 1)
    def _():
        out = acc_ref[...] + bias_ref[...]
        if res_mode == "add":
            out = out + res_ref[...]
        elif res_mode == "mm":
            out = out + jnp.dot(ra_ref[...], rb_ref[...],
                                preferred_element_type=jnp.float32) + rbias_ref[...]
        if relu:
            out = jnp.maximum(out, 0.0)
        o_ref[...] = out.astype(o_ref.dtype)


def matmul_bias(a, b, bias, residual=None, res_mm=None, relu=False):
    """relu?( a @ b + bias (+ residual | + ra @ rb + rbias) ).

    a:(M,K), b:(K,N), bias:(N,).
    residual: optional (M, N or Np) f32 tensor added in the epilogue.
    res_mm:   optional (ra:(M,Kd), rb:(Kd,N), rbias:(N,)) - a second, small
              matmul computed in the epilogue (used to fuse the 1x1 downsample
              conv of the residual branch; its blocks depend only on (i, j) so
              Pallas does not re-DMA them across the k reduction).
    Operands are cast to bf16 for the MXU; accumulation / epilogue in f32.
    Returns (M, Np) with N zero-padded to a multiple of 128 (lane-dense).
    """
    M, K = a.shape
    K2, N = b.shape
    assert K == K2

    Np = _round_up(N, LANE)
    Kp = _round_up(K, LANE)
    if M <= 512:
        tm = _round_up(M, 8)
        Mp = tm
    else:
        tm = 256
        Mp = _round_up(M, tm)
    tn = 256 if Np % 256 == 0 else 128
    tk = next(c for c in (512, 384, 256, 128) if Kp % c == 0)

    a_p = _pad2(a, Mp, Kp, jnp.bfloat16)
    b_p = _pad2(b, Kp, Np, jnp.bfloat16)
    bias_p = _pad2(bias.reshape(1, -1), 1, Np, jnp.float32)

    in_specs = [
        pl.BlockSpec((tm, tk), lambda i, j, k: (i, k)),
        pl.BlockSpec((tk, tn), lambda i, j, k: (k, j)),
        pl.BlockSpec((1, tn), lambda i, j, k: (0, j)),
    ]
    args = [a_p, b_p, bias_p]

    if res_mm is not None:
        ra, rb, rbias = res_mm
        assert ra.shape[0] == M and rb.shape[0] == ra.shape[1]
        Kdp = _round_up(ra.shape[1], LANE)
        args += [_pad2(ra, Mp, Kdp, jnp.bfloat16),
                 _pad2(rb, Kdp, Np, jnp.bfloat16),
                 _pad2(rbias.reshape(1, -1), 1, Np, jnp.float32)]
        in_specs += [pl.BlockSpec((tm, Kdp), lambda i, j, k: (i, 0)),
                     pl.BlockSpec((Kdp, tn), lambda i, j, k: (0, j)),
                     pl.BlockSpec((1, tn), lambda i, j, k: (0, j))]
        res_mode = "mm"
    elif residual is not None:
        args.append(_pad2(residual, Mp, Np, jnp.float32))
        in_specs.append(pl.BlockSpec((tm, tn), lambda i, j, k: (i, j)))
        res_mode = "add"
    else:
        res_mode = "none"

    out = pl.pallas_call(
        functools.partial(_mm_kernel, relu=relu, res_mode=res_mode),
        out_shape=jax.ShapeDtypeStruct((Mp, Np), jnp.float32),
        grid=(Mp // tm, Np // tn, Kp // tk),
        in_specs=in_specs,
        out_specs=pl.BlockSpec((tm, tn), lambda i, j, k: (i, j)),
        scratch_shapes=[pltpu.VMEM((tm, tn), jnp.float32)],
        compiler_params=pltpu.CompilerParams(
            dimension_semantics=("parallel", "parallel", "arbitrary")),
    )(*args)
    return out[:M]


# --------------------- fused maxpool + BN-affine + relu kernel --------------------

def _maxpool_bn_relu_kernel(*refs):
    *win_refs, scale_ref, shift_ref, o_ref = refs
    m = win_refs[0][...]
    for w_ref in win_refs[1:]:
        m = jnp.maximum(m, w_ref[...])
    o_ref[...] = jnp.maximum(m * scale_ref[...] + shift_ref[...], 0.0)


def maxpool_bn_relu(x, k, stride, scale, shift):
    """x: NHWC (C lane-padded to 128). MaxPool2d(k, stride) then eval-mode BN
    affine (per-channel scale/shift) and relu, fused in one lane-dense kernel."""
    n, h, w, c = x.shape
    ho = (h - k) // stride + 1
    wo = (w - k) // stride + 1
    wins = [
        x[:, dh:dh + (ho - 1) * stride + 1:stride,
             dw:dw + (wo - 1) * stride + 1:stride, :].reshape(-1, c)
        for dh in range(k) for dw in range(k)
    ]
    m = n * ho * wo
    tr = min(512, _round_up(m, 8))
    mp = _round_up(m, tr)
    if mp != m:
        wins = [jnp.zeros((mp, c), jnp.float32).at[:m].set(wv) for wv in wins]
    scale2 = scale.reshape(1, c).astype(jnp.float32)
    shift2 = shift.reshape(1, c).astype(jnp.float32)

    win_specs = [pl.BlockSpec((tr, c), lambda i: (i, 0)) for _ in wins]
    vec_spec = pl.BlockSpec((1, c), lambda i: (0, 0))
    out = pl.pallas_call(
        _maxpool_bn_relu_kernel,
        out_shape=jax.ShapeDtypeStruct((mp, c), jnp.float32),
        grid=(mp // tr,),
        in_specs=win_specs + [vec_spec, vec_spec],
        out_specs=pl.BlockSpec((tr, c), lambda i: (i, 0)),
        compiler_params=pltpu.CompilerParams(dimension_semantics=("parallel",)),
    )(*wins, scale2, shift2)
    return out[:m].reshape(n, ho, wo, c)


# -------------------------------- conv via im2col ---------------------------------

def _im2col(x, kh, kw, stride, padding):
    n, h, w, c = x.shape
    xp = jnp.pad(x, ((0, 0), (padding, padding), (padding, padding), (0, 0)))
    hp, wp = h + 2 * padding, w + 2 * padding
    ho = (hp - kh) // stride + 1
    wo = (wp - kw) // stride + 1
    cols = [
        xp[:, dh:dh + (ho - 1) * stride + 1:stride,
              dw:dw + (wo - 1) * stride + 1:stride, :]
        for dh in range(kh) for dw in range(kw)
    ]
    a = jnp.concatenate(cols, axis=-1).reshape(n * ho * wo, kh * kw * c)
    return a, ho, wo


def conv2d_mm(x, w, b, stride, padding, relu=False, residual=None, res_mm=None):
    """x: NHWC (input channels must match w's IC, which may include zero-weight
    padded channels). w: PyTorch layout (OC, IC, KH, KW). Output NHWC with OC
    zero-padded to a multiple of 128 (lane-dense)."""
    n, _, _, c = x.shape
    oc, ic, kh, kw = w.shape
    assert ic == c
    a, ho, wo = _im2col(x.astype(jnp.bfloat16), kh, kw, stride, padding)
    bmat = jnp.transpose(w, (2, 3, 1, 0)).reshape(kh * kw * ic, oc)
    out = matmul_bias(a, bmat, b, residual=residual, res_mm=res_mm, relu=relu)
    return out.reshape(n, ho, wo, out.shape[1])


def fold_bn(w, b, gamma, beta, mean, var, eps=1e-5):
    """Fold an eval-mode BatchNorm2d directly after a conv into (w, b). Exact."""
    scale = gamma / jnp.sqrt(var + eps)
    return w * scale[:, None, None, None], (b - mean) * scale + beta


# ---------------------------------- Block8 forward --------------------------------

def block8_forward(x_nchw, params, stride=1, eps=1e-5):
    """Eval-mode Block8 forward. x_nchw: (N, in_f, H, W) f32 -> (N, out_f, Ho, Wo)."""
    x = jnp.transpose(x_nchw, (0, 2, 3, 1)).astype(jnp.float32)   # NCHW -> NHWC
    in_f = x.shape[-1]
    w1, b1 = params["conv1"]
    out_f = w1.shape[0]
    cpad = _round_up(out_f, LANE)

    # conv1 (k=3, s=1, p=2): im2col + tiled matmul, OC padded to 128 lanes.
    y = conv2d_mm(x, w1, b1, stride=1, padding=2)          # (N, H+2, W+2, cpad)

    # maxpool(k=3, s=stride) + bn1 + relu fused (lane-dense elementwise kernel).
    g1, be1, m1, v1 = params["bn1"]
    scale1 = g1 / jnp.sqrt(v1 + eps)
    shift1 = be1 - m1 * scale1
    scale1 = jnp.zeros((cpad,), jnp.float32).at[:out_f].set(scale1)
    shift1 = jnp.zeros((cpad,), jnp.float32).at[:out_f].set(shift1)
    y = maxpool_bn_relu(y, 3, stride, scale1, shift1)      # (N, Ho, Wo, cpad)

    # conv2 (k=3, s=1, p=1) with bn2 folded in; residual add + relu fused in the
    # matmul epilogue (Dropout2d(0.5) is identity in eval mode).
    w2, b2 = fold_bn(*params["conv2"], *params["bn2"], eps=eps)
    w2p = jnp.zeros((out_f, cpad, 3, 3), jnp.float32).at[:, :out_f].set(w2)

    if params.get("downsample") is not None:
        # Residual branch = 1x1 stride-s conv, computed inside the conv2
        # epilogue as a small extra MXU matmul (no separate kernel launch,
        # no HBM round-trip of the residual tensor).
        wd, bd = params["downsample"]
        a_res, _, _ = _im2col(x.astype(jnp.bfloat16), 1, 1, stride, 0)  # (M, in_f)
        b_res = jnp.transpose(wd, (2, 3, 1, 0)).reshape(in_f, out_f)
        y = conv2d_mm(y, w2p, b2, stride=1, padding=1, relu=True,
                      res_mm=(a_res, b_res, bd))
    else:
        # identity residual (requires stride == 1 and in_f == out_f, as in torch);
        # added exactly in f32 inside the epilogue.
        iden = jnp.zeros(x.shape[:3] + (cpad,), jnp.float32).at[..., :in_f].set(x)
        y = conv2d_mm(y, w2p, b2, stride=1, padding=1, relu=True,
                      residual=iden.reshape(-1, cpad))

    y = y[..., :out_f]                                     # drop channel padding
    return jnp.transpose(y, (0, 3, 1, 2))                  # NHWC -> NCHW


# ------------------------------------ params --------------------------------------

def init_block8_params(key, in_f, out_f, with_downsample):
    keys = iter(jax.random.split(key, 16))

    def conv(oc, ic, k):
        fan = ic * k * k
        w = jax.random.normal(next(keys), (oc, ic, k, k), jnp.float32) / fan ** 0.5
        b = 0.01 * jax.random.normal(next(keys), (oc,), jnp.float32)
        return w, b

    def bn(c):
        gamma = 1.0 + 0.1 * jax.random.normal(next(keys), (c,), jnp.float32)
        beta = 0.1 * jax.random.normal(next(keys), (c,), jnp.float32)
        mean = 0.1 * jax.random.normal(next(keys), (c,), jnp.float32)
        var = 0.5 + jnp.abs(jax.random.normal(next(keys), (c,), jnp.float32))
        return gamma, beta, mean, var

    return dict(conv1=conv(out_f, in_f, 3), bn1=bn(out_f),
                conv2=conv(out_f, out_f, 3), bn2=bn(out_f),
                downsample=conv(out_f, in_f, 1) if with_downsample else None)


# ------------------------------------- main ----------------------------------------

if __name__ == "__main__":
    key = jax.random.PRNGKey(0)
    k1, k2, kx1, kx2 = jax.random.split(key, 4)

    fwd = jax.jit(block8_forward, static_argnames=("stride",))

    # Config A: stride=2 with a 1x1-conv downsample (how Block8 is used in OrangeNet8).
    N, IN_F, OUT_F, H, W = 2, 8, 16, 24, 24
    params_a = init_block8_params(k1, IN_F, OUT_F, with_downsample=True)
    x_a = jax.random.normal(kx1, (N, IN_F, H, W), jnp.float32)
    out_a = jax.block_until_ready(fwd(x_a, params_a, stride=2))
    assert out_a.shape == (N, OUT_F, (H - 1) // 2 + 1, (W - 1) // 2 + 1), out_a.shape
    assert bool(jnp.all(jnp.isfinite(out_a)))
    assert bool(jnp.all(out_a >= 0.0))          # final relu

    # Config B: module defaults (stride=1, downsample=None, in_f == out_f).
    C, H2 = 16, 16
    params_b = init_block8_params(k2, C, C, with_downsample=False)
    x_b = jax.random.normal(kx2, (N, C, H2, H2), jnp.float32)
    out_b = jax.block_until_ready(fwd(x_b, params_b, stride=1))
    assert out_b.shape == (N, C, H2, H2), out_b.shape
    assert bool(jnp.all(jnp.isfinite(out_b)))
    assert bool(jnp.all(out_b >= 0.0))          # final relu

    print("KERNEL_OK")
</pallas_src>

<mosaic_0001>
module attributes {stable_mosaic.version = 11 : i64} {
  func.func @_mm_kernel(%arg0: i32, %arg1: i32, %arg2: i32, %arg3: memref<256x128xbf16, #tpu.memory_space<vmem>>, %arg4: memref<128x128xbf16, #tpu.memory_space<vmem>>, %arg5: memref<1x128xf32, #tpu.memory_space<vmem>>, %arg6: memref<256x128xf32, #tpu.memory_space<vmem>>, %arg7: memref<256x128xf32, #tpu.memory_space<vmem>>) attributes {dimension_semantics = [#tpu.dimension_semantics<parallel>, #tpu.dimension_semantics<parallel>, #tpu.dimension_semantics<arbitrary>], iteration_bounds = array<i64: 6, 1, 1>, scalar_prefetch = 0 : i64, scratch_operands = 1 : i64, tpu.core_type = #tpu.core_type<tc>, window_params = [{transform_indices = @transform_0, window_bounds = array<i64: 256, 128>}, {transform_indices = @transform_1, window_bounds = array<i64: 128, 128>}, {transform_indices = @transform_2, window_bounds = array<i64: 1, 128>}, {transform_indices = @transform_3, window_bounds = array<i64: 256, 128>}]} {
    %c0_i32 = arith.constant 0 : i32
    %0 = arith.cmpi eq, %arg2, %c0_i32 : i32
    %1 = arith.extui %0 : i1 to i32
    %c0_i32_0 = arith.constant 0 : i32
    %2 = arith.cmpi ne, %1, %c0_i32_0 : i32
    scf.if %2 {
      %cst_10 = arith.constant 0.000000e+00 : f32
      %12 = vector.broadcast %cst_10 : f32 to vector<256x128xf32>
      %c0_11 = arith.constant 0 : index
      %c0_12 = arith.constant 0 : index
      %13 = vector.load %arg7[%c0_11, %c0_12] : memref<256x128xf32, #tpu.memory_space<vmem>>, vector<256x128xf32>
      tpu.vector_store %arg7[%c0_11, %c0_12], %12 {strides = array<i32>} : memref<256x128xf32, #tpu.memory_space<vmem>>, vector<256x128xf32>,
    } else {
    }
    %c0 = arith.constant 0 : index
    %c0_1 = arith.constant 0 : index
    %3 = vector.load %arg7[%c0, %c0_1] : memref<256x128xf32, #tpu.memory_space<vmem>>, vector<256x128xf32>
    %c0_2 = arith.constant 0 : index
    %c0_3 = arith.constant 0 : index
    %4 = vector.load %arg3[%c0_2, %c0_3] : memref<256x128xbf16, #tpu.memory_space<vmem>>, vector<256x128xbf16>
    %c0_4 = arith.constant 0 : index
    %c0_5 = arith.constant 0 : index
    %5 = vector.load %arg4[%c0_4, %c0_5] : memref<128x128xbf16, #tpu.memory_space<vmem>>, vector<128x128xbf16>
    %cst = arith.constant dense<0.000000e+00> : vector<256x128xf32>
    %6 = tpu.matmul %4, %5, %cst {dimension_numbers = #tpu.dot_dimension_numbers<[1], [0], [0], [1], [0, 0, 1, 1], [], []>} : vector<256x128xbf16>, vector<128x128xbf16>, vector<256x128xf32> -> vector<256x128xf32>
    %7 = arith.addf %3, %6 : vector<256x128xf32>
    %c0_6 = arith.constant 0 : index
    %c0_7 = arith.constant 0 : index
    %8 = vector.load %arg7[%c0_6, %c0_7] : memref<256x128xf32, #tpu.memory_space<vmem>>, vector<256x128xf32>
    tpu.vector_store %arg7[%c0_6, %c0_7], %7 {strides = array<i32>} : memref<256x128xf32, #tpu.memory_space<vmem>>, vector<256x128xf32>,
    %c0_i32_8 = arith.constant 0 : i32
    %9 = arith.cmpi eq, %arg2, %c0_i32_8 : i32
    %10 = arith.extui %9 : i1 to i32
    %c0_i32_9 = arith.constant 0 : i32
    %11 = arith.cmpi ne, %10, %c0_i32_9 : i32
    scf.if %11 {
      %c0_10 = arith.constant 0 : index
      %c0_11 = arith.constant 0 : index
      %12 = vector.load %arg7[%c0_10, %c0_11] : memref<256x128xf32, #tpu.memory_space<vmem>>, vector<256x128xf32>
      %c0_12 = arith.constant 0 : index
      %c0_13 = arith.constant 0 : index
      %13 = vector.load %arg5[%c0_12, %c0_13] : memref<1x128xf32, #tpu.memory_space<vmem>>, vector<1x128xf32>
      %14 = vector.broadcast %13 : vector<1x128xf32> to vector<256x128xf32>
      %15 = arith.addf %12, %14 : vector<256x128xf32>
      %c0_14 = arith.constant 0 : index
      %c0_15 = arith.constant 0 : index
      %16 = vector.load %arg6[%c0_14, %c0_15] : memref<256x128xf32, #tpu.memory_space<vmem>>, vector<256x128xf32>
      tpu.vector_store %arg6[%c0_14, %c0_15], %15 {strides = array<i32>} : memref<256x128xf32, #tpu.memory_space<vmem>>, vector<256x128xf32>,
    } else {
    }
    return
  }
  func.func @transform_0(%arg0: i32, %arg1: i32, %arg2: i32) -> (i32, i32) {
    %c0_i32 = arith.constant 0 : i32
    return %arg0, %arg2 : i32, i32
  }
  func.func @transform_1(%arg0: i32, %arg1: i32, %arg2: i32) -> (i32, i32) {
    %c0_i32 = arith.constant 0 : i32
    return %arg2, %arg1 : i32, i32
  }
  func.func @transform_2(%arg0: i32, %arg1: i32, %arg2: i32) -> (i32, i32) {
    %c0_i32 = arith.constant 0 : i32
    %c0_i32_0 = arith.constant 0 : i32
    return %c0_i32, %arg1 : i32, i32
  }
  func.func @transform_3(%arg0: i32, %arg1: i32, %arg2: i32) -> (i32, i32) {
    %c0_i32 = arith.constant 0 : i32
    return %arg0, %arg1 : i32, i32
  }
}

module attributes {stable_mosaic.version = 11 : i64} {
  func.func @_maxpool_bn_relu_kernel(%arg0: i32, %arg1: memref<288x128xf32, #tpu.memory_space<vmem>>, %arg2: memref<288x128xf32, #tpu.memory_space<vmem>>, %arg3: memref<288x128xf32, #tpu.memory_space<vmem>>, %arg4: memref<288x128xf32, #tpu.memory_space<vmem>>, %arg5: memref<288x128xf32, #tpu.memory_space<vmem>>, %arg6: memref<288x128xf32, #tpu.memory_space<vmem>>, %arg7: memref<288x128xf32, #tpu.memory_space<vmem>>, %arg8: memref<288x128xf32, #tpu.memory_space<vmem>>, %arg9: memref<288x128xf32, #tpu.memory_space<vmem>>, %arg10: memref<1x128xf32, #tpu.memory_space<vmem>>, %arg11: memref<1x128xf32, #tpu.memory_space<vmem>>, %arg12: memref<288x128xf32, #tpu.memory_space<vmem>>) attributes {dimension_semantics = [#tpu.dimension_semantics<parallel>], iteration_bounds = array<i64: 1>, scalar_prefetch = 0 : i64, scratch_operands = 0 : i64, tpu.core_type = #tpu.core_type<tc>, window_params = [{transform_indices = @transform_0, window_bounds = array<i64: 288, 128>}, {transform_indices = @transform_1, window_bounds = array<i64: 288, 128>}, {transform_indices = @transform_2, window_bounds = array<i64: 288, 128>}, {transform_indices = @transform_3, window_bounds = array<i64: 288, 128>}, {transform_indices = @transform_4, window_bounds = array<i64: 288, 128>}, {transform_indices = @transform_5, window_bounds = array<i64: 288, 128>}, {transform_indices = @transform_6, window_bounds = array<i64: 288, 128>}, {transform_indices = @transform_7, window_bounds = array<i64: 288, 128>}, {transform_indices = @transform_8, window_bounds = array<i64: 288, 128>}, {pipeline_mode = #tpu.pipeline_mode<synchronous>, transform_indices = @transform_9, window_bounds = array<i64: 1, 128>}, {pipeline_mode = #tpu.pipeline_mode<synchronous>, transform_indices = @transform_10, window_bounds = array<i64: 1, 128>}, {transform_indices = @transform_11, window_bounds = array<i64: 288, 128>}]} {
    %c0 = arith.constant 0 : index
    %c0_0 = arith.constant 0 : index
    %0 = vector.load %arg1[%c0, %c0_0] : memref<288x128xf32, #tpu.memory_space<vmem>>, vector<288x128xf32>
    %c0_1 = arith.constant 0 : index
    %c0_2 = arith.constant 0 : index
    %1 = vector.load %arg2[%c0_1, %c0_2] : memref<288x128xf32, #tpu.memory_space<vmem>>, vector<288x128xf32>
    %2 = arith.maximumf %0, %1 : vector<288x128xf32>
    %c0_3 = arith.constant 0 : index
    %c0_4 = arith.constant 0 : index
    %3 = vector.load %arg3[%c0_3, %c0_4] : memref<288x128xf32, #tpu.memory_space<vmem>>, vector<288x128xf32>
    %4 = arith.maximumf %2, %3 : vector<288x128xf32>
    %c0_5 = arith.constant 0 : index
    %c0_6 = arith.constant 0 : index
    %5 = vector.load %arg4[%c0_5, %c0_6] : memref<288x128xf32, #tpu.memory_space<vmem>>, vector<288x128xf32>
    %6 = arith.maximumf %4, %5 : vector<288x128xf32>
    %c0_7 = arith.constant 0 : index
    %c0_8 = arith.constant 0 : index
    %7 = vector.load %arg5[%c0_7, %c0_8] : memref<288x128xf32, #tpu.memory_space<vmem>>, vector<288x128xf32>
    %8 = arith.maximumf %6, %7 : vector<288x128xf32>
    %c0_9 = arith.constant 0 : index
    %c0_10 = arith.constant 0 : index
    %9 = vector.load %arg6[%c0_9, %c0_10] : memref<288x128xf32, #tpu.memory_space<vmem>>, vector<288x128xf32>
    %10 = arith.maximumf %8, %9 : vector<288x128xf32>
    %c0_11 = arith.constant 0 : index
    %c0_12 = arith.constant 0 : index
    %11 = vector.load %arg7[%c0_11, %c0_12] : memref<288x128xf32, #tpu.memory_space<vmem>>, vector<288x128xf32>
    %12 = arith.maximumf %10, %11 : vector<288x128xf32>
    %c0_13 = arith.constant 0 : index
    %c0_14 = arith.constant 0 : index
    %13 = vector.load %arg8[%c0_13, %c0_14] : memref<288x128xf32, #tpu.memory_space<vmem>>, vector<288x128xf32>
    %14 = arith.maximumf %12, %13 : vector<288x128xf32>
    %c0_15 = arith.constant 0 : index
    %c0_16 = arith.constant 0 : index
    %15 = vector.load %arg9[%c0_15, %c0_16] : memref<288x128xf32, #tpu.memory_space<vmem>>, vector<288x128xf32>
    %16 = arith.maximumf %14, %15 : vector<288x128xf32>
    %c0_17 = arith.constant 0 : index
    %c0_18 = arith.constant 0 : index
    %17 = vector.load %arg10[%c0_17, %c0_18] : memref<1x128xf32, #tpu.memory_space<vmem>>, vector<1x128xf32>
    %18 = vector.broadcast %17 : vector<1x128xf32> to vector<288x128xf32>
    %19 = arith.mulf %16, %18 : vector<288x128xf32>
    %c0_19 = arith.constant 0 : index
    %c0_20 = arith.constant 0 : index
    %20 = vector.load %arg11[%c0_19, %c0_20] : memref<1x128xf32, #tpu.memory_space<vmem>>, vector<1x128xf32>
    %21 = vector.broadcast %20 : vector<1x128xf32> to vector<288x128xf32>
    %22 = arith.addf %19, %21 : vector<288x128xf32>
    %cst = arith.constant 0.000000e+00 : f32
    %23 = vector.broadcast %cst : f32 to vector<288x128xf32>
    %24 = arith.maximumf %22, %23 : vector<288x128xf32>
    %c0_21 = arith.constant 0 : index
    %c0_22 = arith.constant 0 : index
    %25 = vector.load %arg12[%c0_21, %c0_22] : memref<288x128xf32, #tpu.memory_space<vmem>>, vector<288x128xf32>
    tpu.vector_store %arg12[%c0_21, %c0_22], %24 {strides = array<i32>} : memref<288x128xf32, #tpu.memory_space<vmem>>, vector<288x128xf32>,
    return
  }
  func.func @transform_0(%arg0: i32) -> (i32, i32) {
    %c0_i32 = arith.constant 0 : i32
    %c0_i32_0 = arith.constant 0 : i32
    return %arg0, %c0_i32 : i32, i32
  }
  func.func @transform_1(%arg0: i32) -> (i32, i32) {
    %c0_i32 = arith.constant 0 : i32
    %c0_i32_0 = arith.constant 0 : i32
    return %arg0, %c0_i32 : i32, i32
  }
  func.func @transform_2(%arg0: i32) -> (i32, i32) {
    %c0_i32 = arith.constant 0 : i32
    %c0_i32_0 = arith.constant 0 : i32
    return %arg0, %c0_i32 : i32, i32
  }
  func.func @transform_3(%arg0: i32) -> (i32, i32) {
    %c0_i32 = arith.constant 0 : i32
    %c0_i32_0 = arith.constant 0 : i32
    return %arg0, %c0_i32 : i32, i32
  }
  func.func @transform_4(%arg0: i32) -> (i32, i32) {
    %c0_i32 = arith.constant 0 : i32
    %c0_i32_0 = arith.constant 0 : i32
    return %arg0, %c0_i32 : i32, i32
  }
  func.func @transform_5(%arg0: i32) -> (i32, i32) {
    %c0_i32 = arith.constant 0 : i32
    %c0_i32_0 = arith.constant 0 : i32
    return %arg0, %c0_i32 : i32, i32
  }
  func.func @transform_6(%arg0: i32) -> (i32, i32) {
    %c0_i32 = arith.constant 0 : i32
    %c0_i32_0 = arith.constant 0 : i32
    return %arg0, %c0_i32 : i32, i32
  }
  func.func @transform_7(%arg0: i32) -> (i32, i32) {
    %c0_i32 = arith.constant 0 : i32
    %c0_i32_0 = arith.constant 0 : i32
    return %arg0, %c0_i32 : i32, i32
  }
  func.func @transform_8(%arg0: i32) -> (i32, i32) {
    %c0_i32 = arith.constant 0 : i32
    %c0_i32_0 = arith.constant 0 : i32
    return %arg0, %c0_i32 : i32, i32
  }
  func.func @transform_9(%arg0: i32) -> (i32, i32) {
    %c0_i32 = arith.constant 0 : i32
    %c0_i32_0 = arith.constant 0 : i32
    %c0_i32_1 = arith.constant 0 : i32
    return %c0_i32, %c0_i32_0 : i32, i32
  }
  func.func @transform_10(%arg0: i32) -> (i32, i32) {
    %c0_i32 = arith.constant 0 : i32
    %c0_i32_0 = arith.constant 0 : i32
    %c0_i32_1 = arith.constant 0 : i32
    return %c0_i32, %c0_i32_0 : i32, i32
  }
  func.func @transform_11(%arg0: i32) -> (i32, i32) {
    %c0_i32 = arith.constant 0 : i32
    %c0_i32_0 = arith.constant 0 : i32
    return %arg0, %c0_i32 : i32, i32
  }
}

module attributes {stable_mosaic.version = 11 : i64} {
  func.func @_mm_kernel(%arg0: i32, %arg1: i32, %arg2: i32, %arg3: memref<288x384xbf16, #tpu.memory_space<vmem>>, %arg4: memref<384x128xbf16, #tpu.memory_space<vmem>>, %arg5: memref<1x128xf32, #tpu.memory_space<vmem>>, %arg6: memref<288x128xbf16, #tpu.memory_space<vmem>>, %arg7: memref<128x128xbf16, #tpu.memory_space<vmem>>, %arg8: memref<1x128xf32, #tpu.memory_space<vmem>>, %arg9: memref<288x128xf32, #tpu.memory_space<vmem>>, %arg10: memref<288x128xf32, #tpu.memory_space<vmem>>) attributes {dimension_semantics = [#tpu.dimension_semantics<parallel>, #tpu.dimension_semantics<parallel>, #tpu.dimension_semantics<arbitrary>], iteration_bounds = array<i64: 1, 1, 3>, scalar_prefetch = 0 : i64, scratch_operands = 1 : i64, tpu.core_type = #tpu.core_type<tc>, window_params = [{transform_indices = @transform_0, window_bounds = array<i64: 288, 384>}, {transform_indices = @transform_1, window_bounds = array<i64: 384, 128>}, {transform_indices = @transform_2, window_bounds = array<i64: 1, 128>}, {transform_indices = @transform_3, window_bounds = array<i64: 288, 128>}, {transform_indices = @transform_4, window_bounds = array<i64: 128, 128>}, {transform_indices = @transform_5, window_bounds = array<i64: 1, 128>}, {transform_indices = @transform_6, window_bounds = array<i64: 288, 128>}]} {
    %c0_i32 = arith.constant 0 : i32
    %0 = arith.cmpi eq, %arg2, %c0_i32 : i32
    %1 = arith.extui %0 : i1 to i32
    %c0_i32_0 = arith.constant 0 : i32
    %2 = arith.cmpi ne, %1, %c0_i32_0 : i32
    scf.if %2 {
      %cst_9 = arith.constant 0.000000e+00 : f32
      %12 = vector.broadcast %cst_9 : f32 to vector<288x128xf32>
      %c0_10 = arith.constant 0 : index
      %c0_11 = arith.constant 0 : index
      %13 = vector.load %arg10[%c0_10, %c0_11] : memref<288x128xf32, #tpu.memory_space<vmem>>, vector<288x128xf32>
      tpu.vector_store %arg10[%c0_10, %c0_11], %12 {strides = array<i32>} : memref<288x128xf32, #tpu.memory_space<vmem>>, vector<288x128xf32>,
    } else {
    }
    %c0 = arith.constant 0 : index
    %c0_1 = arith.constant 0 : index
    %3 = vector.load %arg10[%c0, %c0_1] : memref<288x128xf32, #tpu.memory_space<vmem>>, vector<288x128xf32>
    %c0_2 = arith.constant 0 : index
    %c0_3 = arith.constant 0 : index
    %4 = vector.load %arg3[%c0_2, %c0_3] : memref<288x384xbf16, #tpu.memory_space<vmem>>, vector<288x384xbf16>
    %c0_4 = arith.constant 0 : index
    %c0_5 = arith.constant 0 : index
    %5 = vector.load %arg4[%c0_4, %c0_5] : memref<384x128xbf16, #tpu.memory_space<vmem>>, vector<384x128xbf16>
    %cst = arith.constant dense<0.000000e+00> : vector<288x128xf32>
    %6 = tpu.matmul %4, %5, %cst {dimension_numbers = #tpu.dot_dimension_numbers<[1], [0], [0], [1], [0, 0, 1, 1], [], []>} : vector<288x384xbf16>, vector<384x128xbf16>, vector<288x128xf32> -> vector<288x128xf32>
    %7 = arith.addf %3, %6 : vector<288x128xf32>
    %c0_6 = arith.constant 0 : index
    %c0_7 = arith.constant 0 : index
    %8 = vector.load %arg10[%c0_6, %c0_7] : memref<288x128xf32, #tpu.memory_space<vmem>>, vector<288x128xf32>
    tpu.vector_store %arg10[%c0_6, %c0_7], %7 {strides = array<i32>} : memref<288x128xf32, #tpu.memory_space<vmem>>, vector<288x128xf32>,
    %c2_i32 = arith.constant 2 : i32
    %9 = arith.cmpi eq, %arg2, %c2_i32 : i32
    %10 = arith.extui %9 : i1 to i32
    %c0_i32_8 = arith.constant 0 : i32
    %11 = arith.cmpi ne, %10, %c0_i32_8 : i32
    scf.if %11 {
      %c0_9 = arith.constant 0 : index
      %c0_10 = arith.constant 0 : index
      %12 = vector.load %arg10[%c0_9, %c0_10] : memref<288x128xf32, #tpu.memory_space<vmem>>, vector<288x128xf32>
      %c0_11 = arith.constant 0 : index
      %c0_12 = arith.constant 0 : index
      %13 = vector.load %arg5[%c0_11, %c0_12] : memref<1x128xf32, #tpu.memory_space<vmem>>, vector<1x128xf32>
      %14 = vector.broadcast %13 : vector<1x128xf32> to vector<288x128xf32>
      %15 = arith.addf %12, %14 : vector<288x128xf32>
      %c0_13 = arith.constant 0 : index
      %c0_14 = arith.constant 0 : index
      %16 = vector.load %arg6[%c0_13, %c0_14] : memref<288x128xbf16, #tpu.memory_space<vmem>>, vector<288x128xbf16>
      %c0_15 = arith.constant 0 : index
      %c0_16 = arith.constant 0 : index
      %17 = vector.load %arg7[%c0_15, %c0_16] : memref<128x128xbf16, #tpu.memory_space<vmem>>, vector<128x128xbf16>
      %cst_17 = arith.constant dense<0.000000e+00> : vector<288x128xf32>
      %18 = tpu.matmul %16, %17, %cst_17 {dimension_numbers = #tpu.dot_dimension_numbers<[1], [0], [0], [1], [0, 0, 1, 1], [], []>} : vector<288x128xbf16>, vector<128x128xbf16>, vector<288x128xf32> -> vector<288x128xf32>
      %19 = arith.addf %15, %18 : vector<288x128xf32>
      %c0_18 = arith.constant 0 : index
      %c0_19 = arith.constant 0 : index
      %20 = vector.load %arg8[%c0_18, %c0_19] : memref<1x128xf32, #tpu.memory_space<vmem>>, vector<1x128xf32>
      %21 = vector.broadcast %20 : vector<1x128xf32> to vector<288x128xf32>
      %22 = arith.addf %19, %21 : vector<288x128xf32>
      %cst_20 = arith.constant 0.000000e+00 : f32
      %23 = vector.broadcast %cst_20 : f32 to vector<288x128xf32>
      %24 = arith.maximumf %22, %23 : vector<288x128xf32>
      %c0_21 = arith.constant 0 : index
      %c0_22 = arith.constant 0 : index
      %25 = vector.load %arg9[%c0_21, %c0_22] : memref<288x128xf32, #tpu.memory_space<vmem>>, vector<288x128xf32>
      tpu.vector_store %arg9[%c0_21, %c0_22], %24 {strides = array<i32>} : memref<288x128xf32, #tpu.memory_space<vmem>>, vector<288x128xf32>,
    } else {
    }
    return
  }
  func.func @transform_0(%arg0: i32, %arg1: i32, %arg2: i32) -> (i32, i32) {
    %c0_i32 = arith.constant 0 : i32
    return %arg0, %arg2 : i32, i32
  }
  func.func @transform_1(%arg0: i32, %arg1: i32, %arg2: i32) -> (i32, i32) {
    %c0_i32 = arith.constant 0 : i32
    return %arg2, %arg1 : i32, i32
  }
  func.func @transform_2(%arg0: i32, %arg1: i32, %arg2: i32) -> (i32, i32) {
    %c0_i32 = arith.constant 0 : i32
    %c0_i32_0 = arith.constant 0 : i32
    return %c0_i32, %arg1 : i32, i32
  }
  func.func @transform_3(%arg0: i32, %arg1: i32, %arg2: i32) -> (i32, i32) {
    %c0_i32 = arith.constant 0 : i32
    %c0_i32_0 = arith.constant 0 : i32
    return %arg0, %c0_i32 : i32, i32
  }
  func.func @transform_4(%arg0: i32, %arg1: i32, %arg2: i32) -> (i32, i32) {
    %c0_i32 = arith.constant 0 : i32
    %c0_i32_0 = arith.constant 0 : i32
    return %c0_i32, %arg1 : i32, i32
  }
  func.func @transform_5(%arg0: i32, %arg1: i32, %arg2: i32) -> (i32, i32) {
    %c0_i32 = arith.constant 0 : i32
    %c0_i32_0 = arith.constant 0 : i32
    return %c0_i32, %arg1 : i32, i32
  }
  func.func @transform_6(%arg0: i32, %arg1: i32, %arg2: i32) -> (i32, i32) {
    %c0_i32 = arith.constant 0 : i32
    return %arg0, %arg1 : i32, i32
  }
}

</mosaic_0001>

<bundles_post_ra>
// kernel: block8_forward.3
= control target key start
LH: loop header
LB: loop body
LE: loop exit
PB: predicated region body
PF: predicated region fallthrough
CT: control target
= control target key end

     0   :  { %s1180_s12 = smov 0   ;;  %s1182_s13 = smov 0   ;;  %s1330_s0 = inlined_call_operand.vmem [shape: bf16[1536,128], index: 0, kind: input, shape index: {}]   ;;  %s1331_s1 = inlined_call_operand.vmem [shape: bf16[128,128], index: 1, kind: input, shape index: {}]   ;;  %s1332_s2 = inlined_call_operand.vmem [shape: f32[1,128], index: 2, kind: input, shape index: {}]   ;;  %s1333_s3 = inlined_call_operand.vmem [shape: f32[1536,128], index: 3, kind: output, shape index: {}]  }
   0x1   :  { %s1184_s14 = smov 0  }
   0x2 LB: > { %s32_s15 = sadd.s32 1, %s1154_s13  ;;  %p968_p0 = scmp.ge.s32.totalorder %s1158_s14, 1  ;;  %s1158_s14 = sphi %s1184_s14, %s13_s14   ;;  %s1154_s13 = sphi %s1182_s13, %s1335_s13   ;;  %s1150_s12 = sphi %s1180_s12, %s1334_s12  }
   0x3   : > { %p34_p1 = scmp.ge.s32.totalorder %s32_s15, 6  ;;  %p188_p2 = scmp.lt.s32.totalorder %s1158_s14, 7 }
   0x5   : > { %s1337_s15 = smov (%p34_p1, %s32_s15), 0  ;;  %p189_p3 = pnand %p968_p0, %p188_p2 }
   0x6   : > { %v1112_v0 = vld [vmem:[%s1331_s1] sm:$0xff] (!%p189_p3)   ;;  %s969_s18 = sshll.u32 (!%p189_p3), %s1150_s12, 5  ;;  %v1113_v1 = vld [vmem:[%s1331_s1 + $0x8] sm:$0xff] (!%p189_p3)   ;;  %v1114_v2 = vld [vmem:[%s1331_s1 + $0x10] sm:$0xff] (!%p189_p3)  }
   0x7   : > { %192 = sbr.rel (%p189_p3) target bundleno = 281 (0x119), region = 32  ;;  %p230_p4 = scmp.lt.s32.totalorder (!%p189_p3), %s969_s18, 191  ;;  %1024 = vmatprep.subr.bf16.mxu0 (!%p189_p3), %v1112_v0  ;;  %1072 = vmatprep.subr.bf16.mxu1 (!%p189_p3), %v1112_v0  ;;  %v1115_v3 = vld [vmem:[%s1331_s1 + $0x18] sm:$0xff] (!%p189_p3)   ;;  %v1116_v6 = vld [vmem:[%s1331_s1 + $0x20] sm:$0xff] (!%p189_p3)   ;;  %v1117_v7 = vld [vmem:[%s1331_s1 + $0x28] sm:$0xff] (!%p189_p3)  }
   0x8   : > { %1025 = vmatpush3.bf16.msra.mxu0 (!%p189_p3), %v1112_v0  ;;  %1080 = vmatpush3.bf16.msra.mxu1 (!%p189_p3), %v1112_v0  ;;  %v1118_v8 = vld [vmem:[%s1331_s1 + $0x30] sm:$0xff] (!%p189_p3)   ;;  %v1119_v9 = vld [vmem:[%s1331_s1 + $0x38] sm:$0xff] (!%p189_p3)   ;;  %v1250_v24 = vld [vmem:[%s1332_s2] ss:$0 sm:$0xff] (!%p189_p3) }
   0x9   : > { %1026 = vmatprep.subr.bf16.mxu0 (!%p189_p3), %v1113_v1  ;;  %1073 = vmatprep.subr.bf16.mxu1 (!%p189_p3), %v1113_v1 }
   0xc   : > { %1027 = vmatpush3.bf16.msra.mxu0 (!%p189_p3), %v1113_v1  ;;  %1081 = vmatpush3.bf16.msra.mxu1 (!%p189_p3), %v1113_v1 }
   0xd   : > { %1028 = vmatprep.subr.bf16.mxu0 (!%p189_p3), %v1114_v2  ;;  %1074 = vmatprep.subr.bf16.mxu1 (!%p189_p3), %v1114_v2 }
   0xe   : > { %s1339_s18 = smov (!%p230_p4, %s969_s18), 191 }
   0xf   : > { %s970_s23 = sshll.u32 %s1339_s18, 2  ;;  %s972_s10 = sshll.u32 %s1339_s18, 3 }
  0x10   : > { %s1213_s26 = scalar_lea.vmem %s1330_s0, %s970_s23  ;;  %1029 = vmatpush3.bf16.msra.mxu0 %v1114_v2  ;;  %1082 = vmatpush3.bf16.msra.mxu1 %v1114_v2  ;;  %s1255_s19 = scalar_lea.vmem %s1333_s3, %s972_s10 }
  0x11   : > { %v1120_v4 = vld [vmem:[%s1213_s26] sm:$0xff]   ;;  %1030 = vmatprep.subr.bf16.mxu0 %v1115_v3  ;;  %1075 = vmatprep.subr.bf16.mxu1 %v1115_v3  ;;  %v1122_v10 = vld [vmem:[%s1213_s26 + $0x8] sm:$0xff]   ;;  %v1124_v12 = vld [vmem:[%s1213_s26 + $0x10] sm:$0xff]  }
  0x12   : > { %v1121_v5 = vld [vmem:[%s1213_s26 + $0x40] sm:$0xff]   ;;  %1040 = vmatprep.mubr.bf16.mxu0 %v1120_v4  ;;  %v1123_v11 = vld [vmem:[%s1213_s26 + $0x48] sm:$0xff]   ;;  %v1125_v13 = vld [vmem:[%s1213_s26 + $0x50] sm:$0xff]  }
  0x13   : > { %1056 = vmatprep.mubr.bf16.mxu1 %v1121_v5  ;;  %v1126_v14 = vld [vmem:[%s1213_s26 + $0x18] sm:$0xff]   ;;  %v1128_v16 = vld [vmem:[%s1213_s26 + $0x20] sm:$0xff]   ;;  %v1130_v18 = vld [vmem:[%s1213_s26 + $0x28] sm:$0xff]  }
  0x14   : > { %1031 = vmatpush3.bf16.msra.mxu0 %v1115_v3  ;;  %1083 = vmatpush3.bf16.msra.mxu1 %v1115_v3  ;;  %v1127_v15 = vld [vmem:[%s1213_s26 + $0x58] sm:$0xff]   ;;  %v1129_v17 = vld [vmem:[%s1213_s26 + $0x60] sm:$0xff]   ;;  %v1131_v19 = vld [vmem:[%s1213_s26 + $0x68] sm:$0xff]  }
  0x15   : > { %1032 = vmatprep.subr.bf16.mxu0 %v1116_v6  ;;  %1076 = vmatprep.subr.bf16.mxu1 %v1116_v6  ;;  %v1132_v20 = vld [vmem:[%s1213_s26 + $0x30] sm:$0xff]   ;;  %v1134_v22 = vld [vmem:[%s1213_s26 + $0x38] sm:$0xff]  }
  0x16   : > { %v1133_v21 = vld [vmem:[%s1213_s26 + $0x70] sm:$0xff]   ;;  %v1135_v23 = vld [vmem:[%s1213_s26 + $0x78] sm:$0xff]  }
  0x18   : > { %1033 = vmatpush3.bf16.msra.mxu0 %v1116_v6  ;;  %1084 = vmatpush3.bf16.msra.mxu1 %v1116_v6 }
  0x19   : > { %1034 = vmatprep.subr.bf16.mxu0 %v1117_v7  ;;  %1077 = vmatprep.subr.bf16.mxu1 %v1117_v7 }
  0x1c   : > { %1035 = vmatpush3.bf16.msra.mxu0 %v1117_v7  ;;  %1085 = vmatpush3.bf16.msra.mxu1 %v1117_v7 }
  0x1d   : > { %1036 = vmatprep.subr.bf16.mxu0 %v1118_v8  ;;  %1078 = vmatprep.subr.bf16.mxu1 %v1118_v8 }
  0x20   : > { %1037 = vmatpush3.bf16.msra.mxu0 %v1118_v8  ;;  %1086 = vmatpush3.bf16.msra.mxu1 %v1118_v8 }
  0x21   : > { %1038 = vmatprep.subr.bf16.mxu0 %v1119_v9  ;;  %1079 = vmatprep.subr.bf16.mxu1 %v1119_v9 }
  0x24   : > { %1039 = vmatpush3.bf16.msra.mxu0 %v1119_v9  ;;  %1087 = vmatpush3.bf16.msra.mxu1 %v1119_v9 }
  0x27   : > { %1041 = vmatmul.mubr.bf16.vlgmr.msra.gmra.mrb[0].mxu0 %v1122_v10  ;;  %1057 = vmatmul.mubr.bf16.vlgmr.msra.gmra.mrb[0].mxu1 %v1123_v11 }
  0x28   : > { %1044 = vmatprep.mubr.bf16.mxu0 %v1124_v12  ;;  %1060 = vmatprep.mubr.bf16.mxu1 %v1125_v13 }
  0x2f   : > { %1045 = vmatmul.mubr.bf16.gmra.mrb[4].mxu0 %v1126_v14  ;;  %1061 = vmatmul.mubr.bf16.gmra.mrb[4].mxu1 %v1127_v15 }
  0x30   : > { %1048 = vmatprep.mubr.bf16.mxu0 %v1128_v16  ;;  %1064 = vmatprep.mubr.bf16.mxu1 %v1129_v17 }
  0x37   : > { %1049 = vmatmul.mubr.bf16.gmra.mrb[8].mxu0 %v1130_v18  ;;  %1065 = vmatmul.mubr.bf16.gmra.mrb[8].mxu1 %v1131_v19 }
  0x38   : > { %1052 = vmatprep.mubr.bf16.mxu0 %v1132_v20  ;;  %1068 = vmatprep.mubr.bf16.mxu1 %v1133_v21 }
  0x3f   : > { %1053 = vmatmul.mubr.bf16.gmra.mrb[12].mxu0 %v1134_v22  ;;  %1069 = vmatmul.mubr.bf16.gmra.mrb[12].mxu1 %v1135_v23 }
  0xfa   : > { %v1042_v25 = vpop.f32.mrb[0].mxu0  ;;  %v1058_v26 = vpop.f32.mrb[0].mxu1 }
  0xfb   : > { %v789_v27 = vadd.f32 %v1042_v25, %v1250_v24  ;;  %v805_v28 = vadd.f32 %v1058_v26, %v1250_v24  ;;  %v554_v29 = vpop.f32.mrb[1].mxu0  ;;  %v618_v30 = vpop.f32.mrb[1].mxu1 }
  0xfc   : > { %v787_v31 = vadd.f32 %v1250_v24, %v554_v29  ;;  %v803_v32 = vadd.f32 %v1250_v24, %v618_v30  ;;  %v1043_v33 = vpop.f32.mrb[2].mxu0  ;;  %v1059_v34 = vpop.f32.mrb[2].mxu1 }
  0xfd   : > { %821 = vst [vmem:[%s1255_s19 + $0x10] sm:$0xff] %v789_v27  ;;  %837 = vst [vmem:[%s1255_s19 + $0x90] sm:$0xff] %v805_v28  ;;  %v790_v35 = vadd.f32 %v1043_v33, %v1250_v24  ;;  %v806_v36 = vadd.f32 %v1059_v34, %v1250_v24  ;;  %v557_v37 = vpop.f32.mrb[3].mxu0  ;;  %v621_v38 = vpop.f32.mrb[3].mxu1 }
  0xfe   : > { %819 = vst [vmem:[%s1255_s19] sm:$0xff] %v787_v31  ;;  %835 = vst [vmem:[%s1255_s19 + $0x80] sm:$0xff] %v803_v32  ;;  %v788_v39 = vadd.f32 %v1250_v24, %v557_v37  ;;  %v804_v40 = vadd.f32 %v1250_v24, %v621_v38 }
  0xff   : > { %822 = vst [vmem:[%s1255_s19 + $0x18] sm:$0xff] %v790_v35  ;;  %838 = vst [vmem:[%s1255_s19 + $0x98] sm:$0xff] %v806_v36 }
 0x100   : > { %820 = vst [vmem:[%s1255_s19 + $0x8] sm:$0xff] %v788_v39  ;;  %836 = vst [vmem:[%s1255_s19 + $0x88] sm:$0xff] %v804_v40 }
 0x102   : > { %v1046_v41 = vpop.f32.mrb[4].mxu0  ;;  %v1062_v42 = vpop.f32.mrb[4].mxu1 }
 0x103   : > { %v793_v43 = vadd.f32 %v1046_v41, %v1250_v24  ;;  %v809_v44 = vadd.f32 %v1062_v42, %v1250_v24  ;;  %v570_v45 = vpop.f32.mrb[5].mxu0  ;;  %v634_v46 = vpop.f32.mrb[5].mxu1 }
 0x104   : > { %v791_v47 = vadd.f32 %v1250_v24, %v570_v45  ;;  %v807_v48 = vadd.f32 %v1250_v24, %v634_v46  ;;  %v1047_v49 = vpop.f32.mrb[6].mxu0  ;;  %v1063_v50 = vpop.f32.mrb[6].mxu1 }
 0x105   : > { %825 = vst [vmem:[%s1255_s19 + $0x30] sm:$0xff] %v793_v43  ;;  %841 = vst [vmem:[%s1255_s19 + $0xb0] sm:$0xff] %v809_v44  ;;  %v794_v51 = vadd.f32 %v1047_v49, %v1250_v24  ;;  %v810_v52 = vadd.f32 %v1063_v50, %v1250_v24  ;;  %v573_v53 = vpop.f32.mrb[7].mxu0  ;;  %v637_v54 = vpop.f32.mrb[7].mxu1 }
 0x106   : > { %823 = vst [vmem:[%s1255_s19 + $0x20] sm:$0xff] %v791_v47  ;;  %839 = vst [vmem:[%s1255_s19 + $0xa0] sm:$0xff] %v807_v48  ;;  %v792_v55 = vadd.f32 %v1250_v24, %v573_v53  ;;  %v808_v56 = vadd.f32 %v1250_v24, %v637_v54 }
 0x107   : > { %826 = vst [vmem:[%s1255_s19 + $0x38] sm:$0xff] %v794_v51  ;;  %842 = vst [vmem:[%s1255_s19 + $0xb8] sm:$0xff] %v810_v52 }
 0x108   : > { %824 = vst [vmem:[%s1255_s19 + $0x28] sm:$0xff] %v792_v55  ;;  %840 = vst [vmem:[%s1255_s19 + $0xa8] sm:$0xff] %v808_v56 }
 0x10a   : > { %v1050_v57 = vpop.f32.mrb[8].mxu0  ;;  %v1066_v58 = vpop.f32.mrb[8].mxu1 }
 0x10b   : > { %v797_v59 = vadd.f32 %v1050_v57, %v1250_v24  ;;  %v813_v60 = vadd.f32 %v1066_v58, %v1250_v24  ;;  %v586_v61 = vpop.f32.mrb[9].mxu0  ;;  %v650_v62 = vpop.f32.mrb[9].mxu1 }
 0x10c   : > { %v795_v63 = vadd.f32 %v1250_v24, %v586_v61  ;;  %v811_v0 = vadd.f32 %v1250_v24, %v650_v62  ;;  %v1051_v1 = vpop.f32.mrb[10].mxu0  ;;  %v1067_v2 = vpop.f32.mrb[10].mxu1 }
 0x10d   : > { %829 = vst [vmem:[%s1255_s19 + $0x50] sm:$0xff] %v797_v59  ;;  %845 = vst [vmem:[%s1255_s19 + $0xd0] sm:$0xff] %v813_v60  ;;  %v798_v3 = vadd.f32 %v1051_v1, %v1250_v24  ;;  %v814_v4 = vadd.f32 %v1067_v2, %v1250_v24  ;;  %v589_v5 = vpop.f32.mrb[11].mxu0  ;;  %v653_v6 = vpop.f32.mrb[11].mxu1 }
 0x10e   : > { %827 = vst [vmem:[%s1255_s19 + $0x40] sm:$0xff] %v795_v63  ;;  %843 = vst [vmem:[%s1255_s19 + $0xc0] sm:$0xff] %v811_v0  ;;  %v796_v7 = vadd.f32 %v1250_v24, %v589_v5  ;;  %v812_v8 = vadd.f32 %v1250_v24, %v653_v6 }
 0x10f   : > { %830 = vst [vmem:[%s1255_s19 + $0x58] sm:$0xff] %v798_v3  ;;  %846 = vst [vmem:[%s1255_s19 + $0xd8] sm:$0xff] %v814_v4 }
 0x110   : > { %828 = vst [vmem:[%s1255_s19 + $0x48] sm:$0xff] %v796_v7  ;;  %844 = vst [vmem:[%s1255_s19 + $0xc8] sm:$0xff] %v812_v8 }
 0x112   : > { %v1054_v9 = vpop.f32.mrb[12].mxu0  ;;  %v1070_v10 = vpop.f32.mrb[12].mxu1 }
 0x113   : > { %v801_v11 = vadd.f32 %v1054_v9, %v1250_v24  ;;  %v817_v12 = vadd.f32 %v1070_v10, %v1250_v24  ;;  %v602_v13 = vpop.f32.mrb[13].mxu0  ;;  %v666_v14 = vpop.f32.mrb[13].mxu1 }
 0x114   : > { %v799_v15 = vadd.f32 %v1250_v24, %v602_v13  ;;  %v815_v16 = vadd.f32 %v1250_v24, %v666_v14  ;;  %v1055_v17 = vpop.f32.mrb[14].mxu0  ;;  %v1071_v18 = vpop.f32.mrb[14].mxu1 }
 0x115   : > { %833 = vst [vmem:[%s1255_s19 + $0x70] sm:$0xff] %v801_v11  ;;  %849 = vst [vmem:[%s1255_s19 + $0xf0] sm:$0xff] %v817_v12  ;;  %v802_v19 = vadd.f32 %v1055_v17, %v1250_v24  ;;  %v818_v20 = vadd.f32 %v1071_v18, %v1250_v24  ;;  %v605_v21 = vpop.f32.mrb[15].mxu0  ;;  %v669_v22 = vpop.f32.mrb[15].mxu1 }
 0x116   : > { %831 = vst [vmem:[%s1255_s19 + $0x60] sm:$0xff] %v799_v15  ;;  %847 = vst [vmem:[%s1255_s19 + $0xe0] sm:$0xff] %v815_v16  ;;  %v800_v23 = vadd.f32 %v1250_v24, %v605_v21  ;;  %v816_v25 = vadd.f32 %v1250_v24, %v669_v22 }
 0x117   : > { %834 = vst [vmem:[%s1255_s19 + $0x78] sm:$0xff] %v802_v19  ;;  %850 = vst [vmem:[%s1255_s19 + $0xf8] sm:$0xff] %v818_v20 }
 0x118   : > { %832 = vst [vmem:[%s1255_s19 + $0x68] sm:$0xff] %v800_v23  ;;  %848 = vst [vmem:[%s1255_s19 + $0xe8] sm:$0xff] %v816_v25 }
 0x119 PF: > { %s13_s14 = sadd.s32 1, %s1158_s14   ;;  %s1334_s12 = smov %s1154_s13 }
 0x11a   : > { %p10_p5 = scmp.ge.s32.totalorder %s13_s14, 8   ;;  %s1335_s13 = smov %s1337_s15 }
 0x11c   :  { %12 = sbr.rel (!%p10_p5) target bundleno = 2 (0x2), region = 76 }

// kernel: block8_forward.4
= control target key start
LH: loop header
LB: loop body
LE: loop exit
PB: predicated region body
PF: predicated region fallthrough
CT: control target
= control target key end

     0   :  { %s2048_s0 = inlined_call_operand.vmem [shape: f32[288,128], index: 0, kind: input, shape index: {}]   ;;  %s2049_s1 = inlined_call_operand.vmem [shape: f32[288,128], index: 1, kind: input, shape index: {}]   ;;  %s2050_s2 = inlined_call_operand.vmem [shape: f32[288,128], index: 2, kind: input, shape index: {}]   ;;  %s2051_s3 = inlined_call_operand.vmem [shape: f32[288,128], index: 3, kind: input, shape index: {}]   ;;  %s2052_s4 = inlined_call_operand.vmem [shape: f32[288,128], index: 4, kind: input, shape index: {}]   ;;  %s2053_s5 = inlined_call_operand.vmem [shape: f32[288,128], index: 5, kind: input, shape index: {}]   ;;  %s2054_s6 = inlined_call_operand.vmem [shape: f32[288,128], index: 6, kind: input, shape index: {}]   ;;  %s2055_s7 = inlined_call_operand.vmem [shape: f32[288,128], index: 7, kind: input, shape index: {}]   ;;  %s2056_s8 = inlined_call_operand.vmem [shape: f32[288,128], index: 8, kind: input, shape index: {}]   ;;  %s2057_s9 = inlined_call_operand.vmem [shape: f32[1,128], index: 9, kind: input, shape index: {}]   ;;  %s2058_s10 = inlined_call_operand.vmem [shape: f32[1,128], index: 10, kind: input, shape index: {}]   ;;  %s2059_s11 = inlined_call_operand.vmem [shape: f32[288,128], index: 11, kind: output, shape index: {}]  }
   0x1   :  { %v38_v0 = vld [vmem:[%s2048_s0] sm:$0xff]  ;;  %v39_v6 = vld [vmem:[%s2048_s0 + $0x8] sm:$0xff]  ;;  %v40_v14 = vld [vmem:[%s2048_s0 + $0x10] sm:$0xff] }
   0x2   :  { %v74_v1 = vld [vmem:[%s2049_s1] sm:$0xff]  ;;  %v75_v8 = vld [vmem:[%s2049_s1 + $0x8] sm:$0xff]  ;;  %v76_v17 = vld [vmem:[%s2049_s1 + $0x10] sm:$0xff] }
   0x3   :  { %v146_v2 = vld [vmem:[%s2050_s2] sm:$0xff]  ;;  %v110_v3 = vmax.f32 %v38_v0, %v74_v1  ;;  %v147_v9 = vld [vmem:[%s2050_s2 + $0x8] sm:$0xff]  ;;  %v111_v11 = vmax.f32 %v39_v6, %v75_v8  ;;  %v148_v18 = vld [vmem:[%s2050_s2 + $0x10] sm:$0xff]  ;;  %v112_v21 = vmax.f32 %v40_v14, %v76_v17 }
   0x4   :  { %v218_v4 = vld [vmem:[%s2051_s3] sm:$0xff]  ;;  %v219_v13 = vld [vmem:[%s2051_s3 + $0x8] sm:$0xff]  ;;  %v220_v25 = vld [vmem:[%s2051_s3 + $0x10] sm:$0xff] }
   0x5   :  { %v182_v5 = vmax.f32 %v110_v3, %v146_v2  ;;  %v290_v7 = vld [vmem:[%s2052_s4] sm:$0xff]  ;;  %v183_v16 = vmax.f32 %v111_v11, %v147_v9  ;;  %v291_v20 = vld [vmem:[%s2052_s4 + $0x8] sm:$0xff]  ;;  %v41_v26 = vld [vmem:[%s2048_s0 + $0x18] sm:$0xff]  ;;  %v184_v28 = vmax.f32 %v112_v21, %v148_v18 }
   0x6   :  { %v362_v12 = vld [vmem:[%s2053_s5] sm:$0xff]  ;;  %v363_v27 = vld [vmem:[%s2053_s5 + $0x8] sm:$0xff]  ;;  %v77_v29 = vld [vmem:[%s2049_s1 + $0x18] sm:$0xff] }
   0x7   :  { %v254_v10 = vmax.f32 %v182_v5, %v218_v4  ;;  %v434_v19 = vld [vmem:[%s2054_s6] sm:$0xff]  ;;  %v255_v24 = vmax.f32 %v183_v16, %v219_v13  ;;  %v149_v30 = vld [vmem:[%s2050_s2 + $0x18] sm:$0xff]  ;;  %v292_v34 = vld [vmem:[%s2052_s4 + $0x10] sm:$0xff]  ;;  %v113_v35 = vmax.f32 %v41_v26, %v77_v29  ;;  %v256_v38 = vmax.f32 %v184_v28, %v220_v25 }
   0x8   :  { %v506_v23 = vld [vmem:[%s2055_s7] sm:$0xff]  ;;  %v435_v37 = vld [vmem:[%s2054_s6 + $0x8] sm:$0xff]  ;;  %v221_v39 = vld [vmem:[%s2051_s3 + $0x18] sm:$0xff] }
   0x9   :  { %v326_v15 = vmax.f32 %v254_v10, %v290_v7  ;;  %v578_v32 = vld [vmem:[%s2056_s8] sm:$0xff]  ;;  %v327_v33 = vmax.f32 %v255_v24, %v291_v20  ;;  %v364_v43 = vld [vmem:[%s2053_s5 + $0x10] sm:$0xff]  ;;  %v185_v44 = vmax.f32 %v113_v35, %v149_v30  ;;  %v507_v48 = vld [vmem:[%s2055_s7 + $0x8] sm:$0xff]  ;;  %v328_v50 = vmax.f32 %v256_v38, %v292_v34 }
   0xa   :  { %v948_v36 = vld [vmem:[%s2057_s9] ss:$0 sm:$0xff]  ;;  %v579_v49 = vld [vmem:[%s2056_s8 + $0x8] sm:$0xff]  ;;  %v293_v51 = vld [vmem:[%s2052_s4 + $0x18] sm:$0xff] }
   0xb   :  { %v398_v22 = vmax.f32 %v326_v15, %v362_v12  ;;  %v42_v40 = vld [vmem:[%s2048_s0 + $0x20] sm:$0xff]  ;;  %v399_v42 = vmax.f32 %v327_v33, %v363_v27  ;;  %v436_v55 = vld [vmem:[%s2054_s6 + $0x10] sm:$0xff]  ;;  %v257_v56 = vmax.f32 %v185_v44, %v221_v39  ;;  %v43_v58 = vld [vmem:[%s2048_s0 + $0x28] sm:$0xff]  ;;  %v400_v59 = vmax.f32 %v328_v50, %v364_v43 }
   0xc   :  { %v78_v45 = vld [vmem:[%s2049_s1 + $0x20] sm:$0xff]  ;;  %v365_v60 = vld [vmem:[%s2053_s5 + $0x18] sm:$0xff]  ;;  %v79_v62 = vld [vmem:[%s2049_s1 + $0x28] sm:$0xff] }
   0xd   :  { %v470_v31 = vmax.f32 %v398_v22, %v434_v19  ;;  %v150_v46 = vld [vmem:[%s2050_s2 + $0x20] sm:$0xff]  ;;  %v114_v52 = vmax.f32 %v42_v40, %v78_v45  ;;  %v471_v54 = vmax.f32 %v399_v42, %v435_v37  ;;  %v151_v63 = vld [vmem:[%s2050_s2 + $0x28] sm:$0xff]  ;;  %v508_v2 = vld [vmem:[%s2055_s7 + $0x10] sm:$0xff]  ;;  %v329_v4 = vmax.f32 %v257_v56, %v293_v51 }
   0xe   :  { %v971_v47 = vld [vmem:[%s2058_s10] ss:$0 sm:$0xff]  ;;  %v580_v3 = vld [vmem:[%s2056_s8 + $0x10] sm:$0xff]  ;;  %v115_v6 = vmax.f32 %v43_v58, %v79_v62  ;;  %v472_v7 = vmax.f32 %v400_v59, %v436_v55  ;;  %v437_v8 = vld [vmem:[%s2054_s6 + $0x18] sm:$0xff] }
   0xf   :  { %v542_v41 = vmax.f32 %v470_v31, %v506_v23  ;;  %v222_v57 = vld [vmem:[%s2051_s3 + $0x20] sm:$0xff]  ;;  %v186_v61 = vmax.f32 %v114_v52, %v150_v46  ;;  %v543_v1 = vmax.f32 %v471_v54, %v507_v48  ;;  %v223_v10 = vld [vmem:[%s2051_s3 + $0x28] sm:$0xff]  ;;  %v44_v11 = vld [vmem:[%s2048_s0 + $0x30] sm:$0xff]  ;;  %v401_v14 = vmax.f32 %v329_v4, %v365_v60 }
  0x10   :  { %v294_v5 = vld [vmem:[%s2052_s4 + $0x20] sm:$0xff]  ;;  %v187_v16 = vmax.f32 %v115_v6, %v151_v63  ;;  %v80_v17 = vld [vmem:[%s2049_s1 + $0x30] sm:$0xff]  ;;  %v544_v19 = vmax.f32 %v472_v7, %v508_v2  ;;  %v509_v20 = vld [vmem:[%s2055_s7 + $0x18] sm:$0xff] }
  0x11   :  { %v614_v53 = vmax.f32 %v542_v41, %v578_v32  ;;  %v258_v9 = vmax.f32 %v186_v61, %v222_v57  ;;  %v615_v13 = vmax.f32 %v543_v1, %v579_v49  ;;  %v366_v15 = vld [vmem:[%s2053_s5 + $0x20] sm:$0xff]  ;;  %v152_v18 = vld [vmem:[%s2050_s2 + $0x30] sm:$0xff]  ;;  %v581_v21 = vld [vmem:[%s2056_s8 + $0x18] sm:$0xff]  ;;  %v116_v24 = vmax.f32 %v44_v11, %v80_v17 }
  0x12   :  { %v295_v23 = vld [vmem:[%s2052_s4 + $0x28] sm:$0xff]  ;;  %v473_v27 = vmax.f32 %v401_v14, %v437_v8  ;;  %v438_v28 = vld [vmem:[%s2054_s6 + $0x20] sm:$0xff]  ;;  %v259_v29 = vmax.f32 %v187_v16, %v223_v10  ;;  %v224_v30 = vld [vmem:[%s2051_s3 + $0x30] sm:$0xff]  ;;  %v616_v32 = vmax.f32 %v544_v19, %v580_v3 }
  0x13   :  { %v657_v0 = vmul.f32 %v948_v36, %v614_v53  ;;  %v330_v22 = vmax.f32 %v258_v9, %v294_v5  ;;  %v658_v26 = vmul.f32 %v948_v36, %v615_v13  ;;  %v45_v31 = vld [vmem:[%s2048_s0 + $0x38] sm:$0xff]  ;;  %v367_v34 = vld [vmem:[%s2053_s5 + $0x28] sm:$0xff]  ;;  %v188_v35 = vmax.f32 %v116_v24, %v152_v18  ;;  %v510_v41 = vld [vmem:[%s2055_s7 + $0x20] sm:$0xff] }
  0x14   :  { %v81_v37 = vld [vmem:[%s2049_s1 + $0x38] sm:$0xff]  ;;  %v545_v40 = vmax.f32 %v473_v27, %v509_v20  ;;  %v582_v42 = vld [vmem:[%s2056_s8 + $0x20] sm:$0xff]  ;;  %v331_v43 = vmax.f32 %v259_v29, %v295_v23  ;;  %v296_v44 = vld [vmem:[%s2052_s4 + $0x30] sm:$0xff]  ;;  %v659_v46 = vmul.f32 %v948_v36, %v616_v32 }
  0x15   :  { %v700_v12 = vadd.f32 %v971_v47, %v657_v0  ;;  %v402_v33 = vmax.f32 %v330_v22, %v366_v15  ;;  %v153_v38 = vld [vmem:[%s2050_s2 + $0x38] sm:$0xff]  ;;  %v701_v39 = vadd.f32 %v971_v47, %v658_v26  ;;  %v117_v45 = vmax.f32 %v45_v31, %v81_v37  ;;  %v439_v49 = vld [vmem:[%s2054_s6 + $0x28] sm:$0xff]  ;;  %v46_v52 = vld [vmem:[%s2048_s0 + $0x40] sm:$0xff] }
  0x16   :  { %v260_v50 = vmax.f32 %v188_v35, %v224_v30  ;;  %v225_v51 = vld [vmem:[%s2051_s3 + $0x38] sm:$0xff]  ;;  %v617_v54 = vmax.f32 %v545_v40, %v581_v21  ;;  %v403_v55 = vmax.f32 %v331_v43, %v367_v34  ;;  %v368_v56 = vld [vmem:[%s2053_s5 + $0x30] sm:$0xff]  ;;  %v82_v58 = vld [vmem:[%s2049_s1 + $0x40] sm:$0xff]  ;;  %v702_v60 = vadd.f32 %v971_v47, %v659_v46 }
  0x17   :  { %v736_v25 = vmax.f32 %v700_v12, 0.0  ;;  %v474_v48 = vmax.f32 %v402_v33, %v438_v28  ;;  %v737_v53 = vmax.f32 %v701_v39, 0.0  ;;  %v189_v57 = vmax.f32 %v117_v45, %v153_v38  ;;  %v154_v59 = vld [vmem:[%s2050_s2 + $0x40] sm:$0xff]  ;;  %v511_v62 = vld [vmem:[%s2055_s7 + $0x28] sm:$0xff]  ;;  %v297_v1 = vld [vmem:[%s2052_s4 + $0x38] sm:$0xff] }
  0x18   :  { %v583_v63 = vld [vmem:[%s2056_s8 + $0x28] sm:$0xff]  ;;  %v332_v0 = vmax.f32 %v260_v50, %v296_v44  ;;  %v118_v2 = vmax.f32 %v46_v52, %v82_v58  ;;  %v660_v3 = vmul.f32 %v948_v36, %v617_v54  ;;  %v475_v4 = vmax.f32 %v403_v55, %v439_v49  ;;  %v440_v5 = vld [vmem:[%s2054_s6 + $0x30] sm:$0xff]  ;;  %v226_v7 = vld [vmem:[%s2051_s3 + $0x40] sm:$0xff] }
  0x19   :  { %772 = vst [vmem:[%s2059_s11] sm:$0xff] %v736_v25  ;;  %v546_v61 = vmax.f32 %v474_v48, %v510_v41  ;;  %773 = vst [vmem:[%s2059_s11 + $0x8] sm:$0xff] %v737_v53  ;;  %v261_v6 = vmax.f32 %v189_v57, %v225_v51  ;;  %v47_v8 = vld [vmem:[%s2048_s0 + $0x48] sm:$0xff]  ;;  %v738_v9 = vmax.f32 %v702_v60, 0.0  ;;  %v369_v12 = vld [vmem:[%s2053_s5 + $0x38] sm:$0xff] }
  0x1a   :  { %v404_v11 = vmax.f32 %v332_v0, %v368_v56  ;;  %v190_v13 = vmax.f32 %v118_v2, %v154_v59  ;;  %v83_v14 = vld [vmem:[%s2049_s1 + $0x48] sm:$0xff]  ;;  %v703_v16 = vadd.f32 %v971_v47, %v660_v3  ;;  %v547_v17 = vmax.f32 %v475_v4, %v511_v62  ;;  %v512_v18 = vld [vmem:[%s2055_s7 + $0x30] sm:$0xff]  ;;  %v298_v21 = vld [vmem:[%s2052_s4 + $0x40] sm:$0xff] }
  0x1b   :  { %v618_v10 = vmax.f32 %v546_v61, %v582_v42  ;;  %v155_v15 = vld [vmem:[%s2050_s2 + $0x48] sm:$0xff]  ;;  %v584_v19 = vld [vmem:[%s2056_s8 + $0x30] sm:$0xff]  ;;  %v333_v20 = vmax.f32 %v261_v6, %v297_v1  ;;  %v119_v22 = vmax.f32 %v47_v8, %v83_v14  ;;  %774 = vst [vmem:[%s2059_s11 + $0x10] sm:$0xff] %v738_v9  ;;  %v441_v25 = vld [vmem:[%s2054_s6 + $0x38] sm:$0xff] }
  0x1c   :  { %v476_v24 = vmax.f32 %v404_v11, %v440_v5  ;;  %v262_v26 = vmax.f32 %v190_v13, %v226_v7  ;;  %v227_v27 = vld [vmem:[%s2051_s3 + $0x48] sm:$0xff]  ;;  %v48_v28 = vld [vmem:[%s2048_s0 + $0x50] sm:$0xff]  ;;  %v739_v29 = vmax.f32 %v703_v16, 0.0  ;;  %v619_v30 = vmax.f32 %v547_v17, %v583_v63  ;;  %v370_v32 = vld [vmem:[%s2053_s5 + $0x40] sm:$0xff] }
  0x1d   :  { %v661_v23 = vmul.f32 %v948_v36, %v618_v10  ;;  %v405_v31 = vmax.f32 %v333_v20, %v369_v12  ;;  %v191_v33 = vmax.f32 %v119_v22, %v155_v15  ;;  %v84_v34 = vld [vmem:[%s2049_s1 + $0x50] sm:$0xff]  ;;  %v513_v39 = vld [vmem:[%s2055_s7 + $0x38] sm:$0xff]  ;;  %v299_v42 = vld [vmem:[%s2052_s4 + $0x48] sm:$0xff] }
  0x1e   :  { %v156_v35 = vld [vmem:[%s2050_s2 + $0x50] sm:$0xff]  ;;  %v548_v38 = vmax.f32 %v476_v24, %v512_v18  ;;  %v585_v40 = vld [vmem:[%s2056_s8 + $0x38] sm:$0xff]  ;;  %v334_v41 = vmax.f32 %v262_v26, %v298_v21  ;;  %v120_v43 = vmax.f32 %v48_v28, %v84_v34  ;;  %775 = vst [vmem:[%s2059_s11 + $0x18] sm:$0xff] %v739_v29  ;;  %v662_v44 = vmul.f32 %v948_v36, %v619_v30  ;;  %v442_v46 = vld [vmem:[%s2054_s6 + $0x40] sm:$0xff] }
  0x1f   :  { %v704_v37 = vadd.f32 %v971_v47, %v661_v23  ;;  %v477_v45 = vmax.f32 %v405_v31, %v441_v25  ;;  %v263_v48 = vmax.f32 %v191_v33, %v227_v27  ;;  %v228_v49 = vld [vmem:[%s2051_s3 + $0x50] sm:$0xff]  ;;  %v49_v50 = vld [vmem:[%s2048_s0 + $0x58] sm:$0xff]  ;;  %v371_v54 = vld [vmem:[%s2053_s5 + $0x48] sm:$0xff] }
  0x20   :  { %v620_v52 = vmax.f32 %v548_v38, %v584_v19  ;;  %v406_v53 = vmax.f32 %v334_v41, %v370_v32  ;;  %v192_v55 = vmax.f32 %v120_v43, %v156_v35  ;;  %v85_v56 = vld [vmem:[%s2049_s1 + $0x58] sm:$0xff]  ;;  %v705_v58 = vadd.f32 %v971_v47, %v662_v44  ;;  %v514_v60 = vld [vmem:[%s2055_s7 + $0x40] sm:$0xff]  ;;  %v300_v63 = vld [vmem:[%s2052_s4 + $0x50] sm:$0xff] }
  0x21   :  { %v740_v51 = vmax.f32 %v704_v37, 0.0  ;;  %v157_v57 = vld [vmem:[%s2050_s2 + $0x58] sm:$0xff]  ;;  %v549_v59 = vmax.f32 %v477_v45, %v513_v39  ;;  %v586_v61 = vld [vmem:[%s2056_s8 + $0x40] sm:$0xff]  ;;  %v335_v62 = vmax.f32 %v263_v48, %v299_v42  ;;  %v121_v0 = vmax.f32 %v49_v50, %v85_v56  ;;  %v443_v3 = vld [vmem:[%s2054_s6 + $0x48] sm:$0xff] }
  0x22   :  { %v663_v1 = vmul.f32 %v948_v36, %v620_v52  ;;  %v478_v2 = vmax.f32 %v406_v53, %v442_v46  ;;  %v264_v4 = vmax.f32 %v192_v55, %v228_v49  ;;  %v229_v5 = vld [vmem:[%s2051_s3 + $0x58] sm:$0xff]  ;;  %v50_v6 = vld [vmem:[%s2048_s0 + $0x60] sm:$0xff]  ;;  %v741_v7 = vmax.f32 %v705_v58, 0.0  ;;  %v372_v10 = vld [vmem:[%s2053_s5 + $0x50] sm:$0xff] }
  0x23   :  { %776 = vst [vmem:[%s2059_s11 + $0x20] sm:$0xff] %v740_v51  ;;  %v621_v8 = vmax.f32 %v549_v59, %v585_v40  ;;  %v407_v9 = vmax.f32 %v335_v62, %v371_v54  ;;  %v193_v11 = vmax.f32 %v121_v0, %v157_v57  ;;  %v86_v12 = vld [vmem:[%s2049_s1 + $0x60] sm:$0xff]  ;;  %v515_v16 = vld [vmem:[%s2055_s7 + $0x48] sm:$0xff]  ;;  %v301_v19 = vld [vmem:[%s2052_s4 + $0x58] sm:$0xff] }
  0x24   :  { %v158_v13 = vld [vmem:[%s2050_s2 + $0x60] sm:$0xff]  ;;  %v706_v14 = vadd.f32 %v971_v47, %v663_v1  ;;  %v550_v15 = vmax.f32 %v478_v2, %v514_v60  ;;  %v587_v17 = vld [vmem:[%s2056_s8 + $0x48] sm:$0xff]  ;;  %v336_v18 = vmax.f32 %v264_v4, %v300_v63  ;;  %v122_v20 = vmax.f32 %v50_v6, %v86_v12  ;;  %777 = vst [vmem:[%s2059_s11 + $0x28] sm:$0xff] %v741_v7  ;;  %v444_v23 = vld [vmem:[%s2054_s6 + $0x50] sm:$0xff] }
  0x25   :  { %v664_v21 = vmul.f32 %v948_v36, %v621_v8  ;;  %v479_v22 = vmax.f32 %v407_v9, %v443_v3  ;;  %v265_v24 = vmax.f32 %v193_v11, %v229_v5  ;;  %v230_v25 = vld [vmem:[%s2051_s3 + $0x60] sm:$0xff]  ;;  %v51_v26 = vld [vmem:[%s2048_s0 + $0x68] sm:$0xff]  ;;  %v373_v30 = vld [vmem:[%s2053_s5 + $0x58] sm:$0xff] }
  0x26   :  { %v742_v27 = vmax.f32 %v706_v14, 0.0  ;;  %v622_v28 = vmax.f32 %v550_v15, %v586_v61  ;;  %v408_v29 = vmax.f32 %v336_v18, %v372_v10  ;;  %v194_v31 = vmax.f32 %v122_v20, %v158_v13  ;;  %v87_v32 = vld [vmem:[%s2049_s1 + $0x68] sm:$0xff]  ;;  %v516_v37 = vld [vmem:[%s2055_s7 + $0x50] sm:$0xff]  ;;  %v302_v40 = vld [vmem:[%s2052_s4 + $0x60] sm:$0xff] }
  0x27   :  { %v159_v33 = vld [vmem:[%s2050_s2 + $0x68] sm:$0xff]  ;;  %v707_v34 = vadd.f32 %v971_v47, %v664_v21  ;;  %v551_v35 = vmax.f32 %v479_v22, %v515_v16  ;;  %v588_v38 = vld [vmem:[%s2056_s8 + $0x50] sm:$0xff]  ;;  %v337_v39 = vmax.f32 %v265_v24, %v301_v19  ;;  %v123_v41 = vmax.f32 %v51_v26, %v87_v32  ;;  %v445_v44 = vld [vmem:[%s2054_s6 + $0x58] sm:$0xff] }
  0x28   :  { %778 = vst [vmem:[%s2059_s11 + $0x30] sm:$0xff] %v742_v27  ;;  %v665_v42 = vmul.f32 %v948_v36, %v622_v28  ;;  %v480_v43 = vmax.f32 %v408_v29, %v444_v23  ;;  %v266_v45 = vmax.f32 %v194_v31, %v230_v25  ;;  %v231_v46 = vld [vmem:[%s2051_s3 + $0x68] sm:$0xff]  ;;  %v52_v48 = vld [vmem:[%s2048_s0 + $0x70] sm:$0xff]  ;;  %v374_v52 = vld [vmem:[%s2053_s5 + $0x60] sm:$0xff] }
  0x29   :  { %v743_v49 = vmax.f32 %v707_v34, 0.0  ;;  %v623_v50 = vmax.f32 %v551_v35, %v587_v17  ;;  %v409_v51 = vmax.f32 %v337_v39, %v373_v30  ;;  %v195_v53 = vmax.f32 %v123_v41, %v159_v33  ;;  %v88_v54 = vld [vmem:[%s2049_s1 + $0x70] sm:$0xff]  ;;  %v517_v58 = vld [vmem:[%s2055_s7 + $0x58] sm:$0xff]  ;;  %v303_v61 = vld [vmem:[%s2052_s4 + $0x68] sm:$0xff] }
  0x2a   :  { %v160_v55 = vld [vmem:[%s2050_s2 + $0x70] sm:$0xff]  ;;  %v708_v56 = vadd.f32 %v971_v47, %v665_v42  ;;  %v552_v57 = vmax.f32 %v480_v43, %v516_v37  ;;  %v589_v59 = vld [vmem:[%s2056_s8 + $0x58] sm:$0xff]  ;;  %v338_v60 = vmax.f32 %v266_v45, %v302_v40  ;;  %v124_v62 = vmax.f32 %v52_v48, %v88_v54  ;;  %v446_v1 = vld [vmem:[%s2054_s6 + $0x60] sm:$0xff] }
  0x2b   :  { %779 = vst [vmem:[%s2059_s11 + $0x38] sm:$0xff] %v743_v49  ;;  %v666_v63 = vmul.f32 %v948_v36, %v623_v50  ;;  %v481_v0 = vmax.f32 %v409_v51, %v445_v44  ;;  %v267_v2 = vmax.f32 %v195_v53, %v231_v46  ;;  %v232_v3 = vld [vmem:[%s2051_s3 + $0x70] sm:$0xff]  ;;  %v53_v4 = vld [vmem:[%s2048_s0 + $0x78] sm:$0xff]  ;;  %v375_v8 = vld [vmem:[%s2053_s5 + $0x68] sm:$0xff] }
  0x2c   :  { %v744_v5 = vmax.f32 %v708_v56, 0.0  ;;  %v624_v6 = vmax.f32 %v552_v57, %v588_v38  ;;  %v410_v7 = vmax.f32 %v338_v60, %v374_v52  ;;  %v196_v9 = vmax.f32 %v124_v62, %v160_v55  ;;  %v89_v10 = vld [vmem:[%s2049_s1 + $0x78] sm:$0xff]  ;;  %v518_v14 = vld [vmem:[%s2055_s7 + $0x60] sm:$0xff]  ;;  %v304_v17 = vld [vmem:[%s2052_s4 + $0x70] sm:$0xff] }
  0x2d   :  { %v161_v11 = vld [vmem:[%s2050_s2 + $0x78] sm:$0xff]  ;;  %v709_v12 = vadd.f32 %v971_v47, %v666_v63  ;;  %v553_v13 = vmax.f32 %v481_v0, %v517_v58  ;;  %v590_v15 = vld [vmem:[%s2056_s8 + $0x60] sm:$0xff]  ;;  %v339_v16 = vmax.f32 %v267_v2, %v303_v61  ;;  %v125_v18 = vmax.f32 %v53_v4, %v89_v10  ;;  %v447_v21 = vld [vmem:[%s2054_s6 + $0x68] sm:$0xff] }
  0x2e   :  { %780 = vst [vmem:[%s2059_s11 + $0x40] sm:$0xff] %v744_v5  ;;  %v667_v19 = vmul.f32 %v948_v36, %v624_v6  ;;  %v482_v20 = vmax.f32 %v410_v7, %v446_v1  ;;  %v268_v22 = vmax.f32 %v196_v9, %v232_v3  ;;  %v233_v23 = vld [vmem:[%s2051_s3 + $0x78] sm:$0xff]  ;;  %v54_v24 = vld [vmem:[%s2048_s0 + $0x80] sm:$0xff]  ;;  %v376_v28 = vld [vmem:[%s2053_s5 + $0x70] sm:$0xff] }
  0x2f   :  { %v745_v25 = vmax.f32 %v709_v12, 0.0  ;;  %v625_v26 = vmax.f32 %v553_v13, %v589_v59  ;;  %v411_v27 = vmax.f32 %v339_v16, %v375_v8  ;;  %v197_v29 = vmax.f32 %v125_v18, %v161_v11  ;;  %v90_v30 = vld [vmem:[%s2049_s1 + $0x80] sm:$0xff]  ;;  %v519_v34 = vld [vmem:[%s2055_s7 + $0x68] sm:$0xff]  ;;  %v305_v38 = vld [vmem:[%s2052_s4 + $0x78] sm:$0xff] }
  0x30   :  { %v162_v31 = vld [vmem:[%s2050_s2 + $0x80] sm:$0xff]  ;;  %v710_v32 = vadd.f32 %v971_v47, %v667_v19  ;;  %v554_v33 = vmax.f32 %v482_v20, %v518_v14  ;;  %v591_v35 = vld [vmem:[%s2056_s8 + $0x68] sm:$0xff]  ;;  %v340_v37 = vmax.f32 %v268_v22, %v304_v17  ;;  %v126_v39 = vmax.f32 %v54_v24, %v90_v30  ;;  %v448_v42 = vld [vmem:[%s2054_s6 + $0x70] sm:$0xff] }
  0x31   :  { %781 = vst [vmem:[%s2059_s11 + $0x48] sm:$0xff] %v745_v25  ;;  %v668_v40 = vmul.f32 %v948_v36, %v625_v26  ;;  %v483_v41 = vmax.f32 %v411_v27, %v447_v21  ;;  %v269_v43 = vmax.f32 %v197_v29, %v233_v23  ;;  %v234_v44 = vld [vmem:[%s2051_s3 + $0x80] sm:$0xff]  ;;  %v55_v45 = vld [vmem:[%s2048_s0 + $0x88] sm:$0xff]  ;;  %v377_v50 = vld [vmem:[%s2053_s5 + $0x78] sm:$0xff] }
  0x32   :  { %v746_v46 = vmax.f32 %v710_v32, 0.0  ;;  %v626_v48 = vmax.f32 %v554_v33, %v590_v15  ;;  %v412_v49 = vmax.f32 %v340_v37, %v376_v28  ;;  %v198_v51 = vmax.f32 %v126_v39, %v162_v31  ;;  %v91_v52 = vld [vmem:[%s2049_s1 + $0x88] sm:$0xff]  ;;  %v520_v56 = vld [vmem:[%s2055_s7 + $0x70] sm:$0xff]  ;;  %v306_v59 = vld [vmem:[%s2052_s4 + $0x80] sm:$0xff] }
  0x33   :  { %v163_v53 = vld [vmem:[%s2050_s2 + $0x88] sm:$0xff]  ;;  %v711_v54 = vadd.f32 %v971_v47, %v668_v40  ;;  %v555_v55 = vmax.f32 %v483_v41, %v519_v34  ;;  %v592_v57 = vld [vmem:[%s2056_s8 + $0x70] sm:$0xff]  ;;  %v341_v58 = vmax.f32 %v269_v43, %v305_v38  ;;  %v127_v60 = vmax.f32 %v55_v45, %v91_v52  ;;  %v449_v63 = vld [vmem:[%s2054_s6 + $0x78] sm:$0xff] }
  0x34   :  { %782 = vst [vmem:[%s2059_s11 + $0x50] sm:$0xff] %v746_v46  ;;  %v669_v61 = vmul.f32 %v948_v36, %v626_v48  ;;  %v484_v62 = vmax.f32 %v412_v49, %v448_v42  ;;  %v270_v0 = vmax.f32 %v198_v51, %v234_v44  ;;  %v235_v1 = vld [vmem:[%s2051_s3 + $0x88] sm:$0xff]  ;;  %v56_v2 = vld [vmem:[%s2048_s0 + $0x90] sm:$0xff]  ;;  %v378_v6 = vld [vmem:[%s2053_s5 + $0x80] sm:$0xff] }
  0x35   :  { %v747_v3 = vmax.f32 %v711_v54, 0.0  ;;  %v627_v4 = vmax.f32 %v555_v55, %v591_v35  ;;  %v413_v5 = vmax.f32 %v341_v58, %v377_v50  ;;  %v199_v7 = vmax.f32 %v127_v60, %v163_v53  ;;  %v92_v8 = vld [vmem:[%s2049_s1 + $0x90] sm:$0xff]  ;;  %v521_v12 = vld [vmem:[%s2055_s7 + $0x78] sm:$0xff]  ;;  %v307_v15 = vld [vmem:[%s2052_s4 + $0x88] sm:$0xff] }
  0x36   :  { %v164_v9 = vld [vmem:[%s2050_s2 + $0x90] sm:$0xff]  ;;  %v712_v10 = vadd.f32 %v971_v47, %v669_v61  ;;  %v556_v11 = vmax.f32 %v484_v62, %v520_v56  ;;  %v593_v13 = vld [vmem:[%s2056_s8 + $0x78] sm:$0xff]  ;;  %v342_v14 = vmax.f32 %v270_v0, %v306_v59  ;;  %v128_v16 = vmax.f32 %v56_v2, %v92_v8  ;;  %v450_v19 = vld [vmem:[%s2054_s6 + $0x80] sm:$0xff] }
  0x37   :  { %783 = vst [vmem:[%s2059_s11 + $0x58] sm:$0xff] %v747_v3  ;;  %v670_v17 = vmul.f32 %v948_v36, %v627_v4  ;;  %v485_v18 = vmax.f32 %v413_v5, %v449_v63  ;;  %v271_v20 = vmax.f32 %v199_v7, %v235_v1  ;;  %v236_v21 = vld [vmem:[%s2051_s3 + $0x90] sm:$0xff]  ;;  %v57_v22 = vld [vmem:[%s2048_s0 + $0x98] sm:$0xff]  ;;  %v379_v26 = vld [vmem:[%s2053_s5 + $0x88] sm:$0xff] }
  0x38   :  { %v748_v23 = vmax.f32 %v712_v10, 0.0  ;;  %v628_v24 = vmax.f32 %v556_v11, %v592_v57  ;;  %v414_v25 = vmax.f32 %v342_v14, %v378_v6  ;;  %v200_v27 = vmax.f32 %v128_v16, %v164_v9  ;;  %v93_v28 = vld [vmem:[%s2049_s1 + $0x98] sm:$0xff]  ;;  %v522_v32 = vld [vmem:[%s2055_s7 + $0x80] sm:$0xff]  ;;  %v308_v35 = vld [vmem:[%s2052_s4 + $0x90] sm:$0xff] }
  0x39   :  { %v165_v29 = vld [vmem:[%s2050_s2 + $0x98] sm:$0xff]  ;;  %v713_v30 = vadd.f32 %v971_v47, %v670_v17  ;;  %v557_v31 = vmax.f32 %v485_v18, %v521_v12  ;;  %v594_v33 = vld [vmem:[%s2056_s8 + $0x80] sm:$0xff]  ;;  %v343_v34 = vmax.f32 %v271_v20, %v307_v15  ;;  %v129_v37 = vmax.f32 %v57_v22, %v93_v28  ;;  %v451_v40 = vld [vmem:[%s2054_s6 + $0x88] sm:$0xff] }
  0x3a   :  { %784 = vst [vmem:[%s2059_s11 + $0x60] sm:$0xff] %v748_v23  ;;  %v671_v38 = vmul.f32 %v948_v36, %v628_v24  ;;  %v486_v39 = vmax.f32 %v414_v25, %v450_v19  ;;  %v272_v41 = vmax.f32 %v200_v27, %v236_v21  ;;  %v237_v42 = vld [vmem:[%s2051_s3 + $0x98] sm:$0xff]  ;;  %v58_v43 = vld [vmem:[%s2048_s0 + $0xa0] sm:$0xff]  ;;  %v380_v48 = vld [vmem:[%s2053_s5 + $0x90] sm:$0xff] }
  0x3b   :  { %v749_v44 = vmax.f32 %v713_v30, 0.0  ;;  %v629_v45 = vmax.f32 %v557_v31, %v593_v13  ;;  %v415_v46 = vmax.f32 %v343_v34, %v379_v26  ;;  %v201_v49 = vmax.f32 %v129_v37, %v165_v29  ;;  %v94_v50 = vld [vmem:[%s2049_s1 + $0xa0] sm:$0xff]  ;;  %v523_v54 = vld [vmem:[%s2055_s7 + $0x88] sm:$0xff]  ;;  %v309_v57 = vld [vmem:[%s2052_s4 + $0x98] sm:$0xff] }
  0x3c   :  { %v166_v51 = vld [vmem:[%s2050_s2 + $0xa0] sm:$0xff]  ;;  %v714_v52 = vadd.f32 %v971_v47, %v671_v38  ;;  %v558_v53 = vmax.f32 %v486_v39, %v522_v32  ;;  %v595_v55 = vld [vmem:[%s2056_s8 + $0x88] sm:$0xff]  ;;  %v344_v56 = vmax.f32 %v272_v41, %v308_v35  ;;  %v130_v58 = vmax.f32 %v58_v43, %v94_v50  ;;  %v452_v61 = vld [vmem:[%s2054_s6 + $0x90] sm:$0xff] }
  0x3d   :  { %785 = vst [vmem:[%s2059_s11 + $0x68] sm:$0xff] %v749_v44  ;;  %v672_v59 = vmul.f32 %v948_v36, %v629_v45  ;;  %v487_v60 = vmax.f32 %v415_v46, %v451_v40  ;;  %v273_v62 = vmax.f32 %v201_v49, %v237_v42  ;;  %v238_v63 = vld [vmem:[%s2051_s3 + $0xa0] sm:$0xff]  ;;  %v59_v0 = vld [vmem:[%s2048_s0 + $0xa8] sm:$0xff]  ;;  %v381_v4 = vld [vmem:[%s2053_s5 + $0x98] sm:$0xff] }
  0x3e   :  { %v750_v1 = vmax.f32 %v714_v52, 0.0  ;;  %v630_v2 = vmax.f32 %v558_v53, %v594_v33  ;;  %v416_v3 = vmax.f32 %v344_v56, %v380_v48  ;;  %v202_v5 = vmax.f32 %v130_v58, %v166_v51  ;;  %v95_v6 = vld [vmem:[%s2049_s1 + $0xa8] sm:$0xff]  ;;  %v524_v10 = vld [vmem:[%s2055_s7 + $0x90] sm:$0xff]  ;;  %v310_v13 = vld [vmem:[%s2052_s4 + $0xa0] sm:$0xff] }
  0x3f   :  { %v167_v7 = vld [vmem:[%s2050_s2 + $0xa8] sm:$0xff]  ;;  %v715_v8 = vadd.f32 %v971_v47, %v672_v59  ;;  %v559_v9 = vmax.f32 %v487_v60, %v523_v54  ;;  %v596_v11 = vld [vmem:[%s2056_s8 + $0x90] sm:$0xff]  ;;  %v345_v12 = vmax.f32 %v273_v62, %v309_v57  ;;  %v131_v14 = vmax.f32 %v59_v0, %v95_v6  ;;  %v453_v17 = vld [vmem:[%s2054_s6 + $0x98] sm:$0xff] }
  0x40   :  { %786 = vst [vmem:[%s2059_s11 + $0x70] sm:$0xff] %v750_v1  ;;  %v673_v15 = vmul.f32 %v948_v36, %v630_v2  ;;  %v488_v16 = vmax.f32 %v416_v3, %v452_v61  ;;  %v274_v18 = vmax.f32 %v202_v5, %v238_v63  ;;  %v239_v19 = vld [vmem:[%s2051_s3 + $0xa8] sm:$0xff]  ;;  %v60_v20 = vld [vmem:[%s2048_s0 + $0xb0] sm:$0xff]  ;;  %v382_v24 = vld [vmem:[%s2053_s5 + $0xa0] sm:$0xff] }
  0x41   :  { %v751_v21 = vmax.f32 %v715_v8, 0.0  ;;  %v631_v22 = vmax.f32 %v559_v9, %v595_v55  ;;  %v417_v23 = vmax.f32 %v345_v12, %v381_v4  ;;  %v203_v25 = vmax.f32 %v131_v14, %v167_v7  ;;  %v96_v26 = vld [vmem:[%s2049_s1 + $0xb0] sm:$0xff]  ;;  %v525_v30 = vld [vmem:[%s2055_s7 + $0x98] sm:$0xff]  ;;  %v311_v33 = vld [vmem:[%s2052_s4 + $0xa8] sm:$0xff] }
  0x42   :  { %v168_v27 = vld [vmem:[%s2050_s2 + $0xb0] sm:$0xff]  ;;  %v716_v28 = vadd.f32 %v971_v47, %v673_v15  ;;  %v560_v29 = vmax.f32 %v488_v16, %v524_v10  ;;  %v597_v31 = vld [vmem:[%s2056_s8 + $0x98] sm:$0xff]  ;;  %v346_v32 = vmax.f32 %v274_v18, %v310_v13  ;;  %v132_v34 = vmax.f32 %v60_v20, %v96_v26  ;;  %v454_v38 = vld [vmem:[%s2054_s6 + $0xa0] sm:$0xff] }
  0x43   :  { %787 = vst [vmem:[%s2059_s11 + $0x78] sm:$0xff] %v751_v21  ;;  %v674_v35 = vmul.f32 %v948_v36, %v631_v22  ;;  %v489_v37 = vmax.f32 %v417_v23, %v453_v17  ;;  %v275_v39 = vmax.f32 %v203_v25, %v239_v19  ;;  %v240_v40 = vld [vmem:[%s2051_s3 + $0xb0] sm:$0xff]  ;;  %v61_v41 = vld [vmem:[%s2048_s0 + $0xb8] sm:$0xff]  ;;  %v383_v45 = vld [vmem:[%s2053_s5 + $0xa8] sm:$0xff] }
  0x44   :  { %v752_v42 = vmax.f32 %v716_v28, 0.0  ;;  %v632_v43 = vmax.f32 %v560_v29, %v596_v11  ;;  %v418_v44 = vmax.f32 %v346_v32, %v382_v24  ;;  %v204_v46 = vmax.f32 %v132_v34, %v168_v27  ;;  %v97_v48 = vld [vmem:[%s2049_s1 + $0xb8] sm:$0xff]  ;;  %v526_v52 = vld [vmem:[%s2055_s7 + $0xa0] sm:$0xff]  ;;  %v312_v55 = vld [vmem:[%s2052_s4 + $0xb0] sm:$0xff] }
  0x45   :  { %v169_v49 = vld [vmem:[%s2050_s2 + $0xb8] sm:$0xff]  ;;  %v717_v50 = vadd.f32 %v971_v47, %v674_v35  ;;  %v561_v51 = vmax.f32 %v489_v37, %v525_v30  ;;  %v598_v53 = vld [vmem:[%s2056_s8 + $0xa0] sm:$0xff]  ;;  %v347_v54 = vmax.f32 %v275_v39, %v311_v33  ;;  %v133_v56 = vmax.f32 %v61_v41, %v97_v48  ;;  %v455_v59 = vld [vmem:[%s2054_s6 + $0xa8] sm:$0xff] }
  0x46   :  { %788 = vst [vmem:[%s2059_s11 + $0x80] sm:$0xff] %v752_v42  ;;  %v675_v57 = vmul.f32 %v948_v36, %v632_v43  ;;  %v490_v58 = vmax.f32 %v418_v44, %v454_v38  ;;  %v276_v60 = vmax.f32 %v204_v46, %v240_v40  ;;  %v241_v61 = vld [vmem:[%s2051_s3 + $0xb8] sm:$0xff]  ;;  %v62_v62 = vld [vmem:[%s2048_s0 + $0xc0] sm:$0xff]  ;;  %v384_v2 = vld [vmem:[%s2053_s5 + $0xb0] sm:$0xff] }
  0x47   :  { %v753_v63 = vmax.f32 %v717_v50, 0.0  ;;  %v633_v0 = vmax.f32 %v561_v51, %v597_v31  ;;  %v419_v1 = vmax.f32 %v347_v54, %v383_v45  ;;  %v205_v3 = vmax.f32 %v133_v56, %v169_v49  ;;  %v98_v4 = vld [vmem:[%s2049_s1 + $0xc0] sm:$0xff]  ;;  %v527_v8 = vld [vmem:[%s2055_s7 + $0xa8] sm:$0xff]  ;;  %v313_v11 = vld [vmem:[%s2052_s4 + $0xb8] sm:$0xff] }
  0x48   :  { %v170_v5 = vld [vmem:[%s2050_s2 + $0xc0] sm:$0xff]  ;;  %v718_v6 = vadd.f32 %v971_v47, %v675_v57  ;;  %v562_v7 = vmax.f32 %v490_v58, %v526_v52  ;;  %v599_v9 = vld [vmem:[%s2056_s8 + $0xa8] sm:$0xff]  ;;  %v348_v10 = vmax.f32 %v276_v60, %v312_v55  ;;  %v134_v12 = vmax.f32 %v62_v62, %v98_v4  ;;  %v456_v15 = vld [vmem:[%s2054_s6 + $0xb0] sm:$0xff] }
  0x49   :  { %789 = vst [vmem:[%s2059_s11 + $0x88] sm:$0xff] %v753_v63  ;;  %v676_v13 = vmul.f32 %v948_v36, %v633_v0  ;;  %v491_v14 = vmax.f32 %v419_v1, %v455_v59  ;;  %v277_v16 = vmax.f32 %v205_v3, %v241_v61  ;;  %v242_v17 = vld [vmem:[%s2051_s3 + $0xc0] sm:$0xff]  ;;  %v63_v18 = vld [vmem:[%s2048_s0 + $0xc8] sm:$0xff]  ;;  %v385_v22 = vld [vmem:[%s2053_s5 + $0xb8] sm:$0xff] }
  0x4a   :  { %v754_v19 = vmax.f32 %v718_v6, 0.0  ;;  %v634_v20 = vmax.f32 %v562_v7, %v598_v53  ;;  %v420_v21 = vmax.f32 %v348_v10, %v384_v2  ;;  %v206_v23 = vmax.f32 %v134_v12, %v170_v5  ;;  %v99_v24 = vld [vmem:[%s2049_s1 + $0xc8] sm:$0xff]  ;;  %v528_v28 = vld [vmem:[%s2055_s7 + $0xb0] sm:$0xff]  ;;  %v314_v31 = vld [vmem:[%s2052_s4 + $0xc0] sm:$0xff] }
  0x4b   :  { %v171_v25 = vld [vmem:[%s2050_s2 + $0xc8] sm:$0xff]  ;;  %v719_v26 = vadd.f32 %v971_v47, %v676_v13  ;;  %v563_v27 = vmax.f32 %v491_v14, %v527_v8  ;;  %v600_v29 = vld [vmem:[%s2056_s8 + $0xb0] sm:$0xff]  ;;  %v349_v30 = vmax.f32 %v277_v16, %v313_v11  ;;  %v135_v32 = vmax.f32 %v63_v18, %v99_v24  ;;  %v457_v35 = vld [vmem:[%s2054_s6 + $0xb8] sm:$0xff] }
  0x4c   :  { %790 = vst [vmem:[%s2059_s11 + $0x90] sm:$0xff] %v754_v19  ;;  %v677_v33 = vmul.f32 %v948_v36, %v634_v20  ;;  %v492_v34 = vmax.f32 %v420_v21, %v456_v15  ;;  %v278_v37 = vmax.f32 %v206_v23, %v242_v17  ;;  %v243_v38 = vld [vmem:[%s2051_s3 + $0xc8] sm:$0xff]  ;;  %v64_v39 = vld [vmem:[%s2048_s0 + $0xd0] sm:$0xff]  ;;  %v386_v43 = vld [vmem:[%s2053_s5 + $0xc0] sm:$0xff] }
  0x4d   :  { %v755_v40 = vmax.f32 %v719_v26, 0.0  ;;  %v635_v41 = vmax.f32 %v563_v27, %v599_v9  ;;  %v421_v42 = vmax.f32 %v349_v30, %v385_v22  ;;  %v207_v44 = vmax.f32 %v135_v32, %v171_v25  ;;  %v100_v45 = vld [vmem:[%s2049_s1 + $0xd0] sm:$0xff]  ;;  %v529_v50 = vld [vmem:[%s2055_s7 + $0xb8] sm:$0xff]  ;;  %v315_v53 = vld [vmem:[%s2052_s4 + $0xc8] sm:$0xff] }
  0x4e   :  { %v172_v46 = vld [vmem:[%s2050_s2 + $0xd0] sm:$0xff]  ;;  %v720_v48 = vadd.f32 %v971_v47, %v677_v33  ;;  %v564_v49 = vmax.f32 %v492_v34, %v528_v28  ;;  %v601_v51 = vld [vmem:[%s2056_s8 + $0xb8] sm:$0xff]  ;;  %v350_v52 = vmax.f32 %v278_v37, %v314_v31  ;;  %v136_v54 = vmax.f32 %v64_v39, %v100_v45  ;;  %v458_v57 = vld [vmem:[%s2054_s6 + $0xc0] sm:$0xff] }
  0x4f   :  { %791 = vst [vmem:[%s2059_s11 + $0x98] sm:$0xff] %v755_v40  ;;  %v678_v55 = vmul.f32 %v948_v36, %v635_v41  ;;  %v493_v56 = vmax.f32 %v421_v42, %v457_v35  ;;  %v279_v58 = vmax.f32 %v207_v44, %v243_v38  ;;  %v244_v59 = vld [vmem:[%s2051_s3 + $0xd0] sm:$0xff]  ;;  %v65_v60 = vld [vmem:[%s2048_s0 + $0xd8] sm:$0xff]  ;;  %v387_v0 = vld [vmem:[%s2053_s5 + $0xc8] sm:$0xff] }
  0x50   :  { %v756_v61 = vmax.f32 %v720_v48, 0.0  ;;  %v636_v62 = vmax.f32 %v564_v49, %v600_v29  ;;  %v422_v63 = vmax.f32 %v350_v52, %v386_v43  ;;  %v208_v1 = vmax.f32 %v136_v54, %v172_v46  ;;  %v101_v2 = vld [vmem:[%s2049_s1 + $0xd8] sm:$0xff]  ;;  %v530_v6 = vld [vmem:[%s2055_s7 + $0xc0] sm:$0xff]  ;;  %v316_v9 = vld [vmem:[%s2052_s4 + $0xd0] sm:$0xff] }
  0x51   :  { %v173_v3 = vld [vmem:[%s2050_s2 + $0xd8] sm:$0xff]  ;;  %v721_v4 = vadd.f32 %v971_v47, %v678_v55  ;;  %v565_v5 = vmax.f32 %v493_v56, %v529_v50  ;;  %v602_v7 = vld [vmem:[%s2056_s8 + $0xc0] sm:$0xff]  ;;  %v351_v8 = vmax.f32 %v279_v58, %v315_v53  ;;  %v137_v10 = vmax.f32 %v65_v60, %v101_v2  ;;  %v459_v13 = vld [vmem:[%s2054_s6 + $0xc8] sm:$0xff] }
  0x52   :  { %792 = vst [vmem:[%s2059_s11 + $0xa0] sm:$0xff] %v756_v61  ;;  %v679_v11 = vmul.f32 %v948_v36, %v636_v62  ;;  %v494_v12 = vmax.f32 %v422_v63, %v458_v57  ;;  %v280_v14 = vmax.f32 %v208_v1, %v244_v59  ;;  %v245_v15 = vld [vmem:[%s2051_s3 + $0xd8] sm:$0xff]  ;;  %v66_v16 = vld [vmem:[%s2048_s0 + $0xe0] sm:$0xff]  ;;  %v388_v36 = vld [vmem:[%s2053_s5 + $0xd0] sm:$0xff] }
  0x53   :  { %v757_v17 = vmax.f32 %v721_v4, 0.0  ;;  %v637_v18 = vmax.f32 %v565_v5, %v601_v51  ;;  %v423_v19 = vmax.f32 %v351_v8, %v387_v0  ;;  %v209_v20 = vmax.f32 %v137_v10, %v173_v3  ;;  %v102_v21 = vld [vmem:[%s2049_s1 + $0xe0] sm:$0xff]  ;;  %v531_v25 = vld [vmem:[%s2055_s7 + $0xc8] sm:$0xff]  ;;  %v317_v28 = vld [vmem:[%s2052_s4 + $0xd8] sm:$0xff] }
  0x54   :  { %v174_v22 = vld [vmem:[%s2050_s2 + $0xe0] sm:$0xff]  ;;  %v722_v23 = vadd.f32 %v971_v47, %v679_v11  ;;  %v566_v24 = vmax.f32 %v494_v12, %v530_v6  ;;  %v603_v26 = vld [vmem:[%s2056_s8 + $0xc8] sm:$0xff]  ;;  %v352_v27 = vmax.f32 %v280_v14, %v316_v9  ;;  %v138_v29 = vmax.f32 %v66_v16, %v102_v21  ;;  %v460_v32 = vld [vmem:[%s2054_s6 + $0xd0] sm:$0xff] }
  0x55   :  { %793 = vst [vmem:[%s2059_s11 + $0xa8] sm:$0xff] %v757_v17  ;;  %v1745_v47 = vld [vmem:[%s2057_s9] ss:$0 sm:$0xff]  ;;  %v495_v31 = vmax.f32 %v423_v19, %v459_v13  ;;  %v281_v33 = vmax.f32 %v209_v20, %v245_v15  ;;  %v67_v35 = vld [vmem:[%s2048_s0 + $0xe8] sm:$0xff]  ;;  %v389_v40 = vld [vmem:[%s2053_s5 + $0xd8] sm:$0xff] }
  0x56   :  { %v680_v30 = vmul.f32 %v1745_v47, %v637_v18  ;;  %v246_v34 = vld [vmem:[%s2051_s3 + $0xe0] sm:$0xff]  ;;  %v758_v37 = vmax.f32 %v722_v23, 0.0  ;;  %v638_v38 = vmax.f32 %v566_v24, %v602_v7  ;;  %v424_v39 = vmax.f32 %v352_v27, %v388_v36  ;;  %v103_v42 = vld [vmem:[%s2049_s1 + $0xe8] sm:$0xff]  ;;  %v532_v48 = vld [vmem:[%s2055_s7 + $0xd0] sm:$0xff] }
  0x57   :  { %v210_v41 = vmax.f32 %v138_v29, %v174_v22  ;;  %v175_v43 = vld [vmem:[%s2050_s2 + $0xe8] sm:$0xff]  ;;  %v1769_v44 = vld [vmem:[%s2058_s10] ss:$0 sm:$0xff]  ;;  %v567_v46 = vmax.f32 %v495_v31, %v531_v25  ;;  %v604_v49 = vld [vmem:[%s2056_s8 + $0xd0] sm:$0xff]  ;;  %v353_v50 = vmax.f32 %v281_v33, %v317_v28  ;;  %v139_v52 = vmax.f32 %v67_v35, %v103_v42 }
  0x58   :  { %v723_v45 = vadd.f32 %v1769_v44, %v680_v30  ;;  %v318_v51 = vld [vmem:[%s2052_s4 + $0xe0] sm:$0xff]  ;;  %794 = vst [vmem:[%s2059_s11 + $0xb0] sm:$0xff] %v758_v37  ;;  %v681_v53 = vmul.f32 %v1745_v47, %v638_v38  ;;  %v496_v54 = vmax.f32 %v424_v39, %v460_v32  ;;  %v461_v55 = vld [vmem:[%s2054_s6 + $0xd8] sm:$0xff]  ;;  %v247_v57 = vld [vmem:[%s2051_s3 + $0xe8] sm:$0xff] }
  0x59   :  { %v282_v56 = vmax.f32 %v210_v41, %v246_v34  ;;  %v68_v58 = vld [vmem:[%s2048_s0 + $0xf0] sm:$0xff]  ;;  %v639_v60 = vmax.f32 %v567_v46, %v603_v26  ;;  %v425_v61 = vmax.f32 %v353_v50, %v389_v40  ;;  %v390_v62 = vld [vmem:[%s2053_s5 + $0xe0] sm:$0xff]  ;;  %v211_v63 = vmax.f32 %v139_v52, %v175_v43  ;;  %v533_v4 = vld [vmem:[%s2055_s7 + $0xd8] sm:$0xff] }
  0x5a   :  { %v759_v59 = vmax.f32 %v723_v45, 0.0  ;;  %v104_v0 = vld [vmem:[%s2049_s1 + $0xf0] sm:$0xff]  ;;  %v724_v2 = vadd.f32 %v1769_v44, %v681_v53  ;;  %v568_v3 = vmax.f32 %v496_v54, %v532_v48  ;;  %v605_v5 = vld [vmem:[%s2056_s8 + $0xd8] sm:$0xff]  ;;  %v319_v7 = vld [vmem:[%s2052_s4 + $0xe8] sm:$0xff] }
  0x5b   :  { %v176_v1 = vld [vmem:[%s2050_s2 + $0xf0] sm:$0xff]  ;;  %v354_v6 = vmax.f32 %v282_v56, %v318_v51  ;;  %v140_v8 = vmax.f32 %v68_v58, %v104_v0  ;;  %v682_v9 = vmul.f32 %v1745_v47, %v639_v60  ;;  %v497_v10 = vmax.f32 %v425_v61, %v461_v55  ;;  %v462_v11 = vld [vmem:[%s2054_s6 + $0xe0] sm:$0xff]  ;;  %v69_v14 = vld [vmem:[%s2048_s0 + $0xf8] sm:$0xff] }
  0x5c   :  { %795 = vst [vmem:[%s2059_s11 + $0xb8] sm:$0xff] %v759_v59  ;;  %v283_v12 = vmax.f32 %v211_v63, %v247_v57  ;;  %v248_v13 = vld [vmem:[%s2051_s3 + $0xf0] sm:$0xff]  ;;  %v760_v15 = vmax.f32 %v724_v2, 0.0  ;;  %v640_v16 = vmax.f32 %v568_v3, %v604_v49  ;;  %v391_v18 = vld [vmem:[%s2053_s5 + $0xe8] sm:$0xff]  ;;  %v105_v36 = vld [vmem:[%s2049_s1 + $0xf8] sm:$0xff] }
  0x5d   :  { %v426_v17 = vmax.f32 %v354_v6, %v390_v62  ;;  %v212_v19 = vmax.f32 %v140_v8, %v176_v1  ;;  %v177_v20 = vld [vmem:[%s2050_s2 + $0xf8] sm:$0xff]  ;;  %v725_v21 = vadd.f32 %v1769_v44, %v682_v9  ;;  %v569_v22 = vmax.f32 %v497_v10, %v533_v4  ;;  %v534_v23 = vld [vmem:[%s2055_s7 + $0xe0] sm:$0xff]  ;;  %v320_v26 = vld [vmem:[%s2052_s4 + $0xf0] sm:$0xff] }
  0x5e   :  { %v606_v24 = vld [vmem:[%s2056_s8 + $0xe0] sm:$0xff]  ;;  %v355_v25 = vmax.f32 %v283_v12, %v319_v7  ;;  %v141_v27 = vmax.f32 %v69_v14, %v105_v36  ;;  %796 = vst [vmem:[%s2059_s11 + $0xc0] sm:$0xff] %v760_v15  ;;  %v683_v28 = vmul.f32 %v1745_v47, %v640_v16  ;;  %v463_v30 = vld [vmem:[%s2054_s6 + $0xe8] sm:$0xff]  ;;  %v249_v32 = vld [vmem:[%s2051_s3 + $0xf8] sm:$0xff] }
  0x5f   :  { %v498_v29 = vmax.f32 %v426_v17, %v462_v11  ;;  %v284_v31 = vmax.f32 %v212_v19, %v248_v13  ;;  %v70_v33 = vld [vmem:[%s2048_s0 + $0x100] sm:$0xff]  ;;  %v761_v34 = vmax.f32 %v725_v21, 0.0  ;;  %v641_v35 = vmax.f32 %v569_v22, %v605_v5  ;;  %v392_v38 = vld [vmem:[%s2053_s5 + $0xf0] sm:$0xff]  ;;  %v535_v45 = vld [vmem:[%s2055_s7 + $0xe8] sm:$0xff] }
  0x60   :  { %v427_v37 = vmax.f32 %v355_v25, %v391_v18  ;;  %v213_v39 = vmax.f32 %v141_v27, %v177_v20  ;;  %v106_v40 = vld [vmem:[%s2049_s1 + $0x100] sm:$0xff]  ;;  %v726_v42 = vadd.f32 %v1769_v44, %v683_v28  ;;  %v607_v46 = vld [vmem:[%s2056_s8 + $0xe8] sm:$0xff]  ;;  %v321_v49 = vld [vmem:[%s2052_s4 + $0xf8] sm:$0xff] }
  0x61   :  { %v178_v41 = vld [vmem:[%s2050_s2 + $0x100] sm:$0xff]  ;;  %v570_v43 = vmax.f32 %v498_v29, %v534_v23  ;;  %v356_v48 = vmax.f32 %v284_v31, %v320_v26  ;;  %v142_v50 = vmax.f32 %v70_v33, %v106_v40  ;;  %797 = vst [vmem:[%s2059_s11 + $0xc8] sm:$0xff] %v761_v34  ;;  %v684_v51 = vmul.f32 %v1745_v47, %v641_v35  ;;  %v464_v53 = vld [vmem:[%s2054_s6 + $0xf0] sm:$0xff]  ;;  %v71_v56 = vld [vmem:[%s2048_s0 + $0x108] sm:$0xff] }
  0x62   :  { %v499_v52 = vmax.f32 %v427_v37, %v463_v30  ;;  %v285_v54 = vmax.f32 %v213_v39, %v249_v32  ;;  %v250_v55 = vld [vmem:[%s2051_s3 + $0x100] sm:$0xff]  ;;  %v762_v57 = vmax.f32 %v726_v42, 0.0  ;;  %v393_v60 = vld [vmem:[%s2053_s5 + $0xf8] sm:$0xff]  ;;  %v107_v62 = vld [vmem:[%s2049_s1 + $0x108] sm:$0xff] }
  0x63   :  { %v642_v58 = vmax.f32 %v570_v43, %v606_v24  ;;  %v428_v59 = vmax.f32 %v356_v48, %v392_v38  ;;  %v214_v61 = vmax.f32 %v142_v50, %v178_v41  ;;  %v179_v63 = vld [vmem:[%s2050_s2 + $0x108] sm:$0xff]  ;;  %v727_v0 = vadd.f32 %v1769_v44, %v684_v51  ;;  %v536_v2 = vld [vmem:[%s2055_s7 + $0xf0] sm:$0xff]  ;;  %v322_v5 = vld [vmem:[%s2052_s4 + $0x100] sm:$0xff] }
  0x64   :  { %v571_v1 = vmax.f32 %v499_v52, %v535_v45  ;;  %v608_v3 = vld [vmem:[%s2056_s8 + $0xf0] sm:$0xff]  ;;  %v357_v4 = vmax.f32 %v285_v54, %v321_v49  ;;  %v143_v6 = vmax.f32 %v71_v56, %v107_v62  ;;  %798 = vst [vmem:[%s2059_s11 + $0xd0] sm:$0xff] %v762_v57  ;;  %v465_v9 = vld [vmem:[%s2054_s6 + $0xf8] sm:$0xff]  ;;  %v251_v11 = vld [vmem:[%s2051_s3 + $0x108] sm:$0xff] }
  0x65   :  { %v685_v7 = vmul.f32 %v1745_v47, %v642_v58  ;;  %v500_v8 = vmax.f32 %v428_v59, %v464_v53  ;;  %v286_v10 = vmax.f32 %v214_v61, %v250_v55  ;;  %v72_v12 = vld [vmem:[%s2048_s0 + $0x110] sm:$0xff]  ;;  %v763_v13 = vmax.f32 %v727_v0, 0.0  ;;  %v394_v16 = vld [vmem:[%s2053_s5 + $0x100] sm:$0xff]  ;;  %v537_v21 = vld [vmem:[%s2055_s7 + $0xf8] sm:$0xff] }
  0x66   :  { %v643_v14 = vmax.f32 %v571_v1, %v607_v46  ;;  %v429_v15 = vmax.f32 %v357_v4, %v393_v60  ;;  %v215_v17 = vmax.f32 %v143_v6, %v179_v63  ;;  %v108_v18 = vld [vmem:[%s2049_s1 + $0x110] sm:$0xff]  ;;  %v609_v22 = vld [vmem:[%s2056_s8 + $0xf8] sm:$0xff]  ;;  %v323_v24 = vld [vmem:[%s2052_s4 + $0x108] sm:$0xff] }
  0x67   :  { %v180_v19 = vld [vmem:[%s2050_s2 + $0x110] sm:$0xff]  ;;  %v728_v36 = vadd.f32 %v1769_v44, %v685_v7  ;;  %v572_v20 = vmax.f32 %v500_v8, %v536_v2  ;;  %v358_v23 = vmax.f32 %v286_v10, %v322_v5  ;;  %v144_v25 = vmax.f32 %v72_v12, %v108_v18  ;;  %799 = vst [vmem:[%s2059_s11 + $0xd8] sm:$0xff] %v763_v13  ;;  %v466_v28 = vld [vmem:[%s2054_s6 + $0x100] sm:$0xff]  ;;  %v73_v31 = vld [vmem:[%s2048_s0 + $0x118] sm:$0xff] }
  0x68   :  { %v686_v26 = vmul.f32 %v1745_v47, %v643_v14  ;;  %v501_v27 = vmax.f32 %v429_v15, %v465_v9  ;;  %v287_v29 = vmax.f32 %v215_v17, %v251_v11  ;;  %v252_v30 = vld [vmem:[%s2051_s3 + $0x110] sm:$0xff]  ;;  %v395_v35 = vld [vmem:[%s2053_s5 + $0x108] sm:$0xff]  ;;  %v109_v38 = vld [vmem:[%s2049_s1 + $0x118] sm:$0xff] }
  0x69   :  { %v764_v32 = vmax.f32 %v728_v36, 0.0  ;;  %v644_v33 = vmax.f32 %v572_v20, %v608_v3  ;;  %v430_v34 = vmax.f32 %v358_v23, %v394_v16  ;;  %v216_v37 = vmax.f32 %v144_v25, %v180_v19  ;;  %v181_v39 = vld [vmem:[%s2050_s2 + $0x118] sm:$0xff]  ;;  %v538_v42 = vld [vmem:[%s2055_s7 + $0x100] sm:$0xff]  ;;  %v324_v45 = vld [vmem:[%s2052_s4 + $0x110] sm:$0xff] }
  0x6a   :  { %v729_v40 = vadd.f32 %v1769_v44, %v686_v26  ;;  %v573_v41 = vmax.f32 %v501_v27, %v537_v21  ;;  %v359_v43 = vmax.f32 %v287_v29, %v323_v24  ;;  %v145_v46 = vmax.f32 %v73_v31, %v109_v38  ;;  %v467_v50 = vld [vmem:[%s2054_s6 + $0x108] sm:$0xff]  ;;  %v253_v52 = vld [vmem:[%s2051_s3 + $0x118] sm:$0xff]  ;;  %v610_v55 = vld [vmem:[%s2056_s8 + $0x100] sm:$0xff] }
  0x6b   :  { %800 = vst [vmem:[%s2059_s11 + $0xe0] sm:$0xff] %v764_v32  ;;  %v687_v48 = vmul.f32 %v1745_v47, %v644_v33  ;;  %v502_v49 = vmax.f32 %v430_v34, %v466_v28  ;;  %v288_v51 = vmax.f32 %v216_v37, %v252_v30  ;;  %v396_v57 = vld [vmem:[%s2053_s5 + $0x110] sm:$0xff]  ;;  %v539_v61 = vld [vmem:[%s2055_s7 + $0x108] sm:$0xff]  ;;  %v325_v63 = vld [vmem:[%s2052_s4 + $0x118] sm:$0xff] }
  0x6c   :  { %v765_v53 = vmax.f32 %v729_v40, 0.0  ;;  %v645_v54 = vmax.f32 %v573_v41, %v609_v22  ;;  %v431_v56 = vmax.f32 %v359_v43, %v395_v35  ;;  %v217_v58 = vmax.f32 %v145_v46, %v181_v39  ;;  %v468_v2 = vld [vmem:[%s2054_s6 + $0x110] sm:$0xff]  ;;  %v611_v6 = vld [vmem:[%s2056_s8 + $0x108] sm:$0xff]  ;;  %v397_v8 = vld [vmem:[%s2053_s5 + $0x118] sm:$0xff] }
  0x6d   :  { %v730_v59 = vadd.f32 %v1769_v44, %v687_v48  ;;  %v574_v60 = vmax.f32 %v502_v49, %v538_v42  ;;  %v360_v62 = vmax.f32 %v288_v51, %v324_v45  ;;  %v540_v11 = vld [vmem:[%s2055_s7 + $0x110] sm:$0xff]  ;;  %v469_v15 = vld [vmem:[%s2054_s6 + $0x118] sm:$0xff] }
  0x6e   :  { %801 = vst [vmem:[%s2059_s11 + $0xe8] sm:$0xff] %v765_v53  ;;  %v688_v0 = vmul.f32 %v1745_v47, %v645_v54  ;;  %v503_v1 = vmax.f32 %v431_v56, %v467_v50  ;;  %v289_v3 = vmax.f32 %v217_v58, %v253_v52  ;;  %v612_v18 = vld [vmem:[%s2056_s8 + $0x110] sm:$0xff]  ;;  %v541_v21 = vld [vmem:[%s2055_s7 + $0x118] sm:$0xff] }
  0x6f   :  { %v766_v4 = vmax.f32 %v730_v59, 0.0  ;;  %v646_v5 = vmax.f32 %v574_v60, %v610_v55  ;;  %v432_v7 = vmax.f32 %v360_v62, %v396_v57  ;;  %v613_v26 = vld [vmem:[%s2056_s8 + $0x118] sm:$0xff] }
  0x70   :  { %v731_v9 = vadd.f32 %v1769_v44, %v688_v0  ;;  %v575_v10 = vmax.f32 %v503_v1, %v539_v61  ;;  %v361_v12 = vmax.f32 %v289_v3, %v325_v63 }
  0x71   :  { %802 = vst [vmem:[%s2059_s11 + $0xf0] sm:$0xff] %v766_v4  ;;  %v689_v13 = vmul.f32 %v1745_v47, %v646_v5  ;;  %v504_v14 = vmax.f32 %v432_v7, %v468_v2 }
  0x72   :  { %v767_v16 = vmax.f32 %v731_v9, 0.0  ;;  %v647_v17 = vmax.f32 %v575_v10, %v611_v6  ;;  %v433_v19 = vmax.f32 %v361_v12, %v397_v8 }
  0x73   :  { %v732_v36 = vadd.f32 %v1769_v44, %v689_v13  ;;  %v576_v20 = vmax.f32 %v504_v14, %v540_v11 }
  0x74   :  { %803 = vst [vmem:[%s2059_s11 + $0xf8] sm:$0xff] %v767_v16  ;;  %v690_v22 = vmul.f32 %v1745_v47, %v647_v17  ;;  %v505_v23 = vmax.f32 %v433_v19, %v469_v15 }
  0x75   :  { %v768_v24 = vmax.f32 %v732_v36, 0.0  ;;  %v648_v25 = vmax.f32 %v576_v20, %v612_v18 }
  0x76   :  { %v733_v27 = vadd.f32 %v1769_v44, %v690_v22  ;;  %v577_v28 = vmax.f32 %v505_v23, %v541_v21 }
  0x77   :  { %804 = vst [vmem:[%s2059_s11 + $0x100] sm:$0xff] %v768_v24  ;;  %v691_v29 = vmul.f32 %v1745_v47, %v648_v25 }
  0x78   :  { %v769_v30 = vmax.f32 %v733_v27, 0.0  ;;  %v649_v31 = vmax.f32 %v577_v28, %v613_v26 }
  0x79   :  { %v734_v32 = vadd.f32 %v1769_v44, %v691_v29 }
  0x7a   :  { %805 = vst [vmem:[%s2059_s11 + $0x108] sm:$0xff] %v769_v30  ;;  %v692_v33 = vmul.f32 %v1745_v47, %v649_v31 }
  0x7b   :  { %v770_v34 = vmax.f32 %v734_v32, 0.0 }
  0x7c   :  { %v735_v35 = vadd.f32 %v1769_v44, %v692_v33 }
  0x7d   :  { %806 = vst [vmem:[%s2059_s11 + $0x110] sm:$0xff] %v770_v34 }
  0x7e   :  { %v771_v37 = vmax.f32 %v735_v35, 0.0 }
  0x80   :  { %807 = vst [vmem:[%s2059_s11 + $0x118] sm:$0xff] %v771_v37 }

// kernel: block8_forward.5
= control target key start
LH: loop header
LB: loop body
LE: loop exit
PB: predicated region body
PF: predicated region fallthrough
CT: control target
= control target key end

     0   :  { %s3031_s21 = smov 0   ;;  %s3033_s22 = smov 0   ;;  %s3658_s0 = inlined_call_operand.vmem [shape: bf16[288,1152], index: 0, kind: input, shape index: {}]   ;;  %s3659_s1 = inlined_call_operand.vmem [shape: bf16[1152,128], index: 1, kind: input, shape index: {}]   ;;  %s3660_s2 = inlined_call_operand.vmem [shape: f32[1,128], index: 2, kind: input, shape index: {}]   ;;  %s3661_s3 = inlined_call_operand.vmem [shape: bf16[288,128], index: 3, kind: input, shape index: {}]   ;;  %s3662_s4 = inlined_call_operand.vmem [shape: bf16[128,128], index: 4, kind: input, shape index: {}]   ;;  %s3663_s5 = inlined_call_operand.vmem [shape: f32[1,128], index: 5, kind: input, shape index: {}]   ;;  %s3664_s6 = inlined_call_operand.vmem [shape: f32[288,128], index: 6, kind: output, shape index: {}]  }
   0x1   :  { %s3035_s23 = smov 0   ;;  %s3037_s24 = smov 0  }
   0x2   :  { %s3039_s25 = smov 0  }
   0x3 LB: > { %s28_s26 = sadd.s32 1, %s2988_s24  ;;  %p51_p1 = scmp.ne.s32.totalorder %s2980_s22, %s2976_s21  ;;  %s2992_s25 = sphi %s3039_s25, %s16_s25   ;;  %s2988_s24 = sphi %s3037_s24, %s3668_s24   ;;  %s2984_s23 = sphi %s3035_s23, %s3667_s23   ;;  %s2980_s22 = sphi %s3033_s22, %s3666_s22   ;;  %s2976_s21 = sphi %s3031_s21, %s3665_s21  }
   0x4   : > { %p29_p0 = scmp.ge.s32.totalorder %s28_s26, 3  ;;  %p52_p2 = scmp.eq.s32.totalorder %s2992_s25, 0 }
   0x5   : > { %s44_s28 = sadd.s32 1, %s2980_s22  ;;  %p2395_p5 = scmp.ge.s32.totalorder %s2992_s25, 3 }
   0x6   : > { %s3670_s26 = smov (%p29_p0, %s28_s26), 0  ;;  %p53_p3 = por %p52_p2, %p51_p1 }
   0x7   : > { %s40_s27 = ssub.s32 %s2988_s24, %s3670_s26  ;;  %265 = sbr.rel (%p2395_p5) target bundleno = 61 (0x3d), region = 32 }
   0x8   : > { %p42_p4 = scmp.eq.s32.totalorder %s40_s27, 0 }
   0xa   : > { %s3066_s29 = scalar_select %p42_p4, %s2980_s22, %s44_s28  }
   0xe   : > { %268 = sbr.rel (!%p53_p3) target bundleno = 61 (0x3d), region = 36  ;;  %s270_s30 = sand.u32 (%p53_p3), 1, %s2980_s22  }
   0xf   : > { %s2583_s7 = smul.u32 (%p53_p3), 12, %s2988_s24 }
  0x10   : > { %s2788_s8 = smul.u32 (%p53_p3), 432, %s270_s30 }
  0x11   : > { %s3074_s11 = scalar_lea.vmem (%p53_p3), %s3658_s0, %s2583_s7 }
  0x12   : > { %v293_v0 = vld [vmem:[%s3074_s11] sm:$0xff] (%p53_p3)  ;;  %v297_v2 = vld [vmem:[%s3074_s11 + $0x48] sm:$0xff] (%p53_p3)  ;;  %s3079_s12 = scalar_lea.vmem (%p53_p3), [#allocation3], %s2788_s8  ;;  %v301_v4 = vld [vmem:[%s3074_s11 + $0x90] sm:$0xff] (%p53_p3) }
  0x13   : > { %v295_v1 = vld [vmem:[%s3074_s11 + $0x24] sm:$0xff] (%p53_p3)  ;;  %294 = vst [vmem:[%s3079_s12] sm:$0xff] (%p53_p3), %v293_v0  ;;  %298 = vst [vmem:[%s3079_s12 + $0x18] sm:$0xff] (%p53_p3), %v297_v2  ;;  %v299_v3 = vld [vmem:[%s3074_s11 + $0x6c] sm:$0xff] (%p53_p3) }
  0x14   : > { %296 = vst [vmem:[%s3079_s12 + $0xc] sm:$0xff] (%p53_p3), %v295_v1  ;;  %v303_v5 = vld [vmem:[%s3074_s11 + $0xb4] sm:$0xff] (%p53_p3)  ;;  %300 = vst [vmem:[%s3079_s12 + $0x24] sm:$0xff] (%p53_p3), %v299_v3  ;;  %v307_v7 = vld [vmem:[%s3074_s11 + $0xfc] sm:$0xff] (%p53_p3) }
  0x15   : > { %302 = vst [vmem:[%s3079_s12 + $0x30] sm:$0xff] %v301_v4  ;;  %304 = vst [vmem:[%s3079_s12 + $0x3c] sm:$0xff] %v303_v5  ;;  %v305_v6 = vld [vmem:[%s3074_s11 + $0xd8] sm:$0xff]  ;;  %v309_v8 = vld [vmem:[%s3074_s11 + $0x120] sm:$0xff] }
  0x16   : > { %306 = vst [vmem:[%s3079_s12 + $0x48] sm:$0xff] %v305_v6  ;;  %308 = vst [vmem:[%s3079_s12 + $0x54] sm:$0xff] %v307_v7  ;;  %v311_v9 = vld [vmem:[%s3074_s11 + $0x144] sm:$0xff]  ;;  %v315_v11 = vld [vmem:[%s3074_s11 + $0x18c] sm:$0xff] }
  0x17   : > { %310 = vst [vmem:[%s3079_s12 + $0x60] sm:$0xff] %v309_v8  ;;  %v313_v10 = vld [vmem:[%s3074_s11 + $0x168] sm:$0xff]  ;;  %312 = vst [vmem:[%s3079_s12 + $0x6c] sm:$0xff] %v311_v9  ;;  %v317_v12 = vld [vmem:[%s3074_s11 + $0x1b0] sm:$0xff] }
  0x18   : > { %314 = vst [vmem:[%s3079_s12 + $0x78] sm:$0xff] %v313_v10  ;;  %316 = vst [vmem:[%s3079_s12 + $0x84] sm:$0xff] %v315_v11  ;;  %v319_v13 = vld [vmem:[%s3074_s11 + $0x1d4] sm:$0xff]  ;;  %v323_v15 = vld [vmem:[%s3074_s11 + $0x21c] sm:$0xff] }
  0x19   : > { %v321_v14 = vld [vmem:[%s3074_s11 + $0x1f8] sm:$0xff]  ;;  %318 = vst [vmem:[%s3079_s12 + $0x90] sm:$0xff] %v317_v12  ;;  %320 = vst [vmem:[%s3079_s12 + $0x9c] sm:$0xff] %v319_v13  ;;  %v325_v16 = vld [vmem:[%s3074_s11 + $0x240] sm:$0xff] }
  0x1a   : > { %322 = vst [vmem:[%s3079_s12 + $0xa8] sm:$0xff] %v321_v14  ;;  %v327_v17 = vld [vmem:[%s3074_s11 + $0x264] sm:$0xff]  ;;  %324 = vst [vmem:[%s3079_s12 + $0xb4] sm:$0xff] %v323_v15  ;;  %v331_v19 = vld [vmem:[%s3074_s11 + $0x2ac] sm:$0xff] }
  0x1b   : > { %326 = vst [vmem:[%s3079_s12 + $0xc0] sm:$0xff] %v325_v16  ;;  %328 = vst [vmem:[%s3079_s12 + $0xcc] sm:$0xff] %v327_v17  ;;  %v329_v18 = vld [vmem:[%s3074_s11 + $0x288] sm:$0xff]  ;;  %v333_v20 = vld [vmem:[%s3074_s11 + $0x2d0] sm:$0xff] }
  0x1c   : > { %330 = vst [vmem:[%s3079_s12 + $0xd8] sm:$0xff] %v329_v18  ;;  %332 = vst [vmem:[%s3079_s12 + $0xe4] sm:$0xff] %v331_v19  ;;  %v335_v21 = vld [vmem:[%s3074_s11 + $0x2f4] sm:$0xff]  ;;  %v339_v23 = vld [vmem:[%s3074_s11 + $0x33c] sm:$0xff] }
  0x1d   : > { %334 = vst [vmem:[%s3079_s12 + $0xf0] sm:$0xff] %v333_v20  ;;  %v337_v22 = vld [vmem:[%s3074_s11 + $0x318] sm:$0xff]  ;;  %336 = vst [vmem:[%s3079_s12 + $0xfc] sm:$0xff] %v335_v21  ;;  %v341_v24 = vld [vmem:[%s3074_s11 + $0x360] sm:$0xff] }
  0x1e   : > { %338 = vst [vmem:[%s3079_s12 + $0x108] sm:$0xff] %v337_v22  ;;  %340 = vst [vmem:[%s3079_s12 + $0x114] sm:$0xff] %v339_v23  ;;  %v343_v25 = vld [vmem:[%s3074_s11 + $0x384] sm:$0xff]  ;;  %v347_v27 = vld [vmem:[%s3074_s11 + $0x3cc] sm:$0xff] }
  0x1f   : > { %v345_v26 = vld [vmem:[%s3074_s11 + $0x3a8] sm:$0xff]  ;;  %342 = vst [vmem:[%s3079_s12 + $0x120] sm:$0xff] %v341_v24  ;;  %344 = vst [vmem:[%s3079_s12 + $0x12c] sm:$0xff] %v343_v25  ;;  %v349_v28 = vld [vmem:[%s3074_s11 + $0x3f0] sm:$0xff] }
  0x20   : > { %346 = vst [vmem:[%s3079_s12 + $0x138] sm:$0xff] %v345_v26  ;;  %v351_v29 = vld [vmem:[%s3074_s11 + $0x414] sm:$0xff]  ;;  %348 = vst [vmem:[%s3079_s12 + $0x144] sm:$0xff] %v347_v27  ;;  %v355_v31 = vld [vmem:[%s3074_s11 + $0x45c] sm:$0xff] }
  0x21   : > { %350 = vst [vmem:[%s3079_s12 + $0x150] sm:$0xff] %v349_v28  ;;  %352 = vst [vmem:[%s3079_s12 + $0x15c] sm:$0xff] %v351_v29  ;;  %v353_v30 = vld [vmem:[%s3074_s11 + $0x438] sm:$0xff]  ;;  %v357_v32 = vld [vmem:[%s3074_s11 + $0x480] sm:$0xff] }
  0x22   : > { %354 = vst [vmem:[%s3079_s12 + $0x168] sm:$0xff] %v353_v30  ;;  %356 = vst [vmem:[%s3079_s12 + $0x174] sm:$0xff] %v355_v31  ;;  %v359_v33 = vld [vmem:[%s3074_s11 + $0x4a4] sm:$0xff]  ;;  %v363_v35 = vld [vmem:[%s3074_s11 + $0x4ec] sm:$0xff] }
  0x23   : > { %358 = vst [vmem:[%s3079_s12 + $0x180] sm:$0xff] %v357_v32  ;;  %v361_v34 = vld [vmem:[%s3074_s11 + $0x4c8] sm:$0xff]  ;;  %360 = vst [vmem:[%s3079_s12 + $0x18c] sm:$0xff] %v359_v33  ;;  %v2401_v38 = vld [vmem:[%s3074_s11 + $0x50] sm:$0xf] }
  0x24   : > { %362 = vst [vmem:[%s3079_s12 + $0x198] sm:$0xff] %v361_v34  ;;  %364 = vst [vmem:[%s3079_s12 + $0x1a4] sm:$0xff] %v363_v35  ;;  %v2397_v36 = vld [vmem:[%s3074_s11 + $0x8] sm:$0xf]  ;;  %v2399_v37 = vld [vmem:[%s3074_s11 + $0x2c] sm:$0xf] }
  0x25   : > { %2398 = vst [vmem:[%s3079_s12 + $0x8] sm:$0xf] %v2397_v36  ;;  %2400 = vst [vmem:[%s3079_s12 + $0x14] sm:$0xf] %v2399_v37  ;;  %v2403_v39 = vld [vmem:[%s3074_s11 + $0x74] sm:$0xf] }
  0x26   : > { %2402 = vst [vmem:[%s3079_s12 + $0x20] sm:$0xf] %v2401_v38  ;;  %v2405_v40 = vld [vmem:[%s3074_s11 + $0x98] sm:$0xf]  ;;  %v2407_v41 = vld [vmem:[%s3074_s11 + $0xbc] sm:$0xf] }
  0x27   : > { %2404 = vst [vmem:[%s3079_s12 + $0x2c] sm:$0xf] %v2403_v39  ;;  %2406 = vst [vmem:[%s3079_s12 + $0x38] sm:$0xf] %v2405_v40  ;;  %v2409_v42 = vld [vmem:[%s3074_s11 + $0xe0] sm:$0xf] }
  0x28   : > { %2408 = vst [vmem:[%s3079_s12 + $0x44] sm:$0xf] %v2407_v41  ;;  %v2411_v43 = vld [vmem:[%s3074_s11 + $0x104] sm:$0xf]  ;;  %v2413_v44 = vld [vmem:[%s3074_s11 + $0x128] sm:$0xf] }
  0x29   : > { %2410 = vst [vmem:[%s3079_s12 + $0x50] sm:$0xf] %v2409_v42  ;;  %2412 = vst [vmem:[%s3079_s12 + $0x5c] sm:$0xf] %v2411_v43  ;;  %v2415_v45 = vld [vmem:[%s3074_s11 + $0x14c] sm:$0xf] }
  0x2a   : > { %2414 = vst [vmem:[%s3079_s12 + $0x68] sm:$0xf] %v2413_v44  ;;  %v2417_v46 = vld [vmem:[%s3074_s11 + $0x170] sm:$0xf]  ;;  %v2419_v47 = vld [vmem:[%s3074_s11 + $0x194] sm:$0xf] }
  0x2b   : > { %2416 = vst [vmem:[%s3079_s12 + $0x74] sm:$0xf] %v2415_v45  ;;  %2418 = vst [vmem:[%s3079_s12 + $0x80] sm:$0xf] %v2417_v46  ;;  %v2421_v48 = vld [vmem:[%s3074_s11 + $0x1b8] sm:$0xf] }
  0x2c   : > { %2420 = vst [vmem:[%s3079_s12 + $0x8c] sm:$0xf] %v2419_v47  ;;  %v2423_v49 = vld [vmem:[%s3074_s11 + $0x1dc] sm:$0xf]  ;;  %v2425_v50 = vld [vmem:[%s3074_s11 + $0x200] sm:$0xf] }
  0x2d   : > { %2422 = vst [vmem:[%s3079_s12 + $0x98] sm:$0xf] %v2421_v48  ;;  %2424 = vst [vmem:[%s3079_s12 + $0xa4] sm:$0xf] %v2423_v49  ;;  %v2427_v51 = vld [vmem:[%s3074_s11 + $0x224] sm:$0xf] }
  0x2e   : > { %2426 = vst [vmem:[%s3079_s12 + $0xb0] sm:$0xf] %v2425_v50  ;;  %v2429_v52 = vld [vmem:[%s3074_s11 + $0x248] sm:$0xf]  ;;  %v2431_v53 = vld [vmem:[%s3074_s11 + $0x26c] sm:$0xf] }
  0x2f   : > { %2428 = vst [vmem:[%s3079_s12 + $0xbc] sm:$0xf] %v2427_v51  ;;  %2430 = vst [vmem:[%s3079_s12 + $0xc8] sm:$0xf] %v2429_v52  ;;  %v2433_v54 = vld [vmem:[%s3074_s11 + $0x290] sm:$0xf] }
  0x30   : > { %2432 = vst [vmem:[%s3079_s12 + $0xd4] sm:$0xf] %v2431_v53  ;;  %v2435_v55 = vld [vmem:[%s3074_s11 + $0x2b4] sm:$0xf]  ;;  %v2437_v56 = vld [vmem:[%s3074_s11 + $0x2d8] sm:$0xf] }
  0x31   : > { %2434 = vst [vmem:[%s3079_s12 + $0xe0] sm:$0xf] %v2433_v54  ;;  %2436 = vst [vmem:[%s3079_s12 + $0xec] sm:$0xf] %v2435_v55  ;;  %v2439_v57 = vld [vmem:[%s3074_s11 + $0x2fc] sm:$0xf] }
  0x32   : > { %2438 = vst [vmem:[%s3079_s12 + $0xf8] sm:$0xf] %v2437_v56  ;;  %v2441_v58 = vld [vmem:[%s3074_s11 + $0x320] sm:$0xf]  ;;  %v2443_v59 = vld [vmem:[%s3074_s11 + $0x344] sm:$0xf] }
  0x33   : > { %2440 = vst [vmem:[%s3079_s12 + $0x104] sm:$0xf] %v2439_v57  ;;  %2442 = vst [vmem:[%s3079_s12 + $0x110] sm:$0xf] %v2441_v58  ;;  %v2445_v60 = vld [vmem:[%s3074_s11 + $0x368] sm:$0xf] }
  0x34   : > { %2444 = vst [vmem:[%s3079_s12 + $0x11c] sm:$0xf] %v2443_v59  ;;  %v2447_v61 = vld [vmem:[%s3074_s11 + $0x38c] sm:$0xf]  ;;  %v2449_v62 = vld [vmem:[%s3074_s11 + $0x3b0] sm:$0xf] }
  0x35   : > { %2446 = vst [vmem:[%s3079_s12 + $0x128] sm:$0xf] %v2445_v60  ;;  %2448 = vst [vmem:[%s3079_s12 + $0x134] sm:$0xf] %v2447_v61  ;;  %v2451_v63 = vld [vmem:[%s3074_s11 + $0x3d4] sm:$0xf] }
  0x36   : > { %2450 = vst [vmem:[%s3079_s12 + $0x140] sm:$0xf] %v2449_v62  ;;  %v2453_v0 = vld [vmem:[%s3074_s11 + $0x3f8] sm:$0xf]  ;;  %v2455_v1 = vld [vmem:[%s3074_s11 + $0x41c] sm:$0xf] }
  0x37   : > { %2452 = vst [vmem:[%s3079_s12 + $0x14c] sm:$0xf] %v2451_v63  ;;  %2454 = vst [vmem:[%s3079_s12 + $0x158] sm:$0xf] %v2453_v0  ;;  %v2457_v2 = vld [vmem:[%s3074_s11 + $0x440] sm:$0xf] }
  0x38   : > { %2456 = vst [vmem:[%s3079_s12 + $0x164] sm:$0xf] %v2455_v1  ;;  %v2459_v3 = vld [vmem:[%s3074_s11 + $0x464] sm:$0xf]  ;;  %v2461_v4 = vld [vmem:[%s3074_s11 + $0x488] sm:$0xf] }
  0x39   : > { %2458 = vst [vmem:[%s3079_s12 + $0x170] sm:$0xf] %v2457_v2  ;;  %2460 = vst [vmem:[%s3079_s12 + $0x17c] sm:$0xf] %v2459_v3  ;;  %v2463_v5 = vld [vmem:[%s3074_s11 + $0x4ac] sm:$0xf] }
  0x3a   : > { %2462 = vst [vmem:[%s3079_s12 + $0x188] sm:$0xf] %v2461_v4  ;;  %v2465_v6 = vld [vmem:[%s3074_s11 + $0x4d0] sm:$0xf]  ;;  %v2467_v7 = vld [vmem:[%s3074_s11 + $0x4f4] sm:$0xf] }
  0x3b   : > { %2464 = vst [vmem:[%s3079_s12 + $0x194] sm:$0xf] %v2463_v5  ;;  %2466 = vst [vmem:[%s3079_s12 + $0x1a0] sm:$0xf] %v2465_v6 }
  0x3c   : > { %2468 = vst [vmem:[%s3079_s12 + $0x1ac] sm:$0xf] %v2467_v7 }
  0x3d PF: > { %p2469_p6 = scmp.ge.s32.totalorder %s2992_s25, 1  ;;  %p460_p7 = scmp.lt.s32.totalorder %s2992_s25, 4 }
  0x3f   : > { %p461_p8 = pnand %p2469_p6, %p460_p7 }
  0x40   : > { %s467_s13 = sand.u32 (!%p461_p8), 1, %s2976_s21   ;;  %s524_s14 = smul.u32 (!%p461_p8), 48, %s2984_s23 }
  0x41   : > { %464 = sbr.rel (%p461_p8) target bundleno = 756 (0x2f4), region = 66  ;;  %p2471_p10 = scmp.ne.s32.totalorder (!%p461_p8), %s2984_s23, 0 }
  0x42   : > { %s2789_s15 = smul.u32 (!%p461_p8), 432, %s467_s13  ;;  %p525_p9 = scmp.lt.s32.totalorder (!%p461_p8), %s524_s14, 143 }
  0x44   : > { %s3231_s20 = scalar_lea.vmem (!%p461_p8), [#allocation3], %s2789_s15 }
  0x48   : > { %s3672_s14 = smov (!%p525_p9, %s524_s14), 143  ;;  %562 = sbr.rel (%p2471_p10) target bundleno = 92 (0x5c), region = 74 }
  0x49   : > { %s2470_s16 = sshll.u32 %s3672_s14, 2  ;;  %v2994_v8 = vmov (!%p2471_p10), 0.0  }
  0x4a   : > { %s3229_s19 = scalar_lea.vmem %s3659_s1, %s2470_s16  ;;  %563 = vst [vmem:[#allocation2] sm:$0xff] (!%p2471_p10), %v2994_v8  ;;  %564 = vst [vmem:[#allocation2 + $0x8] sm:$0xff] (!%p2471_p10), %v2994_v8 }
  0x4b   : > { %565 = vst [vmem:[#allocation2 + $0x10] sm:$0xff] (!%p2471_p10), %v2994_v8  ;;  %566 = vst [vmem:[#allocation2 + $0x18] sm:$0xff] (!%p2471_p10), %v2994_v8 }
  0x4c   : > { %567 = vst [vmem:[#allocation2 + $0x20] sm:$0xff] (!%p2471_p10), %v2994_v8  ;;  %568 = vst [vmem:[#allocation2 + $0x28] sm:$0xff] (!%p2471_p10), %v2994_v8 }
  0x4d   : > { %569 = vst [vmem:[#allocation2 + $0x30] sm:$0xff] (!%p2471_p10), %v2994_v8  ;;  %570 = vst [vmem:[#allocation2 + $0x38] sm:$0xff] (!%p2471_p10), %v2994_v8 }
  0x4e   : > { %571 = vst [vmem:[#allocation2 + $0x40] sm:$0xff] (!%p2471_p10), %v2994_v8  ;;  %572 = vst [vmem:[#allocation2 + $0x48] sm:$0xff] (!%p2471_p10), %v2994_v8 }
  0x4f   : > { %573 = vst [vmem:[#allocation2 + $0x50] sm:$0xff] %v2994_v8  ;;  %574 = vst [vmem:[#allocation2 + $0x58] sm:$0xff] %v2994_v8 }
  0x50   : > { %575 = vst [vmem:[#allocation2 + $0x60] sm:$0xff] %v2994_v8  ;;  %576 = vst [vmem:[#allocation2 + $0x68] sm:$0xff] %v2994_v8 }
  0x51   : > { %577 = vst [vmem:[#allocation2 + $0x70] sm:$0xff] %v2994_v8  ;;  %578 = vst [vmem:[#allocation2 + $0x78] sm:$0xff] %v2994_v8 }
  0x52   : > { %579 = vst [vmem:[#allocation2 + $0x80] sm:$0xff] %v2994_v8  ;;  %580 = vst [vmem:[#allocation2 + $0x88] sm:$0xff] %v2994_v8 }
  0x53   : > { %581 = vst [vmem:[#allocation2 + $0x90] sm:$0xff] %v2994_v8  ;;  %582 = vst [vmem:[#allocation2 + $0x98] sm:$0xff] %v2994_v8 }
  0x54   : > { %583 = vst [vmem:[#allocation2 + $0xa0] sm:$0xff] %v2994_v8  ;;  %584 = vst [vmem:[#allocation2 + $0xa8] sm:$0xff] %v2994_v8 }
  0x55   : > { %585 = vst [vmem:[#allocation2 + $0xb0] sm:$0xff] %v2994_v8  ;;  %586 = vst [vmem:[#allocation2 + $0xb8] sm:$0xff] %v2994_v8 }
  0x56   : > { %587 = vst [vmem:[#allocation2 + $0xc0] sm:$0xff] %v2994_v8  ;;  %588 = vst [vmem:[#allocation2 + $0xc8] sm:$0xff] %v2994_v8 }
  0x57   : > { %589 = vst [vmem:[#allocation2 + $0xd0] sm:$0xff] %v2994_v8  ;;  %590 = vst [vmem:[#allocation2 + $0xd8] sm:$0xff] %v2994_v8 }
  0x58   : > { %591 = vst [vmem:[#allocation2 + $0xe0] sm:$0xff] %v2994_v8  ;;  %592 = vst [vmem:[#allocation2 + $0xe8] sm:$0xff] %v2994_v8 }
  0x59   : > { %593 = vst [vmem:[#allocation2 + $0xf0] sm:$0xff] %v2994_v8  ;;  %594 = vst [vmem:[#allocation2 + $0xf8] sm:$0xff] %v2994_v8 }
  0x5a   : > { %595 = vst [vmem:[#allocation2 + $0x100] sm:$0xff] %v2994_v8  ;;  %596 = vst [vmem:[#allocation2 + $0x108] sm:$0xff] %v2994_v8 }
  0x5b   : > { %597 = vst [vmem:[#allocation2 + $0x110] sm:$0xff] %v2994_v8  ;;  %598 = vst [vmem:[#allocation2 + $0x118] sm:$0xff] %v2994_v8 }
  0x5c PF: > { %v2832_v9 = vld [vmem:[%s3229_s19] sm:$0xff]   ;;  %v2995_v10 = vmov 0   ;;  %v2833_v11 = vld [vmem:[%s3229_s19 + $0x8] sm:$0xff]   ;;  %v2834_v12 = vld [vmem:[%s3229_s19 + $0x10] sm:$0xff]   ;;  %p2550_p11 = scmp.ne.s32.totalorder %s2984_s23, 2 }
  0x5d   : > { %1187 = vmatprep.subr.bf16.mxu0 %v2995_v10  ;;  %2740 = vmatprep.subr.bf16.mxu1 %v2995_v10  ;;  %v2835_v13 = vld [vmem:[%s3229_s19 + $0x18] sm:$0xff]   ;;  %v2836_v14 = vld [vmem:[%s3229_s19 + $0x20] sm:$0xff]   ;;  %v2837_v16 = vld [vmem:[%s3229_s19 + $0x28] sm:$0xff]  }
  0x5e   : > { %1188 = vmatpush1.bf16.msra.mxu0 %v2832_v9  ;;  %2756 = vmatpush1.bf16.msra.mxu1 %v2832_v9  ;;  %v2850_v15 = vld [vmem:[%s3231_s20 + $0x4] ss:$12 sps:$4 sm:$0xff]   ;;  %v2853_v17 = vld [vmem:[%s3231_s20 + $0x154] ss:$12 sps:$4 sm:$0xff]   ;;  %v2839_v19 = vld [vmem:[%s3229_s19 + $0x38] sm:$0xff]  }
  0x5f   : > { %1189 = vmatprep.subr.bf16.mxu0 %v2995_v10  ;;  %2741 = vmatprep.subr.bf16.mxu1 %v2995_v10  ;;  %v2838_v18 = vld [vmem:[%s3229_s19 + $0x30] sm:$0xff]   ;;  %v2840_v20 = vld [vmem:[%s3229_s19 + $0x40] sm:$0xff]   ;;  %v2841_v21 = vld [vmem:[%s3229_s19 + $0x48] sm:$0xff]  }
  0x60   : > { %1219 = vmatprep.mubr.bf16.mxu0 %v2850_v15  ;;  %1331 = vmatprep.mubr.bf16.mxu1 %v2853_v17  ;;  %v2842_v22 = vld [vmem:[%s3229_s19 + $0x50] sm:$0xff]   ;;  %v2843_v23 = vld [vmem:[%s3229_s19 + $0x58] sm:$0xff]   ;;  %v2844_v24 = vld [vmem:[%s3229_s19 + $0x60] sm:$0xff]  }
  0x61   : > { %v2845_v25 = vld [vmem:[%s3229_s19 + $0x68] sm:$0xff]   ;;  %v2846_v26 = vld [vmem:[%s3229_s19 + $0x70] sm:$0xff]   ;;  %v2847_v27 = vld [vmem:[%s3229_s19 + $0x78] sm:$0xff]  }
  0x62   : > { %1190 = vmatpush1.bf16.msra.mxu0 %v2833_v11  ;;  %2757 = vmatpush1.bf16.msra.mxu1 %v2833_v11  ;;  %v2854_v28 = vld [vmem:[%s3229_s19 + $0x80] sm:$0xff]   ;;  %v2856_v31 = vld [vmem:[%s3231_s20 + $0x1c] ss:$12 sps:$4 sm:$0xff]   ;;  %v2858_v33 = vld [vmem:[%s3231_s20 + $0x16c] ss:$12 sps:$4 sm:$0xff]  }
  0x63   : > { %1191 = vmatprep.subr.bf16.mxu0 %v2995_v10  ;;  %2742 = vmatprep.subr.bf16.mxu1 %v2995_v10  ;;  %v2848_v29 = vld [vmem:[%s3231_s20] ss:$12 sps:$4 sm:$0xff]   ;;  %v2851_v30 = vld [vmem:[%s3231_s20 + $0x150] ss:$12 sps:$4 sm:$0xff]   ;;  %v2860_v35 = vld [vmem:[%s3231_s20 + $0x18] ss:$12 sps:$4 sm:$0xff]  }
  0x64   : > { %v2855_v32 = vld [vmem:[%s3229_s19 + $0x88] sm:$0xff]   ;;  %v2862_v34 = vld [vmem:[%s3229_s19 + $0x90] sm:$0xff]   ;;  %v2863_v38 = vld [vmem:[%s3229_s19 + $0x98] sm:$0xff]  }
  0x65   : > { %v2861_v36 = vld [vmem:[%s3231_s20 + $0x168] ss:$12 sps:$4 sm:$0xff]   ;;  %v2866_v39 = vld [vmem:[%s3231_s20 + $0x184] ss:$12 sps:$4 sm:$0xff]   ;;  %v2869_v42 = vld [vmem:[%s3231_s20 + $0x180] ss:$12 sps:$4 sm:$0xff]  }
  0x66   : > { %1192 = vmatpush1.bf16.msra.mxu0 %v2834_v12  ;;  %2758 = vmatpush1.bf16.msra.mxu1 %v2834_v12  ;;  %v2864_v37 = vld [vmem:[%s3231_s20 + $0x34] ss:$12 sps:$4 sm:$0xff]   ;;  %v2868_v41 = vld [vmem:[%s3231_s20 + $0x30] ss:$12 sps:$4 sm:$0xff]   ;;  %v2872_v43 = vld [vmem:[%s3231_s20 + $0x4c] ss:$12 sps:$4 sm:$0xff]  }
  0x67   : > { %1193 = vmatprep.subr.bf16.mxu0 %v2995_v10  ;;  %2743 = vmatprep.subr.bf16.mxu1 %v2995_v10  ;;  %v2870_v40 = vld [vmem:[%s3229_s19 + $0xa0] sm:$0xff]   ;;  %v2871_v44 = vld [vmem:[%s3229_s19 + $0xa8] sm:$0xff]   ;;  %v2878_v46 = vld [vmem:[%s3229_s19 + $0xb0] sm:$0xff]  }
  0x68   : > { %v2874_v45 = vld [vmem:[%s3231_s20 + $0x19c] ss:$12 sps:$4 sm:$0xff]   ;;  %v2877_v48 = vld [vmem:[%s3231_s20 + $0x198] ss:$12 sps:$4 sm:$0xff]   ;;  %v2883_v52 = vld [vmem:[%s3231_s20 + $0x60] ss:$12 sps:$4 sm:$0xff]  }
  0x69   : > { %v2876_v47 = vld [vmem:[%s3231_s20 + $0x48] ss:$12 sps:$4 sm:$0xff]   ;;  %v2880_v49 = vld [vmem:[%s3231_s20 + $0x64] ss:$12 sps:$4 sm:$0xff]   ;;  %v2884_v53 = vld [vmem:[%s3231_s20 + $0x20] ss:$12 sps:$4 sm:$0xff]  }
  0x6a   : > { %1194 = vmatpush1.bf16.msra.mxu0 %v2835_v13  ;;  %2759 = vmatpush1.bf16.msra.mxu1 %v2835_v13  ;;  %v2879_v50 = vld [vmem:[%s3229_s19 + $0xb8] sm:$0xff]   ;;  %v2890_v58 = vld [vmem:[%s3231_s20 + $0x94] ss:$12 sps:$4 sm:$0xff]   ;;  %v2900_v2 = vld [vmem:[%s3231_s20 + $0xc4] ss:$12 sps:$4 sm:$0xff]  }
  0x6b   : > { %1195 = vmatprep.subr.bf16.mxu0 %v2995_v10  ;;  %2744 = vmatprep.subr.bf16.mxu1 %v2995_v10  ;;  %v2882_v51 = vld [vmem:[%s3231_s20 + $0x8] ss:$12 sps:$4 sm:$0xff]   ;;  %v2887_v55 = vld [vmem:[%s3231_s20 + $0x38] ss:$12 sps:$4 sm:$0xff]   ;;  %v2889_v57 = vld [vmem:[%s3231_s20 + $0x50] ss:$12 sps:$4 sm:$0xff]  }
  0x6c   : > { %v2885_v54 = vld [vmem:[%s3231_s20 + $0x7c] ss:$12 sps:$4 sm:$0xff]   ;;  %v2888_v56 = vld [vmem:[%s3231_s20 + $0x78] ss:$12 sps:$4 sm:$0xff]   ;;  %v2894_v61 = vld [vmem:[%s3231_s20 + $0x80] ss:$12 sps:$4 sm:$0xff]  }
  0x6d   : > { %v2892_v59 = vld [vmem:[%s3231_s20 + $0x68] ss:$12 sps:$4 sm:$0xff]   ;;  %v2893_v60 = vld [vmem:[%s3231_s20 + $0x90] ss:$12 sps:$4 sm:$0xff]   ;;  %v2895_v62 = vld [vmem:[%s3231_s20 + $0xac] ss:$12 sps:$4 sm:$0xff]  }
  0x6e   : > { %1196 = vmatpush1.bf16.msra.mxu0 %v2836_v14  ;;  %2760 = vmatpush1.bf16.msra.mxu1 %v2836_v14  ;;  %v2897_v63 = vld [vmem:[%s3231_s20 + $0x98] ss:$12 sps:$4 sm:$0xff]   ;;  %v2898_v0 = vld [vmem:[%s3231_s20 + $0xa8] ss:$12 sps:$4 sm:$0xff]   ;;  %v2899_v1 = vld [vmem:[%s3231_s20 + $0xb0] ss:$12 sps:$4 sm:$0xff]  }
  0x6f   : > { %1197 = vmatprep.subr.bf16.mxu0 %v2995_v10  ;;  %2745 = vmatprep.subr.bf16.mxu1 %v2995_v10  ;;  %v2902_v3 = vld [vmem:[%s3231_s20 + $0xc8] ss:$12 sps:$4 sm:$0xff]   ;;  %v2903_v4 = vld [vmem:[%s3231_s20 + $0xc0] ss:$12 sps:$4 sm:$0xff]   ;;  %v2907_v7 = vld [vmem:[%s3231_s20 + $0xf8] ss:$12 sps:$4 sm:$0xff]  }
  0x70   : > { %v2904_v5 = vld [vmem:[%s3231_s20 + $0xe0] ss:$12 sps:$4 sm:$0xff]   ;;  %v2905_v6 = vld [vmem:[%s3231_s20 + $0xdc] ss:$12 sps:$4 sm:$0xff]   ;;  %v2908_v8 = vld [vmem:[%s3231_s20 + $0xd8] ss:$12 sps:$4 sm:$0xff]  }
  0x71   : > { %v2909_v9 = vld [vmem:[%s3231_s20 + $0x110] ss:$12 sps:$4 sm:$0xff]   ;;  %v2912_v11 = vld [vmem:[%s3231_s20 + $0x128] ss:$12 sps:$4 sm:$0xff]   ;;  %v2914_v13 = vld [vmem:[%s3231_s20 + $0x140] ss:$12 sps:$4 sm:$0xff]  }
  0x72   : > { %1198 = vmatpush1.bf16.msra.mxu0 %v2837_v16  ;;  %2761 = vmatpush1.bf16.msra.mxu1 %v2837_v16  ;;  %v2913_v12 = vld [vmem:[%s3231_s20 + $0xf0] ss:$12 sps:$4 sm:$0xff]   ;;  %v2915_v14 = vld [vmem:[%s3231_s20 + $0x10c] ss:$12 sps:$4 sm:$0xff]   ;;  %v2918_v16 = vld [vmem:[%s3231_s20 + $0x108] ss:$12 sps:$4 sm:$0xff]  }
  0x73   : > { %1199 = vmatprep.subr.bf16.mxu0 %v2995_v10  ;;  %2746 = vmatprep.subr.bf16.mxu1 %v2995_v10  ;;  %v2917_v15 = vld [vmem:[%s3231_s20 + $0x158] ss:$12 sps:$4 sm:$0xff]   ;;  %v2919_v17 = vld [vmem:[%s3231_s20 + $0x170] ss:$12 sps:$4 sm:$0xff]  }
  0x76   : > { %1200 = vmatpush1.bf16.msra.mxu0 %v2838_v18  ;;  %2762 = vmatpush1.bf16.msra.mxu1 %v2838_v18  ;;  %v2920_v18 = vld [vmem:[%s3231_s20 + $0x124] ss:$12 sps:$4 sm:$0xff]  }
  0x77   : > { %1201 = vmatprep.subr.bf16.mxu0 %v2995_v10  ;;  %2747 = vmatprep.subr.bf16.mxu1 %v2995_v10 }
  0x7a   : > { %1202 = vmatpush1.bf16.msra.mxu0 %v2839_v19  ;;  %2763 = vmatpush1.bf16.msra.mxu1 %v2839_v19  ;;  %v2922_v19 = vld [vmem:[%s3231_s20 + $0x188] ss:$12 sps:$4 sm:$0xff]  }
  0x7b   : > { %1203 = vmatprep.subr.bf16.mxu0 %v2995_v10  ;;  %2748 = vmatprep.subr.bf16.mxu1 %v2995_v10 }
  0x7e   : > { %1204 = vmatpush1.bf16.msra.mxu0 %v2840_v20  ;;  %2764 = vmatpush1.bf16.msra.mxu1 %v2840_v20  ;;  %v2923_v20 = vld [vmem:[%s3231_s20 + $0x120] ss:$12 sps:$4 sm:$0xff]  }
  0x7f   : > { %1205 = vmatprep.subr.bf16.mxu0 %v2995_v10  ;;  %2749 = vmatprep.subr.bf16.mxu1 %v2995_v10 }
  0x82   : > { %1206 = vmatpush1.bf16.msra.mxu0 %v2841_v21  ;;  %2765 = vmatpush1.bf16.msra.mxu1 %v2841_v21  ;;  %v2924_v21 = vld [vmem:[%s3231_s20 + $0x1a0] ss:$12 sps:$4 sm:$0xff]  }
  0x83   : > { %1207 = vmatprep.subr.bf16.mxu0 %v2995_v10  ;;  %2750 = vmatprep.subr.bf16.mxu1 %v2995_v10 }
  0x86   : > { %1208 = vmatpush1.bf16.msra.mxu0 %v2842_v22  ;;  %2766 = vmatpush1.bf16.msra.mxu1 %v2842_v22  ;;  %v2925_v22 = vld [vmem:[%s3231_s20 + $0x13c] ss:$12 sps:$4 sm:$0xff]  }
  0x87   : > { %1209 = vmatprep.subr.bf16.mxu0 %v2995_v10  ;;  %2751 = vmatprep.subr.bf16.mxu1 %v2995_v10 }
  0x8a   : > { %1210 = vmatpush1.bf16.msra.mxu0 %v2843_v23  ;;  %2767 = vmatpush1.bf16.msra.mxu1 %v2843_v23  ;;  %v2927_v23 = vld [vmem:[%s3231_s20 + $0x138] ss:$12 sps:$4 sm:$0xff]  }
  0x8b   : > { %1211 = vmatprep.subr.bf16.mxu0 %v2995_v10  ;;  %2752 = vmatprep.subr.bf16.mxu1 %v2995_v10 }
  0x8e   : > { %1212 = vmatpush1.bf16.msra.mxu0 %v2844_v24  ;;  %2768 = vmatpush1.bf16.msra.mxu1 %v2844_v24 }
  0x8f   : > { %1213 = vmatprep.subr.bf16.mxu0 %v2995_v10  ;;  %2753 = vmatprep.subr.bf16.mxu1 %v2995_v10 }
  0x92   : > { %1214 = vmatpush1.bf16.msra.mxu0 %v2845_v25  ;;  %2769 = vmatpush1.bf16.msra.mxu1 %v2845_v25 }
  0x93   : > { %1215 = vmatprep.subr.bf16.mxu0 %v2995_v10  ;;  %2754 = vmatprep.subr.bf16.mxu1 %v2995_v10 }
  0x96   : > { %1216 = vmatpush1.bf16.msra.mxu0 %v2846_v26  ;;  %2770 = vmatpush1.bf16.msra.mxu1 %v2846_v26 }
  0x97   : > { %1217 = vmatprep.subr.bf16.mxu0 %v2995_v10  ;;  %2755 = vmatprep.subr.bf16.mxu1 %v2995_v10  ;;  %v2910_v10 = vld [vmem:[%s3231_s20 + $0xf4] ss:$12 sps:$4 sm:$0xff]  }
  0x9a   : > { %1218 = vmatpush1.bf16.msra.mxu0 %v2847_v27  ;;  %2771 = vmatpush1.bf16.msra.mxu1 %v2847_v27 }
  0x9b   : > { %2636 = vmatprep.subr.bf16.mxu1 %v2854_v28 }
  0x9d   : > { %1220 = vmatmul.mubr.bf16.vlgmr.msra.gmra.mrb[0].mxu0 %v2848_v29  ;;  %1332 = vmatmul.mubr.bf16.vlgmr.msra.gmra.mrb[0].mxu1 %v2851_v30 }
  0x9e   : > { %2637 = vmatpush3.bf16.msra.mxu1 %v2854_v28  ;;  %1227 = vmatprep.mubr.bf16.mxu0 %v2856_v31 }
  0x9f   : > { %2638 = vmatprep.subr.bf16.mxu1 %v2855_v32  ;;  %1339 = vmatprep.mubr.bf16.mxu1 %v2858_v33 }
  0xa2   : > { %2639 = vmatpush3.bf16.msra.mxu1 %v2855_v32 }
  0xa3   : > { %2640 = vmatprep.subr.bf16.mxu1 %v2862_v34 }
  0xa5   : > { %1228 = vmatmul.mubr.bf16.gmra.mrb[4].mxu0 %v2860_v35  ;;  %1340 = vmatmul.mubr.bf16.gmra.mrb[4].mxu1 %v2861_v36 }
  0xa6   : > { %2641 = vmatpush3.bf16.msra.mxu1 %v2862_v34  ;;  %1235 = vmatprep.mubr.bf16.mxu0 %v2864_v37 }
  0xa7   : > { %2642 = vmatprep.subr.bf16.mxu1 %v2863_v38  ;;  %1347 = vmatprep.mubr.bf16.mxu1 %v2866_v39 }
  0xaa   : > { %2643 = vmatpush3.bf16.msra.mxu1 %v2863_v38 }
  0xab   : > { %2644 = vmatprep.subr.bf16.mxu1 %v2870_v40 }
  0xad   : > { %1236 = vmatmul.mubr.bf16.gmra.mrb[8].mxu0 %v2868_v41  ;;  %1348 = vmatmul.mubr.bf16.gmra.mrb[8].mxu1 %v2869_v42 }
  0xae   : > { %2645 = vmatpush3.bf16.msra.mxu1 %v2870_v40  ;;  %1243 = vmatprep.mubr.bf16.mxu0 %v2872_v43 }
  0xaf   : > { %2646 = vmatprep.subr.bf16.mxu1 %v2871_v44  ;;  %1355 = vmatprep.mubr.bf16.mxu1 %v2874_v45 }
  0xb2   : > { %2647 = vmatpush3.bf16.msra.mxu1 %v2871_v44 }
  0xb3   : > { %2648 = vmatprep.subr.bf16.mxu1 %v2878_v46 }
  0xb5   : > { %1244 = vmatmul.mubr.bf16.gmra.mrb[12].mxu0 %v2876_v47  ;;  %1356 = vmatmul.mubr.bf16.gmra.mrb[12].mxu1 %v2877_v48 }
  0xb6   : > { %2649 = vmatpush3.bf16.msra.mxu1 %v2878_v46  ;;  %1251 = vmatprep.mubr.bf16.mxu0 %v2880_v49 }
  0xb7   : > { %2650 = vmatprep.subr.bf16.mxu1 %v2879_v50  ;;  %2652 = vmatprep.mubr.bf16.mxu1 %v2882_v51 }
  0xba   : > { %2651 = vmatpush3.bf16.msra.mxu1 %v2879_v50 }
  0xbd   : > { %1252 = vmatmul.mubr.bf16.gmra.mrb[16].mxu0 %v2883_v52  ;;  %2653 = vmatmul.mubr.bf16.vlgmr.msra.gmra.mrb[16].mxu1 %v2884_v53 }
  0xbe   : > { %1259 = vmatprep.mubr.bf16.mxu0 %v2885_v54  ;;  %2656 = vmatprep.mubr.bf16.mxu1 %v2887_v55 }
  0xc5   : > { %1260 = vmatmul.mubr.bf16.gmra.mrb[20].mxu0 %v2888_v56  ;;  %2657 = vmatmul.mubr.bf16.gmra.mrb[20].mxu1 %v2889_v57  ;;  %v601_v57 = vld [vmem:[#allocation2 + $0x10] sm:$0xff] }
  0xc6   : > { %1267 = vmatprep.mubr.bf16.mxu0 %v2890_v58  ;;  %2660 = vmatprep.mubr.bf16.mxu1 %v2892_v59 }
  0xcd   : > { %1268 = vmatmul.mubr.bf16.gmra.mrb[24].mxu0 %v2893_v60  ;;  %2661 = vmatmul.mubr.bf16.gmra.mrb[24].mxu1 %v2894_v61  ;;  %v599_v61 = vld [vmem:[#allocation2] sm:$0xff] }
  0xce   : > { %1275 = vmatprep.mubr.bf16.mxu0 %v2895_v62  ;;  %2664 = vmatprep.mubr.bf16.mxu1 %v2897_v63 }
  0xd5   : > { %1276 = vmatmul.mubr.bf16.gmra.mrb[28].mxu0 %v2898_v0  ;;  %2665 = vmatmul.mubr.bf16.gmra.mrb[28].mxu1 %v2899_v1  ;;  %v602_v1 = vld [vmem:[#allocation2 + $0x18] sm:$0xff] }
  0xd6   : > { %1283 = vmatprep.mubr.bf16.mxu0 %v2900_v2  ;;  %2668 = vmatprep.mubr.bf16.mxu1 %v2902_v3 }
  0xdd   : > { %1284 = vmatmul.mubr.bf16.gmra.mrb[32].mxu0 %v2903_v4  ;;  %2669 = vmatmul.mubr.bf16.gmra.mrb[32].mxu1 %v2904_v5 }
  0xde   : > { %1291 = vmatprep.mubr.bf16.mxu0 %v2905_v6  ;;  %2672 = vmatprep.mubr.bf16.mxu1 %v2907_v7  ;;  %v600_v6 = vld [vmem:[#allocation2 + $0x8] sm:$0xff] }
  0xe5   : > { %1292 = vmatmul.mubr.bf16.gmra.mrb[36].mxu0 %v2908_v8  ;;  %2673 = vmatmul.mubr.bf16.gmra.mrb[36].mxu1 %v2909_v9 }
  0xe6   : > { %1299 = vmatprep.mubr.bf16.mxu0 %v2910_v10  ;;  %2676 = vmatprep.mubr.bf16.mxu1 %v2912_v11 }
  0xed   : > { %1300 = vmatmul.mubr.bf16.gmra.mrb[40].mxu0 %v2913_v12  ;;  %2677 = vmatmul.mubr.bf16.gmra.mrb[40].mxu1 %v2914_v13  ;;  %v605_v13 = vld [vmem:[#allocation2 + $0x30] sm:$0xff] }
  0xee   : > { %1307 = vmatprep.mubr.bf16.mxu0 %v2915_v14  ;;  %2680 = vmatprep.mubr.bf16.mxu1 %v2917_v15 }
  0xf5   : > { %1308 = vmatmul.mubr.bf16.gmra.mrb[44].mxu0 %v2918_v16  ;;  %2681 = vmatmul.mubr.bf16.gmra.mrb[44].mxu1 %v2919_v17  ;;  %v603_v17 = vld [vmem:[#allocation2 + $0x20] sm:$0xff] }
  0xf6   : > { %1315 = vmatprep.mubr.bf16.mxu0 %v2920_v18  ;;  %2684 = vmatprep.mubr.bf16.mxu1 %v2922_v19 }
  0xfd   : > { %1316 = vmatmul.mubr.bf16.gmra.mrb[48].mxu0 %v2923_v20  ;;  %2685 = vmatmul.mubr.bf16.gmra.mrb[48].mxu1 %v2924_v21  ;;  %v606_v21 = vld [vmem:[#allocation2 + $0x38] sm:$0xff] }
  0xfe   : > { %1323 = vmatprep.mubr.bf16.mxu0 %v2925_v22 }
 0x105   : > { %1324 = vmatmul.mubr.bf16.gmra.mrb[52].mxu0 %v2927_v23 }
 0x170   : > { %v1221_v24 = vpop.f32.mrb[0].mxu0  ;;  %v3344_v25 = vpop.f32.mrb[0].mxu1 }
 0x171   : > { %v1223_v26 = vpop.f32.mrb[1].mxu0  ;;  %v1335_v27 = vpop.f32.mrb[1].mxu1 }
 0x172   : > { %v1224_v28 = vpop.f32.mrb[2].mxu0  ;;  %v3346_v29 = vpop.f32.mrb[2].mxu1  ;;  %v604_v27 = vld [vmem:[#allocation2 + $0x28] sm:$0xff] }
 0x173   : > { %v1226_v30 = vpop.f32.mrb[3].mxu0  ;;  %v1338_v31 = vpop.f32.mrb[3].mxu1 }
 0x178   : > { %v1229_v32 = vpop.f32.mrb[4].mxu0  ;;  %v3348_v33 = vpop.f32.mrb[4].mxu1 }
 0x179   : > { %v1231_v34 = vpop.f32.mrb[5].mxu0  ;;  %v1343_v35 = vpop.f32.mrb[5].mxu1 }
 0x17a   : > { %v1232_v36 = vpop.f32.mrb[6].mxu0  ;;  %v3350_v37 = vpop.f32.mrb[6].mxu1 }
 0x17b   : > { %v1234_v38 = vpop.f32.mrb[7].mxu0  ;;  %v1346_v39 = vpop.f32.mrb[7].mxu1 }
 0x180   : > { %v1237_v40 = vpop.f32.mrb[8].mxu0  ;;  %v3352_v41 = vpop.f32.mrb[8].mxu1 }
 0x181   : > { %v1239_v42 = vpop.f32.mrb[9].mxu0  ;;  %v1351_v43 = vpop.f32.mrb[9].mxu1 }
 0x182   : > { %v1240_v44 = vpop.f32.mrb[10].mxu0  ;;  %v3354_v45 = vpop.f32.mrb[10].mxu1  ;;  %v607_v42 = vld [vmem:[#allocation2 + $0x40] sm:$0xff] }
 0x183   : > { %v1242_v46 = vpop.f32.mrb[11].mxu0  ;;  %v1354_v47 = vpop.f32.mrb[11].mxu1 }
 0x188   : > { %v1245_v48 = vpop.f32.mrb[12].mxu0  ;;  %v3356_v49 = vpop.f32.mrb[12].mxu1 }
 0x189   : > { %v1247_v50 = vpop.f32.mrb[13].mxu0  ;;  %v1359_v51 = vpop.f32.mrb[13].mxu1 }
 0x18a   : > { %v1248_v52 = vpop.f32.mrb[14].mxu0  ;;  %v3358_v53 = vpop.f32.mrb[14].mxu1 }
 0x18b   : > { %v1250_v54 = vpop.f32.mrb[15].mxu0  ;;  %v1362_v55 = vpop.f32.mrb[15].mxu1 }
 0x18c   : > { %v608_v54 = vld [vmem:[#allocation2 + $0x48] sm:$0xff] }
 0x190   : > { %v1253_v56 = vpop.f32.mrb[16].mxu0  ;;  %v2654_v58 = vpop.f32.mrb[16].mxu1 }
 0x191   : > { %v1407_v59 = vadd.f32 %v2654_v58, %v1229_v32  ;;  %v1255_v60 = vpop.f32.mrb[17].mxu0  ;;  %v1398_v62 = vpop.f32.mrb[17].mxu1 }
 0x192   : > { %v1399_v63 = vadd.f32 %v1398_v62, %v1221_v24  ;;  %v1256_v0 = vpop.f32.mrb[18].mxu0  ;;  %v2655_v2 = vpop.f32.mrb[18].mxu1  ;;  %v613_v62 = vld [vmem:[#allocation2 + $0x70] sm:$0xff] }
 0x193   : > { %v1543_v3 = vadd.f32 %v1407_v59, %v601_v57  ;;  %v1410_v4 = vadd.f32 %v2655_v2, %v1232_v36  ;;  %v1258_v5 = vpop.f32.mrb[19].mxu0  ;;  %v1401_v7 = vpop.f32.mrb[19].mxu1  ;;  %v609_v36 = vld [vmem:[#allocation2 + $0x50] sm:$0xff]  ;;  %v611_v2 = vld [vmem:[#allocation2 + $0x60] sm:$0xff] }
 0x194   : > { %v1541_v8 = vadd.f32 %v1399_v63, %v599_v61  ;;  %v1402_v9 = vadd.f32 %v1401_v7, %v1224_v28 }
 0x195   : > { %1579 = vst [vmem:[#allocation2 + $0x10] sm:$0xff] %v1543_v3  ;;  %v1544_v10 = vadd.f32 %v1410_v4, %v602_v1 }
 0x196   : > { %1577 = vst [vmem:[#allocation2] sm:$0xff] %v1541_v8  ;;  %v1542_v11 = vadd.f32 %v1402_v9, %v600_v6  ;;  %v614_v6 = vld [vmem:[#allocation2 + $0x78] sm:$0xff] }
 0x197   : > { %1580 = vst [vmem:[#allocation2 + $0x18] sm:$0xff] %v1544_v10  ;;  %v612_v10 = vld [vmem:[#allocation2 + $0x68] sm:$0xff] }
 0x198   : > { %1578 = vst [vmem:[#allocation2 + $0x8] sm:$0xff] %v1542_v11  ;;  %v1261_v12 = vpop.f32.mrb[20].mxu0  ;;  %v2658_v14 = vpop.f32.mrb[20].mxu1 }
 0x199   : > { %v1423_v15 = vadd.f32 %v2658_v14, %v1245_v48  ;;  %v1263_v16 = vpop.f32.mrb[21].mxu0  ;;  %v1414_v18 = vpop.f32.mrb[21].mxu1  ;;  %v610_v48 = vld [vmem:[#allocation2 + $0x58] sm:$0xff] }
 0x19a   : > { %v1415_v19 = vadd.f32 %v1414_v18, %v1237_v40  ;;  %v1264_v20 = vpop.f32.mrb[22].mxu0  ;;  %v2659_v22 = vpop.f32.mrb[22].mxu1 }
 0x19b   : > { %v1547_v23 = vadd.f32 %v1423_v15, %v605_v13  ;;  %v1426_v24 = vadd.f32 %v2659_v22, %v1248_v52  ;;  %v1266_v26 = vpop.f32.mrb[23].mxu0  ;;  %v1417_v28 = vpop.f32.mrb[23].mxu1 }
 0x19c   : > { %v1545_v30 = vadd.f32 %v1415_v19, %v603_v17  ;;  %v1418_v31 = vadd.f32 %v1417_v28, %v1240_v44  ;;  %v615_v19 = vld [vmem:[#allocation2 + $0x80] sm:$0xff]  ;;  %v616_v26 = vld [vmem:[#allocation2 + $0x88] sm:$0xff] }
 0x19d   : > { %1583 = vst [vmem:[#allocation2 + $0x30] sm:$0xff] %v1547_v23  ;;  %v1548_v32 = vadd.f32 %v1426_v24, %v606_v21 }
 0x19e   : > { %1581 = vst [vmem:[#allocation2 + $0x20] sm:$0xff] %v1545_v30  ;;  %v1546_v34 = vadd.f32 %v1418_v31, %v604_v27 }
 0x19f   : > { %1584 = vst [vmem:[#allocation2 + $0x38] sm:$0xff] %v1548_v32  ;;  %v617_v32 = vld [vmem:[#allocation2 + $0x90] sm:$0xff] }
 0x1a0   : > { %1582 = vst [vmem:[#allocation2 + $0x28] sm:$0xff] %v1546_v34  ;;  %v1269_v35 = vpop.f32.mrb[24].mxu0  ;;  %v2662_v38 = vpop.f32.mrb[24].mxu1 }
 0x1a1   : > { %v1439_v39 = vadd.f32 %v2662_v38, %v1261_v12  ;;  %v1271_v40 = vpop.f32.mrb[25].mxu0  ;;  %v1430_v43 = vpop.f32.mrb[25].mxu1 }
 0x1a2   : > { %v1431_v46 = vadd.f32 %v1430_v43, %v1253_v56  ;;  %v1272_v47 = vpop.f32.mrb[26].mxu0  ;;  %v2663_v50 = vpop.f32.mrb[26].mxu1  ;;  %v618_v40 = vld [vmem:[#allocation2 + $0x98] sm:$0xff] }
 0x1a3   : > { %v1551_v51 = vadd.f32 %v1439_v39, %v609_v36  ;;  %v1442_v52 = vadd.f32 %v2663_v50, %v1264_v20  ;;  %v1274_v44 = vpop.f32.mrb[27].mxu0  ;;  %v1433_v55 = vpop.f32.mrb[27].mxu1 }
 0x1a4   : > { %v1549_v57 = vadd.f32 %v1431_v46, %v607_v42  ;;  %v1434_v58 = vadd.f32 %v1433_v55, %v1256_v0 }
 0x1a5   : > { %1587 = vst [vmem:[#allocation2 + $0x50] sm:$0xff] %v1551_v51  ;;  %v1552_v59 = vadd.f32 %v1442_v52, %v610_v48  ;;  %v619_v52 = vld [vmem:[#allocation2 + $0xa0] sm:$0xff] }
 0x1a6   : > { %1585 = vst [vmem:[#allocation2 + $0x40] sm:$0xff] %v1549_v57  ;;  %v1550_v60 = vadd.f32 %v1434_v58, %v608_v54 }
 0x1a7   : > { %1588 = vst [vmem:[#allocation2 + $0x58] sm:$0xff] %v1552_v59  ;;  %v620_v59 = vld [vmem:[#allocation2 + $0xa8] sm:$0xff] }
 0x1a8   : > { %1586 = vst [vmem:[#allocation2 + $0x48] sm:$0xff] %v1550_v60  ;;  %v1277_v61 = vpop.f32.mrb[28].mxu0  ;;  %v2666_v63 = vpop.f32.mrb[28].mxu1 }
 0x1a9   : > { %v1455_v56 = vadd.f32 %v2666_v63, %v1277_v61  ;;  %v1279_v1 = vpop.f32.mrb[29].mxu0  ;;  %v1446_v3 = vpop.f32.mrb[29].mxu1 }
 0x1aa   : > { %v1447_v4 = vadd.f32 %v1446_v3, %v1269_v35  ;;  %v1280_v5 = vpop.f32.mrb[30].mxu0  ;;  %v2667_v7 = vpop.f32.mrb[30].mxu1  ;;  %v621_v3 = vld [vmem:[#allocation2 + $0xb0] sm:$0xff] }
 0x1ab   : > { %v1555_v8 = vadd.f32 %v1455_v56, %v613_v62  ;;  %v1458_v9 = vadd.f32 %v2667_v7, %v1280_v5  ;;  %v1282_v0 = vpop.f32.mrb[31].mxu0  ;;  %v1449_v11 = vpop.f32.mrb[31].mxu1  ;;  %v629_v5 = vld [vmem:[#allocation2 + $0xf0] sm:$0xff] }
 0x1ac   : > { %v1553_v12 = vadd.f32 %v1447_v4, %v611_v2  ;;  %v1450_v13 = vadd.f32 %v1449_v11, %v1272_v47  ;;  %v627_v0 = vld [vmem:[#allocation2 + $0xe0] sm:$0xff] }
 0x1ad   : > { %1591 = vst [vmem:[#allocation2 + $0x70] sm:$0xff] %v1555_v8  ;;  %v1556_v14 = vadd.f32 %v1458_v9, %v614_v6 }
 0x1ae   : > { %1589 = vst [vmem:[#allocation2 + $0x60] sm:$0xff] %v1553_v12  ;;  %v1554_v15 = vadd.f32 %v1450_v13, %v612_v10  ;;  %v622_v12 = vld [vmem:[#allocation2 + $0xb8] sm:$0xff] }
 0x1af   : > { %1592 = vst [vmem:[#allocation2 + $0x78] sm:$0xff] %v1556_v14  ;;  %v630_v14 = vld [vmem:[#allocation2 + $0xf8] sm:$0xff] }
 0x1b0   : > { %1590 = vst [vmem:[#allocation2 + $0x68] sm:$0xff] %v1554_v15  ;;  %v1285_v16 = vpop.f32.mrb[32].mxu0  ;;  %v2670_v17 = vpop.f32.mrb[32].mxu1 }
 0x1b1   : > { %v1287_v18 = vpop.f32.mrb[33].mxu0  ;;  %v1462_v20 = vpop.f32.mrb[33].mxu1 }
 0x1b2   : > { %v1463_v21 = vadd.f32 %v1462_v20, %v1285_v16  ;;  %v1288_v22 = vpop.f32.mrb[34].mxu0  ;;  %v2671_v23 = vpop.f32.mrb[34].mxu1 }
 0x1b3   : > { %v1290_v24 = vpop.f32.mrb[35].mxu0  ;;  %v1465_v27 = vpop.f32.mrb[35].mxu1 }
 0x1b4   : > { %v1557_v28 = vadd.f32 %v1463_v21, %v615_v19  ;;  %v1466_v30 = vadd.f32 %v1465_v27, %v1288_v22  ;;  %v628_v21 = vld [vmem:[#allocation2 + $0xe8] sm:$0xff]  ;;  %v623_v27 = vld [vmem:[#allocation2 + $0xc0] sm:$0xff] }
 0x1b6   : > { %1593 = vst [vmem:[#allocation2 + $0x80] sm:$0xff] %v1557_v28  ;;  %v1558_v31 = vadd.f32 %v1466_v30, %v616_v26  ;;  %v633_v30 = vld [vmem:[#allocation2 + $0x110] sm:$0xff] }
 0x1b8   : > { %1594 = vst [vmem:[#allocation2 + $0x88] sm:$0xff] %v1558_v31  ;;  %v1293_v34 = vpop.f32.mrb[36].mxu0  ;;  %v2674_v35 = vpop.f32.mrb[36].mxu1 }
 0x1b9   : > { %v1471_v36 = vadd.f32 %v2670_v17, %v1293_v34  ;;  %v1295_v38 = vpop.f32.mrb[37].mxu0  ;;  %v1478_v39 = vpop.f32.mrb[37].mxu1 }
 0x1ba   : > { %v1296_v42 = vpop.f32.mrb[38].mxu0  ;;  %v2675_v43 = vpop.f32.mrb[38].mxu1  ;;  %v624_v38 = vld [vmem:[#allocation2 + $0xc8] sm:$0xff] }
 0x1bb   : > { %v1559_v46 = vadd.f32 %v1471_v36, %v617_v32  ;;  %v1474_v47 = vadd.f32 %v2671_v23, %v1296_v42  ;;  %v1298_v48 = vpop.f32.mrb[39].mxu0  ;;  %v1481_v50 = vpop.f32.mrb[39].mxu1 }
 0x1bd   : > { %1595 = vst [vmem:[#allocation2 + $0x90] sm:$0xff] %v1559_v46  ;;  %v1560_v51 = vadd.f32 %v1474_v47, %v618_v40  ;;  %v634_v40 = vld [vmem:[#allocation2 + $0x118] sm:$0xff] }
 0x1bf   : > { %1596 = vst [vmem:[#allocation2 + $0x98] sm:$0xff] %v1560_v51  ;;  %v632_v51 = vld [vmem:[#allocation2 + $0x108] sm:$0xff] }
 0x1c0   : > { %v1301_v44 = vpop.f32.mrb[40].mxu0  ;;  %v3360_v54 = vpop.f32.mrb[40].mxu1 }
 0x1c1   : > { %v1479_v55 = vadd.f32 %v1478_v39, %v1301_v44  ;;  %v1303_v57 = vpop.f32.mrb[41].mxu0  ;;  %v1494_v58 = vpop.f32.mrb[41].mxu1 }
 0x1c2   : > { %v1304_v60 = vpop.f32.mrb[42].mxu0  ;;  %v3362_v61 = vpop.f32.mrb[42].mxu1 }
 0x1c3   : > { %v1561_v62 = vadd.f32 %v1479_v55, %v619_v52  ;;  %v1482_v63 = vadd.f32 %v1481_v50, %v1304_v60  ;;  %v1306_v56 = vpop.f32.mrb[43].mxu0  ;;  %v1497_v1 = vpop.f32.mrb[43].mxu1 }
 0x1c5   : > { %1597 = vst [vmem:[#allocation2 + $0xa0] sm:$0xff] %v1561_v62  ;;  %v1562_v2 = vadd.f32 %v1482_v63, %v620_v59  ;;  %v626_v62 = vld [vmem:[#allocation2 + $0xd8] sm:$0xff] }
 0x1c7   : > { %1598 = vst [vmem:[#allocation2 + $0xa8] sm:$0xff] %v1562_v2 }
 0x1c8   : > { %v1309_v4 = vpop.f32.mrb[44].mxu0  ;;  %v2682_v6 = vpop.f32.mrb[44].mxu1 }
 0x1c9   : > { %v1487_v7 = vadd.f32 %v2674_v35, %v1309_v4  ;;  %v1519_v8 = vadd.f32 %v2682_v6, %v3348_v33  ;;  %v1311_v9 = vpop.f32.mrb[45].mxu0  ;;  %v1510_v10 = vpop.f32.mrb[45].mxu1  ;;  %v631_v35 = vld [vmem:[#allocation2 + $0x100] sm:$0xff]  ;;  %v2931_v4 = vld [vmem:[%s3662_s4 + $0x18] sm:$0xff] (!%p2550_p11)   ;;  %v2938_v6 = vld [vmem:[%s3661_s3 + $0x50] sm:$0xff] (!%p2550_p11)  }
 0x1ca   : > { %v1511_v11 = vadd.f32 %v1510_v10, %v3344_v25  ;;  %v1312_v13 = vpop.f32.mrb[46].mxu0  ;;  %v2683_v15 = vpop.f32.mrb[46].mxu1  ;;  %2724 = vmatprep.mubr.bf16.mxu1 (!%p2550_p11), %v2938_v6  ;;  %v2934_v9 = vld [vmem:[%s3662_s4 + $0x30] sm:$0xff] (!%p2550_p11)   ;;  %v2937_v10 = vld [vmem:[%s3661_s3 + $0x8] sm:$0xff] (!%p2550_p11)  }
 0x1cb   : > { %v1563_v16 = vadd.f32 %v1487_v7, %v621_v3  ;;  %v1571_v17 = vadd.f32 %v1519_v8, %v629_v5  ;;  %v1490_v18 = vadd.f32 %v2675_v43, %v1312_v13  ;;  %v1522_v19 = vadd.f32 %v2683_v15, %v3350_v37  ;;  %v1314_v20 = vpop.f32.mrb[47].mxu0  ;;  %v1513_v22 = vpop.f32.mrb[47].mxu1  ;;  %v2928_v3 = vld [vmem:[%s3662_s4] sm:$0xff] (!%p2550_p11)   ;;  %v2933_v8 = vld [vmem:[%s3662_s4 + $0x28] sm:$0xff] (!%p2550_p11)  }
 0x1cc   : > { %v1569_v23 = vadd.f32 %v1511_v11, %v627_v0  ;;  %v1514_v33 = vadd.f32 %v1513_v22, %v3346_v29  ;;  %2688 = vmatprep.subr.bf16.mxu0 (!%p2550_p11), %v2928_v3  ;;  %2772 = vmatprep.subr.bf16.mxu1 (!%p2550_p11), %v2928_v3  ;;  %v2936_v5 = vld [vmem:[%s3661_s3] sm:$0xff] (!%p2550_p11)   ;;  %v2935_v0 = vld [vmem:[%s3662_s4 + $0x38] sm:$0xff] (!%p2550_p11)   ;;  %v2943_v15 = vld [vmem:[%s3661_s3 + $0x68] sm:$0xff] (!%p2550_p11)  }
 0x1cd   : > { %1599 = vst [vmem:[#allocation2 + $0xb0] sm:$0xff] %v1563_v16  ;;  %1607 = vst [vmem:[#allocation2 + $0xf0] sm:$0xff] %v1571_v17  ;;  %v1564_v24 = vadd.f32 %v1490_v18, %v622_v12  ;;  %v1572_v26 = vadd.f32 %v1522_v19, %v630_v14  ;;  %2689 = vmatpush3.bf16.msra.mxu0 (!%p2550_p11), %v2928_v3  ;;  %2780 = vmatpush3.bf16.msra.mxu1 (!%p2550_p11), %v2928_v3  ;;  %v2932_v7 = vld [vmem:[%s3662_s4 + $0x20] sm:$0xff] (!%p2550_p11)   ;;  %v2939_v11 = vld [vmem:[%s3661_s3 + $0x58] sm:$0xff] (!%p2550_p11)  }
 0x1ce   : > { %1605 = vst [vmem:[#allocation2 + $0xe0] sm:$0xff] %v1569_v23  ;;  %v1570_v25 = vadd.f32 %v1514_v33, %v628_v21  ;;  %2704 = vmatprep.mubr.bf16.mxu0 (!%p2550_p11), %v2936_v5  ;;  %v2940_v12 = vld [vmem:[%s3661_s3 + $0x10] sm:$0xff] (!%p2550_p11)   ;;  %v2942_v13 = vld [vmem:[%s3661_s3 + $0x60] sm:$0xff] (!%p2550_p11)   ;;  %v2941_v14 = vld [vmem:[%s3661_s3 + $0x18] sm:$0xff] (!%p2550_p11)  }
 0x1cf   : > { %1600 = vst [vmem:[#allocation2 + $0xb8] sm:$0xff] %v1564_v24  ;;  %1608 = vst [vmem:[#allocation2 + $0xf8] sm:$0xff] %v1572_v26  ;;  %v2944_v16 = vld [vmem:[%s3661_s3 + $0x20] sm:$0xff] (!%p2550_p11)   ;;  %v2946_v17 = vld [vmem:[%s3661_s3 + $0x70] sm:$0xff] (!%p2550_p11)  }
 0x1d0   : > { %1606 = vst [vmem:[#allocation2 + $0xe8] sm:$0xff] %v1570_v25  ;;  %v1317_v28 = vpop.f32.mrb[48].mxu0  ;;  %v2686_v31 = vpop.f32.mrb[48].mxu1  ;;  %v2945_v18 = vld [vmem:[%s3661_s3 + $0x28] sm:$0xff] (!%p2550_p11)   ;;  %v2947_v19 = vld [vmem:[%s3661_s3 + $0x78] sm:$0xff] (!%p2550_p11)   ;;  %v2948_v20 = vld [vmem:[%s3661_s3 + $0x30] sm:$0xff] (!%p2550_p11)  }
 0x1d1   : > { %v1495_v37 = vadd.f32 %v1494_v58, %v1317_v28  ;;  %v1535_v32 = vadd.f32 %v2686_v31, %v3356_v49  ;;  %v1319_v34 = vpop.f32.mrb[49].mxu0  ;;  %v1526_v36 = vpop.f32.mrb[49].mxu1  ;;  %v625_v58 = vld [vmem:[#allocation2 + $0xd0] sm:$0xff]  ;;  %v2950_v21 = vld [vmem:[%s3661_s3 + $0x80] sm:$0xff] (!%p2550_p11)   ;;  %v2949_v22 = vld [vmem:[%s3661_s3 + $0x38] sm:$0xff] (!%p2550_p11)  }
 0x1d2   : > { %v1527_v29 = vadd.f32 %v1526_v36, %v3352_v41  ;;  %v1320_v39 = vpop.f32.mrb[50].mxu0  ;;  %v2687_v42 = vpop.f32.mrb[50].mxu1  ;;  %v2951_v23 = vld [vmem:[%s3661_s3 + $0x88] sm:$0xff] (!%p2550_p11)   ;;  %v2952_v33 = vld [vmem:[%s3661_s3 + $0x40] sm:$0xff] (!%p2550_p11)   ;;  %v1619_v26 = vld [vmem:[#allocation2 + $0x10] sm:$0xff] (!%p2550_p11) }
 0x1d3   : > { %v1565_v43 = vadd.f32 %v1495_v37, %v623_v27  ;;  %v1575_v46 = vadd.f32 %v1535_v32, %v633_v30  ;;  %v1498_v47 = vadd.f32 %v1497_v1, %v1320_v39  ;;  %v1538_v48 = vadd.f32 %v2687_v42, %v3358_v53  ;;  %v1322_v50 = vpop.f32.mrb[51].mxu0  ;;  %v1529_v52 = vpop.f32.mrb[51].mxu1  ;;  %v2953_v24 = vld [vmem:[%s3661_s3 + $0x48] sm:$0xff] (!%p2550_p11)   ;;  %v3456_v25 = vld [vmem:[%s3660_s2] ss:$0 sm:$0xff] (!%p2550_p11)  ;;  %v1620_v31 = vld [vmem:[#allocation2 + $0x18] sm:$0xff] (!%p2550_p11) }
 0x1d4   : > { %v1573_v44 = vadd.f32 %v1527_v29, %v631_v35  ;;  %v1530_v49 = vadd.f32 %v1529_v52, %v3354_v45  ;;  %v1639_v27 = vld [vmem:[#allocation2 + $0xb0] sm:$0xff] (!%p2550_p11)  ;;  %v1617_v28 = vld [vmem:[#allocation2] sm:$0xff] (!%p2550_p11)  ;;  %v1662_v32 = vadd.f32 (!%p2550_p11), %v3456_v25, %v1619_v26  ;;  %v1618_v34 = vld [vmem:[#allocation2 + $0x8] sm:$0xff] (!%p2550_p11)  ;;  %v1663_v42 = vadd.f32 (!%p2550_p11), %v3456_v25, %v1620_v31 }
 0x1d5   : > { %1601 = vst [vmem:[#allocation2 + $0xc0] sm:$0xff] %v1565_v43  ;;  %1611 = vst [vmem:[#allocation2 + $0x110] sm:$0xff] %v1575_v46  ;;  %v1566_v55 = vadd.f32 %v1498_v47, %v624_v38  ;;  %v1576_v57 = vadd.f32 %v1538_v48, %v634_v40  ;;  %v1637_v30 = vld [vmem:[#allocation2 + $0xa0] sm:$0xff] (!%p2550_p11)  ;;  %v1682_v35 = vadd.f32 (!%p2550_p11), %v3456_v25, %v1639_v27  ;;  %v1638_v36 = vld [vmem:[#allocation2 + $0xa8] sm:$0xff] (!%p2550_p11) }
 0x1d6   : > { %1609 = vst [vmem:[#allocation2 + $0x100] sm:$0xff] %v1573_v44  ;;  %v1574_v41 = vadd.f32 %v1530_v49, %v632_v51  ;;  %v1640_v37 = vld [vmem:[#allocation2 + $0xb8] sm:$0xff] (!%p2550_p11)  ;;  %v1660_v29 = vadd.f32 (!%p2550_p11), %v3456_v25, %v1617_v28  ;;  %v1680_v38 = vadd.f32 (!%p2550_p11), %v3456_v25, %v1637_v30  ;;  %v1623_v39 = vld [vmem:[#allocation2 + $0x30] sm:$0xff] (!%p2550_p11)  ;;  %v1621_v40 = vld [vmem:[#allocation2 + $0x20] sm:$0xff] (!%p2550_p11)  ;;  %v1661_v51 = vadd.f32 (!%p2550_p11), %v3456_v25, %v1618_v34 }
 0x1d7   : > { %1602 = vst [vmem:[#allocation2 + $0xc8] sm:$0xff] %v1566_v55  ;;  %1612 = vst [vmem:[#allocation2 + $0x118] sm:$0xff] %v1576_v57  ;;  %v1683_v43 = vadd.f32 (!%p2550_p11), %v3456_v25, %v1640_v37  ;;  %v3467_v50 = vld [vmem:[%s3663_s5] ss:$0 sm:$0xff] (!%p2550_p11)  ;;  %v1681_v44 = vadd.f32 (!%p2550_p11), %v3456_v25, %v1638_v36  ;;  %v1647_v26 = vld [vmem:[#allocation2 + $0xf0] sm:$0xff] (!%p2550_p11) }
 0x1d8   : > { %1610 = vst [vmem:[#allocation2 + $0x108] sm:$0xff] %v1574_v41  ;;  %v1325_v59 = vpop.f32.mrb[52].mxu0  ;;  %v1645_v27 = vld [vmem:[#allocation2 + $0xe0] sm:$0xff] (!%p2550_p11) }
 0x1d9   : > { %v1503_v60 = vadd.f32 %v3360_v54, %v1325_v59  ;;  %v1327_v53 = vpop.f32.mrb[53].mxu0  ;;  %1616 = sbr.rel (%p2550_p11) target bundleno = 756 (0x2f4), region = 78  ;;  %v2929_v54 = vld [vmem:[%s3662_s4 + $0x8] sm:$0xff] (!%p2550_p11)   ;;  %v1664_v59 = vadd.f32 (!%p2550_p11), %v3456_v25, %v1621_v40 }
 0x1da   : > { %v1328_v63 = vpop.f32.mrb[54].mxu0  ;;  %2690 = vmatprep.subr.bf16.mxu0 (!%p2550_p11), %v2929_v54  ;;  %2773 = vmatprep.subr.bf16.mxu1 (!%p2550_p11), %v2929_v54 }
 0x1db   : > { %v1567_v56 = vadd.f32 %v1503_v60, %v625_v58  ;;  %v1506_v1 = vadd.f32 %v3362_v61, %v1328_v63  ;;  %v1330_v45 = vpop.f32.mrb[55].mxu0  ;;  %v2930_v61 = vld [vmem:[%s3662_s4 + $0x10] sm:$0xff] (!%p2550_p11)   ;;  %2691 = vmatpush3.bf16.msra.mxu0 (!%p2550_p11), %v2929_v54  ;;  %2781 = vmatpush3.bf16.msra.mxu1 (!%p2550_p11), %v2929_v54  ;;  %v1666_v58 = vadd.f32 (!%p2550_p11), %v3456_v25, %v1623_v39 }
 0x1dc   : > { %2692 = vmatprep.subr.bf16.mxu0 (!%p2550_p11), %v2930_v61  ;;  %2774 = vmatprep.subr.bf16.mxu1 (!%p2550_p11), %v2930_v61  ;;  %v1641_v47 = vld [vmem:[#allocation2 + $0xc0] sm:$0xff] (!%p2550_p11) }
 0x1dd   : > { %1603 = vst [vmem:[#allocation2 + $0xd0] sm:$0xff] %v1567_v56  ;;  %v1568_v2 = vadd.f32 %v1506_v1, %v626_v62  ;;  %v1684_v1 = vadd.f32 (!%p2550_p11), %v3456_v25, %v1641_v47 }
 0x1df   : > { %1604 = vst [vmem:[#allocation2 + $0xd8] sm:$0xff] %v1568_v2  ;;  %2693 = vmatpush3.bf16.msra.mxu0 (!%p2550_p11), %v2930_v61  ;;  %2782 = vmatpush3.bf16.msra.mxu1 (!%p2550_p11), %v2930_v61 }
 0x1e0   : > { %2694 = vmatprep.subr.bf16.mxu0 %v2931_v4  ;;  %2775 = vmatprep.subr.bf16.mxu1 %v2931_v4 }
 0x1e3   : > { %2695 = vmatpush3.bf16.msra.mxu0 %v2931_v4  ;;  %2783 = vmatpush3.bf16.msra.mxu1 %v2931_v4 }
 0x1e4   : > { %2696 = vmatprep.subr.bf16.mxu0 %v2932_v7  ;;  %2776 = vmatprep.subr.bf16.mxu1 %v2932_v7  ;;  %v1643_v46 = vld [vmem:[#allocation2 + $0xd0] sm:$0xff] }
 0x1e5   : > { %v1686_v56 = vadd.f32 %v3456_v25, %v1643_v46 }
 0x1e7   : > { %2697 = vmatpush3.bf16.msra.mxu0 %v2932_v7  ;;  %2784 = vmatpush3.bf16.msra.mxu1 %v2932_v7 }
 0x1e8   : > { %2698 = vmatprep.subr.bf16.mxu0 %v2933_v8  ;;  %2777 = vmatprep.subr.bf16.mxu1 %v2933_v8 }
 0x1eb   : > { %2699 = vmatpush3.bf16.msra.mxu0 %v2933_v8  ;;  %2785 = vmatpush3.bf16.msra.mxu1 %v2933_v8 }
 0x1ec   : > { %2700 = vmatprep.subr.bf16.mxu0 %v2934_v9  ;;  %2778 = vmatprep.subr.bf16.mxu1 %v2934_v9 }
 0x1ef   : > { %2701 = vmatpush3.bf16.msra.mxu0 %v2934_v9  ;;  %2786 = vmatpush3.bf16.msra.mxu1 %v2934_v9  ;;  %v1624_v9 = vld [vmem:[#allocation2 + $0x38] sm:$0xff] }
 0x1f0   : > { %2702 = vmatprep.subr.bf16.mxu0 %v2935_v0  ;;  %2779 = vmatprep.subr.bf16.mxu1 %v2935_v0 }
 0x1f3   : > { %2703 = vmatpush3.bf16.msra.mxu0 %v2935_v0  ;;  %2787 = vmatpush3.bf16.msra.mxu1 %v2935_v0  ;;  %v1644_v0 = vld [vmem:[#allocation2 + $0xd8] sm:$0xff] }
 0x1f6   : > { %2705 = vmatmul.mubr.bf16.vlgmr.msra.gmra.mrb[0].mxu0 %v2937_v10  ;;  %2725 = vmatmul.mubr.bf16.vlgmr.msra.gmra.mrb[0].mxu1 %v2939_v11 }
 0x1f7   : > { %2708 = vmatprep.mubr.bf16.mxu0 %v2940_v12  ;;  %2728 = vmatprep.mubr.bf16.mxu1 %v2942_v13 }
 0x1fe   : > { %2709 = vmatmul.mubr.bf16.gmra.mrb[4].mxu0 %v2941_v14  ;;  %2729 = vmatmul.mubr.bf16.gmra.mrb[4].mxu1 %v2943_v15  ;;  %v1622_v14 = vld [vmem:[#allocation2 + $0x28] sm:$0xff] }
 0x1ff   : > { %2712 = vmatprep.mubr.bf16.mxu0 %v2944_v16  ;;  %2732 = vmatprep.mubr.bf16.mxu1 %v2946_v17  ;;  %v1642_v15 = vld [vmem:[#allocation2 + $0xc8] sm:$0xff]  ;;  %v1665_v37 = vadd.f32 %v3456_v25, %v1622_v14 }
 0x200   : > { %v1685_v34 = vadd.f32 %v3456_v25, %v1642_v15 }
 0x206   : > { %2713 = vmatmul.mubr.bf16.gmra.mrb[8].mxu0 %v2945_v18  ;;  %2733 = vmatmul.mubr.bf16.gmra.mrb[8].mxu1 %v2947_v19 }
 0x207   : > { %2716 = vmatprep.mubr.bf16.mxu0 %v2948_v20  ;;  %2736 = vmatprep.mubr.bf16.mxu1 %v2950_v21  ;;  %v1627_v20 = vld [vmem:[#allocation2 + $0x50] sm:$0xff]  ;;  %v1625_v21 = vld [vmem:[#allocation2 + $0x40] sm:$0xff] }
 0x208   : > { %v1670_v39 = vadd.f32 %v3456_v25, %v1627_v20  ;;  %v1668_v40 = vadd.f32 %v3456_v25, %v1625_v21 }
 0x20e   : > { %2717 = vmatmul.mubr.bf16.gmra.mrb[12].mxu0 %v2949_v22  ;;  %2737 = vmatmul.mubr.bf16.gmra.mrb[12].mxu1 %v2951_v23 }
 0x20f   : > { %2720 = vmatprep.mubr.bf16.mxu0 %v2952_v33  ;;  %v1667_v33 = vadd.f32 %v3456_v25, %v1624_v9 }
 0x216   : > { %2721 = vmatmul.mubr.bf16.gmra.mrb[16].mxu0 %v2953_v24  ;;  %v1687_v24 = vadd.f32 %v3456_v25, %v1644_v0 }
 0x2c9   : > { %v2706_v48 = vpop.f32.mrb[0].mxu0  ;;  %v2726_v52 = vpop.f32.mrb[0].mxu1 }
 0x2ca   : > { %v2083_v49 = vadd.f32 %v2706_v48, %v1662_v32  ;;  %v1938_v55 = vpop.f32.mrb[1].mxu0  ;;  %v2103_v57 = vadd.f32 %v2726_v52, %v1682_v35  ;;  %v2018_v41 = vpop.f32.mrb[1].mxu1  ;;  %v1690_v48 = vadd.f32 %v3456_v25, %v1647_v26 }
 0x2cb   : > { %v2081_v60 = vadd.f32 %v1938_v55, %v1660_v29  ;;  %v2707_v53 = vpop.f32.mrb[2].mxu0  ;;  %v2101_v62 = vadd.f32 %v2018_v41, %v1680_v38  ;;  %v2727_v63 = vpop.f32.mrb[2].mxu1 }
 0x2cc   : > { %v2126_v45 = vadd.f32 %v3467_v50, %v2083_v49  ;;  %v2084_v2 = vadd.f32 %v2707_v53, %v1663_v42  ;;  %v1941_v3 = vpop.f32.mrb[3].mxu0  ;;  %v2146_v54 = vadd.f32 %v3467_v50, %v2103_v57  ;;  %v2104_v61 = vadd.f32 %v2727_v63, %v1683_v43  ;;  %v2021_v4 = vpop.f32.mrb[3].mxu1  ;;  %v1648_v63 = vld [vmem:[#allocation2 + $0xf8] sm:$0xff] }
 0x2cd   : > { %v2124_v5 = vadd.f32 %v3467_v50, %v2081_v60  ;;  %v2082_v6 = vadd.f32 %v1941_v3, %v1661_v51  ;;  %v2144_v7 = vadd.f32 %v3467_v50, %v2101_v62  ;;  %v2102_v8 = vadd.f32 %v2021_v4, %v1681_v44  ;;  %v1628_v62 = vld [vmem:[#allocation2 + $0x58] sm:$0xff]  ;;  %v1626_v3 = vld [vmem:[#allocation2 + $0x48] sm:$0xff] }
 0x2ce   : > { %v2162_v10 = vmax.f32 %v2126_v45, 0.0  ;;  %v2127_v11 = vadd.f32 %v3467_v50, %v2084_v2  ;;  %v2182_v12 = vmax.f32 %v2146_v54, 0.0  ;;  %v2147_v13 = vadd.f32 %v3467_v50, %v2104_v61  ;;  %v1646_v54 = vld [vmem:[#allocation2 + $0xe8] sm:$0xff] }
 0x2cf   : > { %v2160_v16 = vmax.f32 %v2124_v5, 0.0  ;;  %v2125_v17 = vadd.f32 %v3467_v50, %v2082_v6  ;;  %v2180_v18 = vmax.f32 %v2144_v7, 0.0  ;;  %v2145_v19 = vadd.f32 %v3467_v50, %v2102_v8  ;;  %v1631_v7 = vld [vmem:[#allocation2 + $0x70] sm:$0xff]  ;;  %v1629_v8 = vld [vmem:[#allocation2 + $0x60] sm:$0xff] }
 0x2d0   : > { %2198 = vst [vmem:[%s3664_s6 + $0x10] sm:$0xff] %v2162_v10  ;;  %v2163_v22 = vmax.f32 %v2127_v11, 0.0  ;;  %2218 = vst [vmem:[%s3664_s6 + $0xb0] sm:$0xff] %v2182_v12  ;;  %v2183_v23 = vmax.f32 %v2147_v13, 0.0  ;;  %v1688_v51 = vadd.f32 %v3456_v25, %v1645_v27  ;;  %v1671_v10 = vadd.f32 %v3456_v25, %v1628_v62  ;;  %v1651_v12 = vld [vmem:[#allocation2 + $0x110] sm:$0xff]  ;;  %v1649_v13 = vld [vmem:[#allocation2 + $0x100] sm:$0xff] }
 0x2d1   : > { %2196 = vst [vmem:[%s3664_s6] sm:$0xff] %v2160_v16  ;;  %v2161_v28 = vmax.f32 %v2125_v17, 0.0  ;;  %2216 = vst [vmem:[%s3664_s6 + $0xa0] sm:$0xff] %v2180_v18  ;;  %v2710_v30 = vpop.f32.mrb[4].mxu0  ;;  %v2181_v31 = vmax.f32 %v2145_v19, 0.0  ;;  %v2730_v32 = vpop.f32.mrb[4].mxu1  ;;  %v1691_v11 = vadd.f32 %v3456_v25, %v1648_v63  ;;  %v1669_v17 = vadd.f32 %v3456_v25, %v1626_v3 }
 0x2d2   : > { %2199 = vst [vmem:[%s3664_s6 + $0x18] sm:$0xff] %v2163_v22  ;;  %2219 = vst [vmem:[%s3664_s6 + $0xb8] sm:$0xff] %v2183_v23  ;;  %v2087_v35 = vadd.f32 %v2710_v30, %v1666_v58  ;;  %v1954_v36 = vpop.f32.mrb[5].mxu0  ;;  %v2107_v29 = vadd.f32 %v2730_v32, %v1686_v56  ;;  %v2034_v38 = vpop.f32.mrb[5].mxu1  ;;  %v1689_v19 = vadd.f32 %v3456_v25, %v1646_v54 }
 0x2d3   : > { %2197 = vst [vmem:[%s3664_s6 + $0x8] sm:$0xff] %v2161_v28  ;;  %2217 = vst [vmem:[%s3664_s6 + $0xa8] sm:$0xff] %v2181_v31  ;;  %v2085_v42 = vadd.f32 %v1954_v36, %v1664_v59  ;;  %v2711_v43 = vpop.f32.mrb[6].mxu0  ;;  %v2105_v46 = vadd.f32 %v2034_v38, %v1684_v1  ;;  %v2731_v47 = vpop.f32.mrb[6].mxu1  ;;  %v1694_v31 = vadd.f32 %v3456_v25, %v1651_v12 }
 0x2d4   : > { %v2130_v52 = vadd.f32 %v3467_v50, %v2087_v35  ;;  %v2088_v44 = vadd.f32 %v2711_v43, %v1667_v33  ;;  %v1957_v49 = vpop.f32.mrb[7].mxu0  ;;  %v2150_v55 = vadd.f32 %v3467_v50, %v2107_v29  ;;  %v2108_v57 = vadd.f32 %v2731_v47, %v1687_v24  ;;  %v2037_v41 = vpop.f32.mrb[7].mxu1  ;;  %v1652_v47 = vld [vmem:[#allocation2 + $0x118] sm:$0xff] }
 0x2d5   : > { %v2128_v58 = vadd.f32 %v3467_v50, %v2085_v42  ;;  %v2086_v60 = vadd.f32 %v1957_v49, %v1665_v37  ;;  %v2148_v59 = vadd.f32 %v3467_v50, %v2105_v46  ;;  %v2106_v53 = vadd.f32 %v2037_v41, %v1685_v34  ;;  %v1632_v46 = vld [vmem:[#allocation2 + $0x78] sm:$0xff]  ;;  %v1630_v49 = vld [vmem:[#allocation2 + $0x68] sm:$0xff] }
 0x2d6   : > { %v2166_v56 = vmax.f32 %v2130_v52, 0.0  ;;  %v2131_v1 = vadd.f32 %v3467_v50, %v2088_v44  ;;  %v2186_v45 = vmax.f32 %v2150_v55, 0.0  ;;  %v2151_v2 = vadd.f32 %v3467_v50, %v2108_v57  ;;  %v1650_v55 = vld [vmem:[#allocation2 + $0x108] sm:$0xff] }
 0x2d7   : > { %v2164_v61 = vmax.f32 %v2128_v58, 0.0  ;;  %v2129_v4 = vadd.f32 %v3467_v50, %v2086_v60  ;;  %v2184_v5 = vmax.f32 %v2148_v59, 0.0  ;;  %v2149_v6 = vadd.f32 %v3467_v50, %v2106_v53 }
 0x2d8   : > { %2202 = vst [vmem:[%s3664_s6 + $0x30] sm:$0xff] %v2166_v56  ;;  %v2167_v9 = vmax.f32 %v2131_v1, 0.0  ;;  %2222 = vst [vmem:[%s3664_s6 + $0xd0] sm:$0xff] %v2186_v45  ;;  %v2187_v0 = vmax.f32 %v2151_v2, 0.0  ;;  %v1674_v33 = vadd.f32 %v3456_v25, %v1631_v7  ;;  %v1672_v24 = vadd.f32 %v3456_v25, %v1629_v8  ;;  %v1635_v56 = vld [vmem:[#allocation2 + $0x90] sm:$0xff]  ;;  %v1633_v1 = vld [vmem:[#allocation2 + $0x80] sm:$0xff] }
 0x2d9   : > { %2200 = vst [vmem:[%s3664_s6 + $0x20] sm:$0xff] %v2164_v61  ;;  %v2165_v14 = vmax.f32 %v2129_v4, 0.0  ;;  %2220 = vst [vmem:[%s3664_s6 + $0xc0] sm:$0xff] %v2184_v5  ;;  %v2714_v15 = vpop.f32.mrb[8].mxu0  ;;  %v2185_v16 = vmax.f32 %v2149_v6, 0.0  ;;  %v2734_v18 = vpop.f32.mrb[8].mxu1  ;;  %v1692_v37 = vadd.f32 %v3456_v25, %v1649_v13  ;;  %v1675_v62 = vadd.f32 %v3456_v25, %v1632_v46 }
 0x2da   : > { %2203 = vst [vmem:[%s3664_s6 + $0x38] sm:$0xff] %v2167_v9  ;;  %2223 = vst [vmem:[%s3664_s6 + $0xd8] sm:$0xff] %v2187_v0  ;;  %v2091_v20 = vadd.f32 %v2714_v15, %v1670_v39  ;;  %v1970_v21 = vpop.f32.mrb[9].mxu0  ;;  %v2111_v22 = vadd.f32 %v2734_v18, %v1690_v48  ;;  %v2050_v23 = vpop.f32.mrb[9].mxu1  ;;  %v1695_v63 = vadd.f32 %v3456_v25, %v1652_v47 }
 0x2db   : > { %2201 = vst [vmem:[%s3664_s6 + $0x28] sm:$0xff] %v2165_v14  ;;  %2221 = vst [vmem:[%s3664_s6 + $0xc8] sm:$0xff] %v2185_v16  ;;  %v2089_v26 = vadd.f32 %v1970_v21, %v1668_v40  ;;  %v2715_v27 = vpop.f32.mrb[10].mxu0  ;;  %v2109_v28 = vadd.f32 %v2050_v23, %v1688_v51  ;;  %v2735_v30 = vpop.f32.mrb[10].mxu1  ;;  %v1673_v54 = vadd.f32 %v3456_v25, %v1630_v49 }
 0x2dc   : > { %v2134_v32 = vadd.f32 %v3467_v50, %v2091_v20  ;;  %v2092_v34 = vadd.f32 %v2715_v27, %v1671_v10  ;;  %v1973_v35 = vpop.f32.mrb[11].mxu0  ;;  %v2154_v36 = vadd.f32 %v3467_v50, %v2111_v22  ;;  %v2112_v29 = vadd.f32 %v2735_v30, %v1691_v11  ;;  %v2053_v38 = vpop.f32.mrb[11].mxu1  ;;  %v1634_v30 = vld [vmem:[#allocation2 + $0x88] sm:$0xff] }
 0x2dd   : > { %v2132_v39 = vadd.f32 %v3467_v50, %v2089_v26  ;;  %v2090_v42 = vadd.f32 %v1973_v35, %v1669_v17  ;;  %v2152_v40 = vadd.f32 %v3467_v50, %v2109_v28  ;;  %v2110_v43 = vadd.f32 %v2053_v38, %v1689_v19 }
 0x2de   : > { %v2170_v48 = vmax.f32 %v2134_v32, 0.0  ;;  %v2135_v51 = vadd.f32 %v3467_v50, %v2092_v34  ;;  %v2190_v52 = vmax.f32 %v2154_v36, 0.0  ;;  %v2155_v44 = vadd.f32 %v3467_v50, %v2112_v29 }
 0x2df   : > { %v2168_v57 = vmax.f32 %v2132_v39, 0.0  ;;  %v2133_v41 = vadd.f32 %v3467_v50, %v2090_v42  ;;  %v2188_v58 = vmax.f32 %v2152_v40, 0.0  ;;  %v2153_v60 = vadd.f32 %v3467_v50, %v2110_v43 }
 0x2e0   : > { %2206 = vst [vmem:[%s3664_s6 + $0x50] sm:$0xff] %v2170_v48  ;;  %v2171_v59 = vmax.f32 %v2135_v51, 0.0  ;;  %2226 = vst [vmem:[%s3664_s6 + $0xf0] sm:$0xff] %v2190_v52  ;;  %v2191_v53 = vmax.f32 %v2155_v44, 0.0  ;;  %v1693_v4 = vadd.f32 %v3456_v25, %v1650_v55  ;;  %v1678_v12 = vadd.f32 %v3456_v25, %v1635_v56 }
 0x2e1   : > { %2204 = vst [vmem:[%s3664_s6 + $0x40] sm:$0xff] %v2168_v57  ;;  %v2169_v45 = vmax.f32 %v2133_v41, 0.0  ;;  %2224 = vst [vmem:[%s3664_s6 + $0xe0] sm:$0xff] %v2188_v58  ;;  %v2718_v2 = vpop.f32.mrb[12].mxu0  ;;  %v2189_v3 = vmax.f32 %v2153_v60, 0.0  ;;  %v2738_v61 = vpop.f32.mrb[12].mxu1  ;;  %v1676_v13 = vadd.f32 %v3456_v25, %v1633_v1  ;;  %v1677_v40 = vadd.f32 %v3456_v25, %v1634_v30 }
 0x2e2   : > { %2207 = vst [vmem:[%s3664_s6 + $0x58] sm:$0xff] %v2171_v59  ;;  %2227 = vst [vmem:[%s3664_s6 + $0xf8] sm:$0xff] %v2191_v53  ;;  %v2095_v5 = vadd.f32 %v2718_v2, %v1674_v33  ;;  %v1986_v6 = vpop.f32.mrb[13].mxu0  ;;  %v2115_v7 = vadd.f32 %v2738_v61, %v1694_v31  ;;  %v2066_v8 = vpop.f32.mrb[13].mxu1  ;;  %v1636_v33 = vld [vmem:[#allocation2 + $0x98] sm:$0xff] }
 0x2e3   : > { %2205 = vst [vmem:[%s3664_s6 + $0x48] sm:$0xff] %v2169_v45  ;;  %2225 = vst [vmem:[%s3664_s6 + $0xe8] sm:$0xff] %v2189_v3  ;;  %v2093_v9 = vadd.f32 %v1986_v6, %v1672_v24  ;;  %v2719_v0 = vpop.f32.mrb[14].mxu0  ;;  %v2113_v10 = vadd.f32 %v2066_v8, %v1692_v37  ;;  %v2739_v11 = vpop.f32.mrb[14].mxu1  ;;  %v1679_v29 = vadd.f32 %v3456_v25, %v1636_v33 }
 0x2e4   : > { %v2138_v14 = vadd.f32 %v3467_v50, %v2095_v5  ;;  %v2096_v15 = vadd.f32 %v2719_v0, %v1675_v62  ;;  %v1989_v16 = vpop.f32.mrb[15].mxu0  ;;  %v2158_v17 = vadd.f32 %v3467_v50, %v2115_v7  ;;  %v2116_v18 = vadd.f32 %v2739_v11, %v1695_v63  ;;  %v2069_v19 = vpop.f32.mrb[15].mxu1 }
 0x2e5   : > { %v2136_v20 = vadd.f32 %v3467_v50, %v2093_v9  ;;  %v2094_v21 = vadd.f32 %v1989_v16, %v1673_v54  ;;  %v2156_v22 = vadd.f32 %v3467_v50, %v2113_v10  ;;  %v2114_v23 = vadd.f32 %v2069_v19, %v1693_v4 }
 0x2e6   : > { %v2174_v24 = vmax.f32 %v2138_v14, 0.0  ;;  %v2139_v26 = vadd.f32 %v3467_v50, %v2096_v15  ;;  %v2194_v27 = vmax.f32 %v2158_v17, 0.0  ;;  %v2159_v28 = vadd.f32 %v3467_v50, %v2116_v18 }
 0x2e7   : > { %v2172_v31 = vmax.f32 %v2136_v20, 0.0  ;;  %v2137_v37 = vadd.f32 %v3467_v50, %v2094_v21  ;;  %v2192_v32 = vmax.f32 %v2156_v22, 0.0  ;;  %v2157_v34 = vadd.f32 %v3467_v50, %v2114_v23 }
 0x2e8   : > { %2210 = vst [vmem:[%s3664_s6 + $0x70] sm:$0xff] %v2174_v24  ;;  %v2175_v35 = vmax.f32 %v2139_v26, 0.0  ;;  %2230 = vst [vmem:[%s3664_s6 + $0x110] sm:$0xff] %v2194_v27  ;;  %v2195_v36 = vmax.f32 %v2159_v28, 0.0 }
 0x2e9   : > { %2208 = vst [vmem:[%s3664_s6 + $0x60] sm:$0xff] %v2172_v31  ;;  %v2173_v38 = vmax.f32 %v2137_v37, 0.0  ;;  %2228 = vst [vmem:[%s3664_s6 + $0x100] sm:$0xff] %v2192_v32  ;;  %v2722_v39 = vpop.f32.mrb[16].mxu0  ;;  %v2193_v42 = vmax.f32 %v2157_v34, 0.0 }
 0x2ea   : > { %2211 = vst [vmem:[%s3664_s6 + $0x78] sm:$0xff] %v2175_v35  ;;  %2231 = vst [vmem:[%s3664_s6 + $0x118] sm:$0xff] %v2195_v36  ;;  %v2099_v43 = vadd.f32 %v2722_v39, %v1678_v12  ;;  %v2002_v46 = vpop.f32.mrb[17].mxu0 }
 0x2eb   : > { %2209 = vst [vmem:[%s3664_s6 + $0x68] sm:$0xff] %v2173_v38  ;;  %2229 = vst [vmem:[%s3664_s6 + $0x108] sm:$0xff] %v2193_v42  ;;  %v2097_v47 = vadd.f32 %v2002_v46, %v1676_v13  ;;  %v2723_v25 = vpop.f32.mrb[18].mxu0 }
 0x2ec   : > { %v2142_v48 = vadd.f32 %v3467_v50, %v2099_v43  ;;  %v2100_v51 = vadd.f32 %v2723_v25, %v1679_v29  ;;  %v2005_v52 = vpop.f32.mrb[19].mxu0 }
 0x2ed   : > { %v2140_v44 = vadd.f32 %v3467_v50, %v2097_v47  ;;  %v2098_v49 = vadd.f32 %v2005_v52, %v1677_v40 }
 0x2ee   : > { %v2178_v55 = vmax.f32 %v2142_v48, 0.0  ;;  %v2143_v57 = vadd.f32 %v3467_v50, %v2100_v51 }
 0x2ef   : > { %v2176_v41 = vmax.f32 %v2140_v44, 0.0  ;;  %v2141_v58 = vadd.f32 %v3467_v50, %v2098_v49 }
 0x2f0   : > { %2214 = vst [vmem:[%s3664_s6 + $0x90] sm:$0xff] %v2178_v55  ;;  %v2179_v60 = vmax.f32 %v2143_v57, 0.0 }
 0x2f1   : > { %2212 = vst [vmem:[%s3664_s6 + $0x80] sm:$0xff] %v2176_v41  ;;  %v2177_v59 = vmax.f32 %v2141_v58, 0.0 }
 0x2f2   : > { %2215 = vst [vmem:[%s3664_s6 + $0x98] sm:$0xff] %v2179_v60 }
 0x2f3   : > { %2213 = vst [vmem:[%s3664_s6 + $0x88] sm:$0xff] %v2177_v59 }
 0x2f4 PF: > { %s16_s25 = sadd.s32 1, %s2992_s25   ;;  %s3665_s21 = smov %s2980_s22 }
 0x2f5   : > { %p13_p12 = scmp.ge.s32.totalorder %s16_s25, 5   ;;  %s3666_s22 = smov %s3066_s29 }
 0x2f6   : > { %s3667_s23 = smov %s2988_s24  ;;  %s3668_s24 = smov %s3670_s26 }
 0x2f7   :  { %15 = sbr.rel (!%p13_p12) target bundleno = 3 (0x3), region = 134 }

</bundles_post_ra>
